<compile_context>
chip_gen: v5e
topology: v5e:2x2
jax: 0.10.0
libtpu: 0.0.40
codegen_flags: <defaults>
</compile_context>

<pallas_src>
import numpy as np

import jax
import jax.numpy as jnp
from jax.experimental import pallas as pl
from jax.experimental.pallas import tpu as pltpu


TILE_B = 8          # images per grid step (batch is padded to a multiple of this)

_CONST_ORDER = (
    "band1", "bias1", "rowpool1", "colpool1", "rowshift2",
    "band2", "bias2", "rowpool2", "colpool2", "fcsel",
    "wfc1", "bfc1", "wfc2", "bfc2", "wout", "bout",
)


def _dot(a, b):
    return jnp.dot(a, b, preferred_element_type=jnp.float32)


# ---------------------------------------------------------------------------
# Fused kernel: whole forward pass for one batch tile of TILE_B images.
# Activation layout through the conv stages: rows = (image, row-in-image),
# lanes = (channel, column-in-image).  All data movement (pooling, row shifts,
# NCHW flatten) is done with constant 0/1 selection matmuls on the MXU, so no
# reshuffles leave VMEM.
# ---------------------------------------------------------------------------
def lenet_kernel(x_ref, band1, bias1, rowpool1, colpool1, rowshift2,
                 band2, bias2, rowpool2, colpool2, fcsel,
                 wfc1, bfc1, wfc2, bfc2, wout, bout, out_ref):
    tb = x_ref.shape[0]

    # ---- conv1 (5x5, 1->6) + bias + ReLU: rows (n,i) x lanes (o*24 + j) ----
    # band1[di][w, o*24+j] = conv1_w[o, 0, di, w-j]; summing the 5 banded
    # matmuls over the row offset di is exactly the valid 5x5 convolution.
    acc1 = _dot(x_ref[:, 0:24, :].reshape(tb * 24, 28), band1[0])
    for di in range(1, 5):
        acc1 = acc1 + _dot(x_ref[:, di:di + 24, :].reshape(tb * 24, 28), band1[di])
    y1 = jnp.maximum(acc1 + bias1[...], 0.0)                         # (tb*24, 144)

    # ---- 2x2 max-pool, stride 2 (rows, then columns, via selection matmuls) -
    r1 = jnp.maximum(_dot(rowpool1[0], y1), _dot(rowpool1[1], y1))   # (tb*12, 144)
    z1 = jnp.maximum(_dot(r1, colpool1[0]), _dot(r1, colpool1[1]))   # (tb*12, 72)

    # ---- conv2 (5x5, 6->12) + bias + ReLU: rows (n,i) x lanes (o*8 + j) -----
    acc2 = _dot(_dot(rowshift2[0], z1), band2[0])
    for di in range(1, 5):
        acc2 = acc2 + _dot(_dot(rowshift2[di], z1), band2[di])
    y2 = jnp.maximum(acc2 + bias2[...], 0.0)                         # (tb*8, 96)

    # ---- 2x2 max-pool -------------------------------------------------------
    r2 = jnp.maximum(_dot(rowpool2[0], y2), _dot(rowpool2[1], y2))   # (tb*4, 96)
    z2 = jnp.maximum(_dot(r2, colpool2[0]), _dot(r2, colpool2[1]))   # (tb*4, 48)

    # ---- fc1 + ReLU (torch NCHW flatten folded into fcsel / wfc1) ----------
    h1 = _dot(_dot(fcsel[0], z2), wfc1[0])
    for i2 in range(1, 4):
        h1 = h1 + _dot(_dot(fcsel[i2], z2), wfc1[i2])
    h1 = jnp.maximum(h1 + bfc1[...], 0.0)                            # (tb, 120)

    # ---- fc2 + ReLU ---------------------------------------------------------
    h2 = jnp.maximum(_dot(h1, wfc2[...]) + bfc2[...], 0.0)           # (tb, 60)

    # ---- out + softmax(dim=1) ----------------------------------------------
    logits = _dot(h2, wout[...]) + bout[...]                         # (tb, 10)
    m = jnp.max(logits, axis=-1, keepdims=True)
    e = jnp.exp(logits - m)
    s = jnp.sum(e, axis=-1, keepdims=True)
    inv = pl.reciprocal(s, approx=True)
    inv = inv * (2.0 - s * inv)      # one Newton step -> ~f32-exact normalization
    out_ref[...] = e * inv


# ---------------------------------------------------------------------------
# One-time packing of the PyTorch-layout parameters into kernel constants.
# ---------------------------------------------------------------------------
def prepare_constants(params, tb=TILE_B):
    w1 = np.asarray(params["conv1_w"], np.float32)     # (6, 1, 5, 5)
    b1 = np.asarray(params["conv1_b"], np.float32)     # (6,)
    w2 = np.asarray(params["conv2_w"], np.float32)     # (12, 6, 5, 5)
    b2 = np.asarray(params["conv2_b"], np.float32)     # (12,)
    fc1_w = np.asarray(params["fc1_w"], np.float32)    # (120, 192)
    fc1_b = np.asarray(params["fc1_b"], np.float32)
    fc2_w = np.asarray(params["fc2_w"], np.float32)    # (60, 120)
    fc2_b = np.asarray(params["fc2_b"], np.float32)
    out_w = np.asarray(params["out_w"], np.float32)    # (10, 60)
    out_b = np.asarray(params["out_b"], np.float32)

    def band(w, w_in, w_out):
        # B[di, c*w_in + (j+dj), o*w_out + j] = w[o, c, di, dj]
        o_ch, c_ch, k, _ = w.shape
        mat = np.zeros((k, c_ch * w_in, o_ch * w_out), np.float32)
        for di in range(k):
            for o in range(o_ch):
                for c in range(c_ch):
                    for j in range(w_out):
                        for dj in range(k):
                            mat[di, c * w_in + j + dj, o * w_out + j] = w[o, c, di, dj]
        return mat

    def row_pool(n_img, rin, rout):
        s = np.zeros((2, n_img * rout, n_img * rin), np.float32)
        for n in range(n_img):
            for i in range(rout):
                s[0, n * rout + i, n * rin + 2 * i] = 1.0
                s[1, n * rout + i, n * rin + 2 * i + 1] = 1.0
        return s

    def col_pool(ch, win, wout):
        s = np.zeros((2, ch * win, ch * wout), np.float32)
        for c in range(ch):
            for j in range(wout):
                s[0, c * win + 2 * j, c * wout + j] = 1.0
                s[1, c * win + 2 * j + 1, c * wout + j] = 1.0
        return s

    def row_shift(n_img, rin, rout, k):
        s = np.zeros((k, n_img * rout, n_img * rin), np.float32)
        for di in range(k):
            for n in range(n_img):
                for i in range(rout):
                    s[di, n * rout + i, n * rin + i + di] = 1.0
        return s

    fcsel = np.zeros((4, tb, tb * 4), np.float32)
    for i2 in range(4):
        for n in range(tb):
            fcsel[i2, n, n * 4 + i2] = 1.0

    # fc1 weight grouped by pooled row index i2 so that
    #   h1 = sum_i2 (fcsel[i2] @ z2) @ wfc1[i2]
    # reproduces torch's fc1(t.reshape(-1, 12*4*4))  (NCHW flatten c*16+i2*4+j2).
    wfc1 = fc1_w.T.reshape(12, 4, 4, 120).transpose(1, 0, 2, 3).reshape(4, 48, 120)

    consts = dict(
        band1=band(w1, 28, 24),                  # (5, 28, 144)
        bias1=np.repeat(b1, 24)[None, :],        # (1, 144)
        rowpool1=row_pool(tb, 24, 12),           # (2, 12*tb, 24*tb)
        colpool1=col_pool(6, 24, 12),            # (2, 144, 72)
        rowshift2=row_shift(tb, 12, 8, 5),       # (5, 8*tb, 12*tb)
        band2=band(w2, 12, 8),                   # (5, 72, 96)
        bias2=np.repeat(b2, 8)[None, :],         # (1, 96)
        rowpool2=row_pool(tb, 8, 4),             # (2, 4*tb, 8*tb)
        colpool2=col_pool(12, 8, 4),             # (2, 96, 48)
        fcsel=fcsel,                             # (4, tb, 4*tb)
        wfc1=np.ascontiguousarray(wfc1),         # (4, 48, 120)
        bfc1=fc1_b[None, :],                     # (1, 120)
        wfc2=np.ascontiguousarray(fc2_w.T),      # (120, 60)
        bfc2=fc2_b[None, :],                     # (1, 60)
        wout=np.ascontiguousarray(out_w.T),      # (60, 10)
        bout=out_b[None, :],                     # (1, 10)
    )
    return {k: jnp.asarray(v) for k, v in consts.items()}


# ---------------------------------------------------------------------------
# Host wrapper: one pallas_call, grid over batch tiles.
# ---------------------------------------------------------------------------
@jax.jit
def network_forward(consts, x):
    # x: (N, 1, 28, 28) float32 -> (N, 10) softmax probabilities.
    n = x.shape[0]
    npad = ((n + TILE_B - 1) // TILE_B) * TILE_B
    xs = x.reshape(n, 28, 28).astype(jnp.float32)
    if npad != n:
        xs = jnp.pad(xs, ((0, npad - n), (0, 0), (0, 0)))

    def const_spec(arr):
        zeros = (0,) * arr.ndim
        return pl.BlockSpec(arr.shape, lambda b, _z=zeros: _z)

    in_specs = [pl.BlockSpec((TILE_B, 28, 28), lambda b: (b, 0, 0))]
    in_specs += [const_spec(consts[k]) for k in _CONST_ORDER]

    out = pl.pallas_call(
        lenet_kernel,
        out_shape=jax.ShapeDtypeStruct((npad, 10), jnp.float32),
        grid=(npad // TILE_B,),
        in_specs=in_specs,
        out_specs=pl.BlockSpec((TILE_B, 10), lambda b: (b, 0)),
        compiler_params=pltpu.CompilerParams(
            dimension_semantics=("parallel",),
            vmem_limit_bytes=32 * 1024 * 1024,
        ),
    )(xs, *[consts[k] for k in _CONST_ORDER])
    return out[:n]


# ---------------------------------------------------------------------------
# Parameters (deterministic, PyTorch-like uniform fan-in init)
# ---------------------------------------------------------------------------
def init_params(key):
    ks = jax.random.split(key, 10)

    def u(k, shape, fan_in):
        bound = 1.0 / (fan_in ** 0.5)
        return jax.random.uniform(k, shape, jnp.float32, -bound, bound)

    return {
        "conv1_w": u(ks[0], (6, 1, 5, 5), 1 * 5 * 5),
        "conv1_b": u(ks[1], (6,), 1 * 5 * 5),
        "conv2_w": u(ks[2], (12, 6, 5, 5), 6 * 5 * 5),
        "conv2_b": u(ks[3], (12,), 6 * 5 * 5),
        "fc1_w": u(ks[4], (120, 12 * 4 * 4), 12 * 4 * 4),
        "fc1_b": u(ks[5], (120,), 12 * 4 * 4),
        "fc2_w": u(ks[6], (60, 120), 120),
        "fc2_b": u(ks[7], (60,), 120),
        "out_w": u(ks[8], (10, 60), 60),
        "out_b": u(ks[9], (10,), 60),
    }


# ---------------------------------------------------------------------------
# Pure-JAX reference (mirrors Network.forward exactly) -- used as a self-check.
# ---------------------------------------------------------------------------
def reference_forward(params, x):
    def conv2d(inp, w, b):
        n, c, h, wd = inp.shape
        o, _, k, _ = w.shape
        oh, ow = h - k + 1, wd - k + 1
        patches = [inp[:, :, di:di + oh, dj:dj + ow]
                   for di in range(k) for dj in range(k)]
        p = jnp.stack(patches, axis=2).reshape(n, c * k * k, oh * ow)
        p = jnp.transpose(p, (0, 2, 1)).reshape(n * oh * ow, c * k * k)
        y = p @ w.reshape(o, c * k * k).T + b
        return y.reshape(n, oh, ow, o).transpose(0, 3, 1, 2)

    def pool2x2(t):
        return jnp.maximum(
            jnp.maximum(t[:, :, 0::2, 0::2], t[:, :, 0::2, 1::2]),
            jnp.maximum(t[:, :, 1::2, 0::2], t[:, :, 1::2, 1::2]))

    t = pool2x2(jax.nn.relu(conv2d(x, params["conv1_w"], params["conv1_b"])))
    t = pool2x2(jax.nn.relu(conv2d(t, params["conv2_w"], params["conv2_b"])))
    t = t.reshape(-1, 12 * 4 * 4)
    t = jax.nn.relu(t @ params["fc1_w"].T + params["fc1_b"])
    t = jax.nn.relu(t @ params["fc2_w"].T + params["fc2_b"])
    t = t @ params["out_w"].T + params["out_b"]
    return jax.nn.softmax(t, axis=1)


if __name__ == "__main__":
    key = jax.random.PRNGKey(0)
    k_params, k_x = jax.random.split(key)
    params = init_params(k_params)
    consts = prepare_constants(params)
    # Input shape implied by the module: 28x28 single-channel images (MNIST).
    x = jax.random.normal(k_x, (2, 1, 28, 28), dtype=jnp.float32)

    out = jax.block_until_ready(network_forward(consts, x))
    assert out.shape == (2, 10), out.shape

    # softmax rows must sum to 1
    row_sums = jnp.sum(out, axis=1)
    assert jnp.allclose(row_sums, jnp.ones_like(row_sums), atol=1e-4), row_sums

    # compare against the pure-JAX reference of the same network; tolerance
    # allows for MXU f32 pass-decomposition differences vs the XLA reference.
    ref = jax.block_until_ready(reference_forward(params, x))
    err = float(jnp.max(jnp.abs(out - ref)))
    assert err < 2e-2, err

    print("KERNEL_OK")
</pallas_src>

<mosaic_0001>
module attributes {stable_mosaic.version = 11 : i64} {
  func.func @lenet_kernel(%arg0: i32, %arg1: memref<8x28x28xf32, #tpu.memory_space<vmem>>, %arg2: memref<5x28x144xf32, #tpu.memory_space<vmem>>, %arg3: memref<1x144xf32, #tpu.memory_space<vmem>>, %arg4: memref<2x96x192xf32, #tpu.memory_space<vmem>>, %arg5: memref<2x144x72xf32, #tpu.memory_space<vmem>>, %arg6: memref<5x64x96xf32, #tpu.memory_space<vmem>>, %arg7: memref<5x72x96xf32, #tpu.memory_space<vmem>>, %arg8: memref<1x96xf32, #tpu.memory_space<vmem>>, %arg9: memref<2x32x64xf32, #tpu.memory_space<vmem>>, %arg10: memref<2x96x48xf32, #tpu.memory_space<vmem>>, %arg11: memref<4x8x32xf32, #tpu.memory_space<vmem>>, %arg12: memref<4x48x120xf32, #tpu.memory_space<vmem>>, %arg13: memref<1x120xf32, #tpu.memory_space<vmem>>, %arg14: memref<120x60xf32, #tpu.memory_space<vmem>>, %arg15: memref<1x60xf32, #tpu.memory_space<vmem>>, %arg16: memref<60x10xf32, #tpu.memory_space<vmem>>, %arg17: memref<1x10xf32, #tpu.memory_space<vmem>>, %arg18: memref<8x10xf32, #tpu.memory_space<vmem>>) attributes {dimension_semantics = [#tpu.dimension_semantics<parallel>], iteration_bounds = array<i64: 1>, scalar_prefetch = 0 : i64, scratch_operands = 0 : i64, tpu.core_type = #tpu.core_type<tc>, window_params = [{transform_indices = @transform_0, window_bounds = array<i64: 8, 28, 28>}, {pipeline_mode = #tpu.pipeline_mode<synchronous>, transform_indices = @transform_1, window_bounds = array<i64: 5, 28, 144>}, {pipeline_mode = #tpu.pipeline_mode<synchronous>, transform_indices = @transform_2, window_bounds = array<i64: 1, 144>}, {pipeline_mode = #tpu.pipeline_mode<synchronous>, transform_indices = @transform_3, window_bounds = array<i64: 2, 96, 192>}, {pipeline_mode = #tpu.pipeline_mode<synchronous>, transform_indices = @transform_4, window_bounds = array<i64: 2, 144, 72>}, {pipeline_mode = #tpu.pipeline_mode<synchronous>, transform_indices = @transform_5, window_bounds = array<i64: 5, 64, 96>}, {pipeline_mode = #tpu.pipeline_mode<synchronous>, transform_indices = @transform_6, window_bounds = array<i64: 5, 72, 96>}, {pipeline_mode = #tpu.pipeline_mode<synchronous>, transform_indices = @transform_7, window_bounds = array<i64: 1, 96>}, {pipeline_mode = #tpu.pipeline_mode<synchronous>, transform_indices = @transform_8, window_bounds = array<i64: 2, 32, 64>}, {pipeline_mode = #tpu.pipeline_mode<synchronous>, transform_indices = @transform_9, window_bounds = array<i64: 2, 96, 48>}, {pipeline_mode = #tpu.pipeline_mode<synchronous>, transform_indices = @transform_10, window_bounds = array<i64: 4, 8, 32>}, {pipeline_mode = #tpu.pipeline_mode<synchronous>, transform_indices = @transform_11, window_bounds = array<i64: 4, 48, 120>}, {pipeline_mode = #tpu.pipeline_mode<synchronous>, transform_indices = @transform_12, window_bounds = array<i64: 1, 120>}, {pipeline_mode = #tpu.pipeline_mode<synchronous>, transform_indices = @transform_13, window_bounds = array<i64: 120, 60>}, {pipeline_mode = #tpu.pipeline_mode<synchronous>, transform_indices = @transform_14, window_bounds = array<i64: 1, 60>}, {pipeline_mode = #tpu.pipeline_mode<synchronous>, transform_indices = @transform_15, window_bounds = array<i64: 60, 10>}, {pipeline_mode = #tpu.pipeline_mode<synchronous>, transform_indices = @transform_16, window_bounds = array<i64: 1, 10>}, {transform_indices = @transform_17, window_bounds = array<i64: 8, 10>}]} {
    %c0 = arith.constant 0 : index
    %c0_0 = arith.constant 0 : index
    %c0_1 = arith.constant 0 : index
    %0 = vector.load %arg1[%c0, %c0_0, %c0_1] : memref<8x28x28xf32, #tpu.memory_space<vmem>>, vector<8x24x28xf32>
    %1 = vector.shape_cast %0 : vector<8x24x28xf32> to vector<192x28xf32>
    %c0_2 = arith.constant 0 : index
    %c0_3 = arith.constant 0 : index
    %c0_4 = arith.constant 0 : index
    %2 = vector.load %arg2[%c0_2, %c0_3, %c0_4] : memref<5x28x144xf32, #tpu.memory_space<vmem>>, vector<1x28x144xf32>
    %3 = vector.shape_cast %2 : vector<1x28x144xf32> to vector<28x144xf32>
    %cst = arith.constant dense<0.000000e+00> : vector<192x144xf32>
    %4 = tpu.matmul %1, %3, %cst {dimension_numbers = #tpu.dot_dimension_numbers<[1], [0], [0], [1], [0, 0, 1, 1], [], []>} : vector<192x28xf32>, vector<28x144xf32>, vector<192x144xf32> -> vector<192x144xf32>
    %c0_5 = arith.constant 0 : index
    %c1 = arith.constant 1 : index
    %c0_6 = arith.constant 0 : index
    %5 = vector.load %arg1[%c0_5, %c1, %c0_6] : memref<8x28x28xf32, #tpu.memory_space<vmem>>, vector<8x24x28xf32>
    %6 = vector.shape_cast %5 : vector<8x24x28xf32> to vector<192x28xf32>
    %c1_7 = arith.constant 1 : index
    %c0_8 = arith.constant 0 : index
    %c0_9 = arith.constant 0 : index
    %7 = vector.load %arg2[%c1_7, %c0_8, %c0_9] : memref<5x28x144xf32, #tpu.memory_space<vmem>>, vector<1x28x144xf32>
    %8 = vector.shape_cast %7 : vector<1x28x144xf32> to vector<28x144xf32>
    %cst_10 = arith.constant dense<0.000000e+00> : vector<192x144xf32>
    %9 = tpu.matmul %6, %8, %cst_10 {dimension_numbers = #tpu.dot_dimension_numbers<[1], [0], [0], [1], [0, 0, 1, 1], [], []>} : vector<192x28xf32>, vector<28x144xf32>, vector<192x144xf32> -> vector<192x144xf32>
    %10 = arith.addf %4, %9 : vector<192x144xf32>
    %c0_11 = arith.constant 0 : index
    %c2 = arith.constant 2 : index
    %c0_12 = arith.constant 0 : index
    %11 = vector.load %arg1[%c0_11, %c2, %c0_12] : memref<8x28x28xf32, #tpu.memory_space<vmem>>, vector<8x24x28xf32>
    %12 = vector.shape_cast %11 : vector<8x24x28xf32> to vector<192x28xf32>
    %c2_13 = arith.constant 2 : index
    %c0_14 = arith.constant 0 : index
    %c0_15 = arith.constant 0 : index
    %13 = vector.load %arg2[%c2_13, %c0_14, %c0_15] : memref<5x28x144xf32, #tpu.memory_space<vmem>>, vector<1x28x144xf32>
    %14 = vector.shape_cast %13 : vector<1x28x144xf32> to vector<28x144xf32>
    %cst_16 = arith.constant dense<0.000000e+00> : vector<192x144xf32>
    %15 = tpu.matmul %12, %14, %cst_16 {dimension_numbers = #tpu.dot_dimension_numbers<[1], [0], [0], [1], [0, 0, 1, 1], [], []>} : vector<192x28xf32>, vector<28x144xf32>, vector<192x144xf32> -> vector<192x144xf32>
    %16 = arith.addf %10, %15 : vector<192x144xf32>
    %c0_17 = arith.constant 0 : index
    %c3 = arith.constant 3 : index
    %c0_18 = arith.constant 0 : index
    %17 = vector.load %arg1[%c0_17, %c3, %c0_18] : memref<8x28x28xf32, #tpu.memory_space<vmem>>, vector<8x24x28xf32>
    %18 = vector.shape_cast %17 : vector<8x24x28xf32> to vector<192x28xf32>
    %c3_19 = arith.constant 3 : index
    %c0_20 = arith.constant 0 : index
    %c0_21 = arith.constant 0 : index
    %19 = vector.load %arg2[%c3_19, %c0_20, %c0_21] : memref<5x28x144xf32, #tpu.memory_space<vmem>>, vector<1x28x144xf32>
    %20 = vector.shape_cast %19 : vector<1x28x144xf32> to vector<28x144xf32>
    %cst_22 = arith.constant dense<0.000000e+00> : vector<192x144xf32>
    %21 = tpu.matmul %18, %20, %cst_22 {dimension_numbers = #tpu.dot_dimension_numbers<[1], [0], [0], [1], [0, 0, 1, 1], [], []>} : vector<192x28xf32>, vector<28x144xf32>, vector<192x144xf32> -> vector<192x144xf32>
    %22 = arith.addf %16, %21 : vector<192x144xf32>
    %c0_23 = arith.constant 0 : index
    %c4 = arith.constant 4 : index
    %c0_24 = arith.constant 0 : index
    %23 = vector.load %arg1[%c0_23, %c4, %c0_24] : memref<8x28x28xf32, #tpu.memory_space<vmem>>, vector<8x24x28xf32>
    %24 = vector.shape_cast %23 : vector<8x24x28xf32> to vector<192x28xf32>
    %c4_25 = arith.constant 4 : index
    %c0_26 = arith.constant 0 : index
    %c0_27 = arith.constant 0 : index
    %25 = vector.load %arg2[%c4_25, %c0_26, %c0_27] : memref<5x28x144xf32, #tpu.memory_space<vmem>>, vector<1x28x144xf32>
    %26 = vector.shape_cast %25 : vector<1x28x144xf32> to vector<28x144xf32>
    %cst_28 = arith.constant dense<0.000000e+00> : vector<192x144xf32>
    %27 = tpu.matmul %24, %26, %cst_28 {dimension_numbers = #tpu.dot_dimension_numbers<[1], [0], [0], [1], [0, 0, 1, 1], [], []>} : vector<192x28xf32>, vector<28x144xf32>, vector<192x144xf32> -> vector<192x144xf32>
    %28 = arith.addf %22, %27 : vector<192x144xf32>
    %c0_29 = arith.constant 0 : index
    %c0_30 = arith.constant 0 : index
    %29 = vector.load %arg3[%c0_29, %c0_30] : memref<1x144xf32, #tpu.memory_space<vmem>>, vector<1x144xf32>
    %30 = vector.broadcast %29 : vector<1x144xf32> to vector<192x144xf32>
    %31 = arith.addf %28, %30 : vector<192x144xf32>
    %cst_31 = arith.constant 0.000000e+00 : f32
    %32 = vector.broadcast %cst_31 : f32 to vector<192x144xf32>
    %33 = arith.maximumf %31, %32 : vector<192x144xf32>
    %c0_32 = arith.constant 0 : index
    %c0_33 = arith.constant 0 : index
    %c0_34 = arith.constant 0 : index
    %34 = vector.load %arg4[%c0_32, %c0_33, %c0_34] : memref<2x96x192xf32, #tpu.memory_space<vmem>>, vector<1x96x192xf32>
    %35 = vector.shape_cast %34 : vector<1x96x192xf32> to vector<96x192xf32>
    %cst_35 = arith.constant dense<0.000000e+00> : vector<96x144xf32>
    %36 = tpu.matmul %35, %33, %cst_35 {dimension_numbers = #tpu.dot_dimension_numbers<[1], [0], [0], [1], [0, 0, 1, 1], [], []>} : vector<96x192xf32>, vector<192x144xf32>, vector<96x144xf32> -> vector<96x144xf32>
    %c1_36 = arith.constant 1 : index
    %c0_37 = arith.constant 0 : index
    %c0_38 = arith.constant 0 : index
    %37 = vector.load %arg4[%c1_36, %c0_37, %c0_38] : memref<2x96x192xf32, #tpu.memory_space<vmem>>, vector<1x96x192xf32>
    %38 = vector.shape_cast %37 : vector<1x96x192xf32> to vector<96x192xf32>
    %cst_39 = arith.constant dense<0.000000e+00> : vector<96x144xf32>
    %39 = tpu.matmul %38, %33, %cst_39 {dimension_numbers = #tpu.dot_dimension_numbers<[1], [0], [0], [1], [0, 0, 1, 1], [], []>} : vector<96x192xf32>, vector<192x144xf32>, vector<96x144xf32> -> vector<96x144xf32>
    %40 = arith.maximumf %36, %39 : vector<96x144xf32>
    %c0_40 = arith.constant 0 : index
    %c0_41 = arith.constant 0 : index
    %c0_42 = arith.constant 0 : index
    %41 = vector.load %arg5[%c0_40, %c0_41, %c0_42] : memref<2x144x72xf32, #tpu.memory_space<vmem>>, vector<1x144x72xf32>
    %42 = vector.shape_cast %41 : vector<1x144x72xf32> to vector<144x72xf32>
    %cst_43 = arith.constant dense<0.000000e+00> : vector<96x72xf32>
    %43 = tpu.matmul %40, %42, %cst_43 {dimension_numbers = #tpu.dot_dimension_numbers<[1], [0], [0], [1], [0, 0, 1, 1], [], []>} : vector<96x144xf32>, vector<144x72xf32>, vector<96x72xf32> -> vector<96x72xf32>
    %c1_44 = arith.constant 1 : index
    %c0_45 = arith.constant 0 : index
    %c0_46 = arith.constant 0 : index
    %44 = vector.load %arg5[%c1_44, %c0_45, %c0_46] : memref<2x144x72xf32, #tpu.memory_space<vmem>>, vector<1x144x72xf32>
    %45 = vector.shape_cast %44 : vector<1x144x72xf32> to vector<144x72xf32>
    %cst_47 = arith.constant dense<0.000000e+00> : vector<96x72xf32>
    %46 = tpu.matmul %40, %45, %cst_47 {dimension_numbers = #tpu.dot_dimension_numbers<[1], [0], [0], [1], [0, 0, 1, 1], [], []>} : vector<96x144xf32>, vector<144x72xf32>, vector<96x72xf32> -> vector<96x72xf32>
    %47 = arith.maximumf %43, %46 : vector<96x72xf32>
    %c0_48 = arith.constant 0 : index
    %c0_49 = arith.constant 0 : index
    %c0_50 = arith.constant 0 : index
    %48 = vector.load %arg6[%c0_48, %c0_49, %c0_50] : memref<5x64x96xf32, #tpu.memory_space<vmem>>, vector<1x64x96xf32>
    %49 = vector.shape_cast %48 : vector<1x64x96xf32> to vector<64x96xf32>
    %cst_51 = arith.constant dense<0.000000e+00> : vector<64x72xf32>
    %50 = tpu.matmul %49, %47, %cst_51 {dimension_numbers = #tpu.dot_dimension_numbers<[1], [0], [0], [1], [0, 0, 1, 1], [], []>} : vector<64x96xf32>, vector<96x72xf32>, vector<64x72xf32> -> vector<64x72xf32>
    %c0_52 = arith.constant 0 : index
    %c0_53 = arith.constant 0 : index
    %c0_54 = arith.constant 0 : index
    %51 = vector.load %arg7[%c0_52, %c0_53, %c0_54] : memref<5x72x96xf32, #tpu.memory_space<vmem>>, vector<1x72x96xf32>
    %52 = vector.shape_cast %51 : vector<1x72x96xf32> to vector<72x96xf32>
    %cst_55 = arith.constant dense<0.000000e+00> : vector<64x96xf32>
    %53 = tpu.matmul %50, %52, %cst_55 {dimension_numbers = #tpu.dot_dimension_numbers<[1], [0], [0], [1], [0, 0, 1, 1], [], []>} : vector<64x72xf32>, vector<72x96xf32>, vector<64x96xf32> -> vector<64x96xf32>
    %c1_56 = arith.constant 1 : index
    %c0_57 = arith.constant 0 : index
    %c0_58 = arith.constant 0 : index
    %54 = vector.load %arg6[%c1_56, %c0_57, %c0_58] : memref<5x64x96xf32, #tpu.memory_space<vmem>>, vector<1x64x96xf32>
    %55 = vector.shape_cast %54 : vector<1x64x96xf32> to vector<64x96xf32>
    %cst_59 = arith.constant dense<0.000000e+00> : vector<64x72xf32>
    %56 = tpu.matmul %55, %47, %cst_59 {dimension_numbers = #tpu.dot_dimension_numbers<[1], [0], [0], [1], [0, 0, 1, 1], [], []>} : vector<64x96xf32>, vector<96x72xf32>, vector<64x72xf32> -> vector<64x72xf32>
    %c1_60 = arith.constant 1 : index
    %c0_61 = arith.constant 0 : index
    %c0_62 = arith.constant 0 : index
    %57 = vector.load %arg7[%c1_60, %c0_61, %c0_62] : memref<5x72x96xf32, #tpu.memory_space<vmem>>, vector<1x72x96xf32>
    %58 = vector.shape_cast %57 : vector<1x72x96xf32> to vector<72x96xf32>
    %cst_63 = arith.constant dense<0.000000e+00> : vector<64x96xf32>
    %59 = tpu.matmul %56, %58, %cst_63 {dimension_numbers = #tpu.dot_dimension_numbers<[1], [0], [0], [1], [0, 0, 1, 1], [], []>} : vector<64x72xf32>, vector<72x96xf32>, vector<64x96xf32> -> vector<64x96xf32>
    %60 = arith.addf %53, %59 : vector<64x96xf32>
    %c2_64 = arith.constant 2 : index
    %c0_65 = arith.constant 0 : index
    %c0_66 = arith.constant 0 : index
    %61 = vector.load %arg6[%c2_64, %c0_65, %c0_66] : memref<5x64x96xf32, #tpu.memory_space<vmem>>, vector<1x64x96xf32>
    %62 = vector.shape_cast %61 : vector<1x64x96xf32> to vector<64x96xf32>
    %cst_67 = arith.constant dense<0.000000e+00> : vector<64x72xf32>
    %63 = tpu.matmul %62, %47, %cst_67 {dimension_numbers = #tpu.dot_dimension_numbers<[1], [0], [0], [1], [0, 0, 1, 1], [], []>} : vector<64x96xf32>, vector<96x72xf32>, vector<64x72xf32> -> vector<64x72xf32>
    %c2_68 = arith.constant 2 : index
    %c0_69 = arith.constant 0 : index
    %c0_70 = arith.constant 0 : index
    %64 = vector.load %arg7[%c2_68, %c0_69, %c0_70] : memref<5x72x96xf32, #tpu.memory_space<vmem>>, vector<1x72x96xf32>
    %65 = vector.shape_cast %64 : vector<1x72x96xf32> to vector<72x96xf32>
    %cst_71 = arith.constant dense<0.000000e+00> : vector<64x96xf32>
    %66 = tpu.matmul %63, %65, %cst_71 {dimension_numbers = #tpu.dot_dimension_numbers<[1], [0], [0], [1], [0, 0, 1, 1], [], []>} : vector<64x72xf32>, vector<72x96xf32>, vector<64x96xf32> -> vector<64x96xf32>
    %67 = arith.addf %60, %66 : vector<64x96xf32>
    %c3_72 = arith.constant 3 : index
    %c0_73 = arith.constant 0 : index
    %c0_74 = arith.constant 0 : index
    %68 = vector.load %arg6[%c3_72, %c0_73, %c0_74] : memref<5x64x96xf32, #tpu.memory_space<vmem>>, vector<1x64x96xf32>
    %69 = vector.shape_cast %68 : vector<1x64x96xf32> to vector<64x96xf32>
    %cst_75 = arith.constant dense<0.000000e+00> : vector<64x72xf32>
    %70 = tpu.matmul %69, %47, %cst_75 {dimension_numbers = #tpu.dot_dimension_numbers<[1], [0], [0], [1], [0, 0, 1, 1], [], []>} : vector<64x96xf32>, vector<96x72xf32>, vector<64x72xf32> -> vector<64x72xf32>
    %c3_76 = arith.constant 3 : index
    %c0_77 = arith.constant 0 : index
    %c0_78 = arith.constant 0 : index
    %71 = vector.load %arg7[%c3_76, %c0_77, %c0_78] : memref<5x72x96xf32, #tpu.memory_space<vmem>>, vector<1x72x96xf32>
    %72 = vector.shape_cast %71 : vector<1x72x96xf32> to vector<72x96xf32>
    %cst_79 = arith.constant dense<0.000000e+00> : vector<64x96xf32>
    %73 = tpu.matmul %70, %72, %cst_79 {dimension_numbers = #tpu.dot_dimension_numbers<[1], [0], [0], [1], [0, 0, 1, 1], [], []>} : vector<64x72xf32>, vector<72x96xf32>, vector<64x96xf32> -> vector<64x96xf32>
    %74 = arith.addf %67, %73 : vector<64x96xf32>
    %c4_80 = arith.constant 4 : index
    %c0_81 = arith.constant 0 : index
    %c0_82 = arith.constant 0 : index
    %75 = vector.load %arg6[%c4_80, %c0_81, %c0_82] : memref<5x64x96xf32, #tpu.memory_space<vmem>>, vector<1x64x96xf32>
    %76 = vector.shape_cast %75 : vector<1x64x96xf32> to vector<64x96xf32>
    %cst_83 = arith.constant dense<0.000000e+00> : vector<64x72xf32>
    %77 = tpu.matmul %76, %47, %cst_83 {dimension_numbers = #tpu.dot_dimension_numbers<[1], [0], [0], [1], [0, 0, 1, 1], [], []>} : vector<64x96xf32>, vector<96x72xf32>, vector<64x72xf32> -> vector<64x72xf32>
    %c4_84 = arith.constant 4 : index
    %c0_85 = arith.constant 0 : index
    %c0_86 = arith.constant 0 : index
    %78 = vector.load %arg7[%c4_84, %c0_85, %c0_86] : memref<5x72x96xf32, #tpu.memory_space<vmem>>, vector<1x72x96xf32>
    %79 = vector.shape_cast %78 : vector<1x72x96xf32> to vector<72x96xf32>
    %cst_87 = arith.constant dense<0.000000e+00> : vector<64x96xf32>
    %80 = tpu.matmul %77, %79, %cst_87 {dimension_numbers = #tpu.dot_dimension_numbers<[1], [0], [0], [1], [0, 0, 1, 1], [], []>} : vector<64x72xf32>, vector<72x96xf32>, vector<64x96xf32> -> vector<64x96xf32>
    %81 = arith.addf %74, %80 : vector<64x96xf32>
    %c0_88 = arith.constant 0 : index
    %c0_89 = arith.constant 0 : index
    %82 = vector.load %arg8[%c0_88, %c0_89] : memref<1x96xf32, #tpu.memory_space<vmem>>, vector<1x96xf32>
    %83 = vector.broadcast %82 : vector<1x96xf32> to vector<64x96xf32>
    %84 = arith.addf %81, %83 : vector<64x96xf32>
    %cst_90 = arith.constant 0.000000e+00 : f32
    %85 = vector.broadcast %cst_90 : f32 to vector<64x96xf32>
    %86 = arith.maximumf %84, %85 : vector<64x96xf32>
    %c0_91 = arith.constant 0 : index
    %c0_92 = arith.constant 0 : index
    %c0_93 = arith.constant 0 : index
    %87 = vector.load %arg9[%c0_91, %c0_92, %c0_93] : memref<2x32x64xf32, #tpu.memory_space<vmem>>, vector<1x32x64xf32>
    %88 = vector.shape_cast %87 : vector<1x32x64xf32> to vector<32x64xf32>
    %cst_94 = arith.constant dense<0.000000e+00> : vector<32x96xf32>
    %89 = tpu.matmul %88, %86, %cst_94 {dimension_numbers = #tpu.dot_dimension_numbers<[1], [0], [0], [1], [0, 0, 1, 1], [], []>} : vector<32x64xf32>, vector<64x96xf32>, vector<32x96xf32> -> vector<32x96xf32>
    %c1_95 = arith.constant 1 : index
    %c0_96 = arith.constant 0 : index
    %c0_97 = arith.constant 0 : index
    %90 = vector.load %arg9[%c1_95, %c0_96, %c0_97] : memref<2x32x64xf32, #tpu.memory_space<vmem>>, vector<1x32x64xf32>
    %91 = vector.shape_cast %90 : vector<1x32x64xf32> to vector<32x64xf32>
    %cst_98 = arith.constant dense<0.000000e+00> : vector<32x96xf32>
    %92 = tpu.matmul %91, %86, %cst_98 {dimension_numbers = #tpu.dot_dimension_numbers<[1], [0], [0], [1], [0, 0, 1, 1], [], []>} : vector<32x64xf32>, vector<64x96xf32>, vector<32x96xf32> -> vector<32x96xf32>
    %93 = arith.maximumf %89, %92 : vector<32x96xf32>
    %c0_99 = arith.constant 0 : index
    %c0_100 = arith.constant 0 : index
    %c0_101 = arith.constant 0 : index
    %94 = vector.load %arg10[%c0_99, %c0_100, %c0_101] : memref<2x96x48xf32, #tpu.memory_space<vmem>>, vector<1x96x48xf32>
    %95 = vector.shape_cast %94 : vector<1x96x48xf32> to vector<96x48xf32>
    %cst_102 = arith.constant dense<0.000000e+00> : vector<32x48xf32>
    %96 = tpu.matmul %93, %95, %cst_102 {dimension_numbers = #tpu.dot_dimension_numbers<[1], [0], [0], [1], [0, 0, 1, 1], [], []>} : vector<32x96xf32>, vector<96x48xf32>, vector<32x48xf32> -> vector<32x48xf32>
    %c1_103 = arith.constant 1 : index
    %c0_104 = arith.constant 0 : index
    %c0_105 = arith.constant 0 : index
    %97 = vector.load %arg10[%c1_103, %c0_104, %c0_105] : memref<2x96x48xf32, #tpu.memory_space<vmem>>, vector<1x96x48xf32>
    %98 = vector.shape_cast %97 : vector<1x96x48xf32> to vector<96x48xf32>
    %cst_106 = arith.constant dense<0.000000e+00> : vector<32x48xf32>
    %99 = tpu.matmul %93, %98, %cst_106 {dimension_numbers = #tpu.dot_dimension_numbers<[1], [0], [0], [1], [0, 0, 1, 1], [], []>} : vector<32x96xf32>, vector<96x48xf32>, vector<32x48xf32> -> vector<32x48xf32>
    %100 = arith.maximumf %96, %99 : vector<32x48xf32>
    %c0_107 = arith.constant 0 : index
    %c0_108 = arith.constant 0 : index
    %c0_109 = arith.constant 0 : index
    %101 = vector.load %arg11[%c0_107, %c0_108, %c0_109] : memref<4x8x32xf32, #tpu.memory_space<vmem>>, vector<1x8x32xf32>
    %102 = vector.shape_cast %101 : vector<1x8x32xf32> to vector<8x32xf32>
    %cst_110 = arith.constant dense<0.000000e+00> : vector<8x48xf32>
    %103 = tpu.matmul %102, %100, %cst_110 {dimension_numbers = #tpu.dot_dimension_numbers<[1], [0], [0], [1], [0, 0, 1, 1], [], []>} : vector<8x32xf32>, vector<32x48xf32>, vector<8x48xf32> -> vector<8x48xf32>
    %c0_111 = arith.constant 0 : index
    %c0_112 = arith.constant 0 : index
    %c0_113 = arith.constant 0 : index
    %104 = vector.load %arg12[%c0_111, %c0_112, %c0_113] : memref<4x48x120xf32, #tpu.memory_space<vmem>>, vector<1x48x120xf32>
    %105 = vector.shape_cast %104 : vector<1x48x120xf32> to vector<48x120xf32>
    %cst_114 = arith.constant dense<0.000000e+00> : vector<8x120xf32>
    %106 = tpu.matmul %103, %105, %cst_114 {dimension_numbers = #tpu.dot_dimension_numbers<[1], [0], [0], [1], [0, 0, 1, 1], [], []>} : vector<8x48xf32>, vector<48x120xf32>, vector<8x120xf32> -> vector<8x120xf32>
    %c1_115 = arith.constant 1 : index
    %c0_116 = arith.constant 0 : index
    %c0_117 = arith.constant 0 : index
    %107 = vector.load %arg11[%c1_115, %c0_116, %c0_117] : memref<4x8x32xf32, #tpu.memory_space<vmem>>, vector<1x8x32xf32>
    %108 = vector.shape_cast %107 : vector<1x8x32xf32> to vector<8x32xf32>
    %cst_118 = arith.constant dense<0.000000e+00> : vector<8x48xf32>
    %109 = tpu.matmul %108, %100, %cst_118 {dimension_numbers = #tpu.dot_dimension_numbers<[1], [0], [0], [1], [0, 0, 1, 1], [], []>} : vector<8x32xf32>, vector<32x48xf32>, vector<8x48xf32> -> vector<8x48xf32>
    %c1_119 = arith.constant 1 : index
    %c0_120 = arith.constant 0 : index
    %c0_121 = arith.constant 0 : index
    %110 = vector.load %arg12[%c1_119, %c0_120, %c0_121] : memref<4x48x120xf32, #tpu.memory_space<vmem>>, vector<1x48x120xf32>
    %111 = vector.shape_cast %110 : vector<1x48x120xf32> to vector<48x120xf32>
    %cst_122 = arith.constant dense<0.000000e+00> : vector<8x120xf32>
    %112 = tpu.matmul %109, %111, %cst_122 {dimension_numbers = #tpu.dot_dimension_numbers<[1], [0], [0], [1], [0, 0, 1, 1], [], []>} : vector<8x48xf32>, vector<48x120xf32>, vector<8x120xf32> -> vector<8x120xf32>
    %113 = arith.addf %106, %112 : vector<8x120xf32>
    %c2_123 = arith.constant 2 : index
    %c0_124 = arith.constant 0 : index
    %c0_125 = arith.constant 0 : index
    %114 = vector.load %arg11[%c2_123, %c0_124, %c0_125] : memref<4x8x32xf32, #tpu.memory_space<vmem>>, vector<1x8x32xf32>
    %115 = vector.shape_cast %114 : vector<1x8x32xf32> to vector<8x32xf32>
    %cst_126 = arith.constant dense<0.000000e+00> : vector<8x48xf32>
    %116 = tpu.matmul %115, %100, %cst_126 {dimension_numbers = #tpu.dot_dimension_numbers<[1], [0], [0], [1], [0, 0, 1, 1], [], []>} : vector<8x32xf32>, vector<32x48xf32>, vector<8x48xf32> -> vector<8x48xf32>
    %c2_127 = arith.constant 2 : index
    %c0_128 = arith.constant 0 : index
    %c0_129 = arith.constant 0 : index
    %117 = vector.load %arg12[%c2_127, %c0_128, %c0_129] : memref<4x48x120xf32, #tpu.memory_space<vmem>>, vector<1x48x120xf32>
    %118 = vector.shape_cast %117 : vector<1x48x120xf32> to vector<48x120xf32>
    %cst_130 = arith.constant dense<0.000000e+00> : vector<8x120xf32>
    %119 = tpu.matmul %116, %118, %cst_130 {dimension_numbers = #tpu.dot_dimension_numbers<[1], [0], [0], [1], [0, 0, 1, 1], [], []>} : vector<8x48xf32>, vector<48x120xf32>, vector<8x120xf32> -> vector<8x120xf32>
    %120 = arith.addf %113, %119 : vector<8x120xf32>
    %c3_131 = arith.constant 3 : index
    %c0_132 = arith.constant 0 : index
    %c0_133 = arith.constant 0 : index
    %121 = vector.load %arg11[%c3_131, %c0_132, %c0_133] : memref<4x8x32xf32, #tpu.memory_space<vmem>>, vector<1x8x32xf32>
    %122 = vector.shape_cast %121 : vector<1x8x32xf32> to vector<8x32xf32>
    %cst_134 = arith.constant dense<0.000000e+00> : vector<8x48xf32>
    %123 = tpu.matmul %122, %100, %cst_134 {dimension_numbers = #tpu.dot_dimension_numbers<[1], [0], [0], [1], [0, 0, 1, 1], [], []>} : vector<8x32xf32>, vector<32x48xf32>, vector<8x48xf32> -> vector<8x48xf32>
    %c3_135 = arith.constant 3 : index
    %c0_136 = arith.constant 0 : index
    %c0_137 = arith.constant 0 : index
    %124 = vector.load %arg12[%c3_135, %c0_136, %c0_137] : memref<4x48x120xf32, #tpu.memory_space<vmem>>, vector<1x48x120xf32>
    %125 = vector.shape_cast %124 : vector<1x48x120xf32> to vector<48x120xf32>
    %cst_138 = arith.constant dense<0.000000e+00> : vector<8x120xf32>
    %126 = tpu.matmul %123, %125, %cst_138 {dimension_numbers = #tpu.dot_dimension_numbers<[1], [0], [0], [1], [0, 0, 1, 1], [], []>} : vector<8x48xf32>, vector<48x120xf32>, vector<8x120xf32> -> vector<8x120xf32>
    %127 = arith.addf %120, %126 : vector<8x120xf32>
    %c0_139 = arith.constant 0 : index
    %c0_140 = arith.constant 0 : index
    %128 = vector.load %arg13[%c0_139, %c0_140] : memref<1x120xf32, #tpu.memory_space<vmem>>, vector<1x120xf32>
    %129 = vector.broadcast %128 : vector<1x120xf32> to vector<8x120xf32>
    %130 = arith.addf %127, %129 : vector<8x120xf32>
    %cst_141 = arith.constant 0.000000e+00 : f32
    %131 = vector.broadcast %cst_141 : f32 to vector<8x120xf32>
    %132 = arith.maximumf %130, %131 : vector<8x120xf32>
    %c0_142 = arith.constant 0 : index
    %c0_143 = arith.constant 0 : index
    %133 = vector.load %arg14[%c0_142, %c0_143] : memref<120x60xf32, #tpu.memory_space<vmem>>, vector<120x60xf32>
    %cst_144 = arith.constant dense<0.000000e+00> : vector<8x60xf32>
    %134 = tpu.matmul %132, %133, %cst_144 {dimension_numbers = #tpu.dot_dimension_numbers<[1], [0], [0], [1], [0, 0, 1, 1], [], []>} : vector<8x120xf32>, vector<120x60xf32>, vector<8x60xf32> -> vector<8x60xf32>
    %c0_145 = arith.constant 0 : index
    %c0_146 = arith.constant 0 : index
    %135 = vector.load %arg15[%c0_145, %c0_146] : memref<1x60xf32, #tpu.memory_space<vmem>>, vector<1x60xf32>
    %136 = vector.broadcast %135 : vector<1x60xf32> to vector<8x60xf32>
    %137 = arith.addf %134, %136 : vector<8x60xf32>
    %cst_147 = arith.constant 0.000000e+00 : f32
    %138 = vector.broadcast %cst_147 : f32 to vector<8x60xf32>
    %139 = arith.maximumf %137, %138 : vector<8x60xf32>
    %c0_148 = arith.constant 0 : index
    %c0_149 = arith.constant 0 : index
    %140 = vector.load %arg16[%c0_148, %c0_149] : memref<60x10xf32, #tpu.memory_space<vmem>>, vector<60x10xf32>
    %cst_150 = arith.constant dense<0.000000e+00> : vector<8x10xf32>
    %141 = tpu.matmul %139, %140, %cst_150 {dimension_numbers = #tpu.dot_dimension_numbers<[1], [0], [0], [1], [0, 0, 1, 1], [], []>} : vector<8x60xf32>, vector<60x10xf32>, vector<8x10xf32> -> vector<8x10xf32>
    %c0_151 = arith.constant 0 : index
    %c0_152 = arith.constant 0 : index
    %142 = vector.load %arg17[%c0_151, %c0_152] : memref<1x10xf32, #tpu.memory_space<vmem>>, vector<1x10xf32>
    %143 = vector.broadcast %142 : vector<1x10xf32> to vector<8x10xf32>
    %144 = arith.addf %141, %143 : vector<8x10xf32>
    %cst_153 = arith.constant dense<0xFF800000> : vector<8xf32>
    %145 = vector.multi_reduction <maximumf>, %144, %cst_153 [1] : vector<8x10xf32> to vector<8xf32>
    %146 = vector.shape_cast %145 : vector<8xf32> to vector<8x1xf32>
    %147 = vector.broadcast %146 : vector<8x1xf32> to vector<8x10xf32>
    %148 = arith.subf %144, %147 : vector<8x10xf32>
    %149 = math.exp %148 : vector<8x10xf32>
    %cst_154 = arith.constant dense<0.000000e+00> : vector<8xf32>
    %150 = vector.multi_reduction <add>, %149, %cst_154 [1] : vector<8x10xf32> to vector<8xf32>
    %151 = vector.shape_cast %150 : vector<8xf32> to vector<8x1xf32>
    %152 = tpu.reciprocal %151 {approx = true} : vector<8x1xf32> -> vector<8x1xf32>
    %153 = arith.mulf %151, %152 : vector<8x1xf32>
    %cst_155 = arith.constant 2.000000e+00 : f32
    %154 = vector.broadcast %cst_155 : f32 to vector<8x1xf32>
    %155 = arith.subf %154, %153 : vector<8x1xf32>
    %156 = arith.mulf %152, %155 : vector<8x1xf32>
    %157 = vector.broadcast %156 : vector<8x1xf32> to vector<8x10xf32>
    %158 = arith.mulf %149, %157 : vector<8x10xf32>
    %c0_156 = arith.constant 0 : index
    %c0_157 = arith.constant 0 : index
    %159 = vector.load %arg18[%c0_156, %c0_157] : memref<8x10xf32, #tpu.memory_space<vmem>>, vector<8x10xf32>
    tpu.vector_store %arg18[%c0_156, %c0_157], %158 {strides = array<i32>} : memref<8x10xf32, #tpu.memory_space<vmem>>, vector<8x10xf32>,
    return
  }
  func.func @transform_0(%arg0: i32) -> (i32, i32, i32) {
    %c0_i32 = arith.constant 0 : i32
    %c0_i32_0 = arith.constant 0 : i32
    %c0_i32_1 = arith.constant 0 : i32
    return %arg0, %c0_i32, %c0_i32_0 : i32, i32, i32
  }
  func.func @transform_1(%arg0: i32) -> (i32, i32, i32) {
    %c0_i32 = arith.constant 0 : i32
    %c0_i32_0 = arith.constant 0 : i32
    %c0_i32_1 = arith.constant 0 : i32
    %c0_i32_2 = arith.constant 0 : i32
    return %c0_i32, %c0_i32_0, %c0_i32_1 : i32, i32, i32
  }
  func.func @transform_2(%arg0: i32) -> (i32, i32) {
    %c0_i32 = arith.constant 0 : i32
    %c0_i32_0 = arith.constant 0 : i32
    %c0_i32_1 = arith.constant 0 : i32
    return %c0_i32, %c0_i32_0 : i32, i32
  }
  func.func @transform_3(%arg0: i32) -> (i32, i32, i32) {
    %c0_i32 = arith.constant 0 : i32
    %c0_i32_0 = arith.constant 0 : i32
    %c0_i32_1 = arith.constant 0 : i32
    %c0_i32_2 = arith.constant 0 : i32
    return %c0_i32, %c0_i32_0, %c0_i32_1 : i32, i32, i32
  }
  func.func @transform_4(%arg0: i32) -> (i32, i32, i32) {
    %c0_i32 = arith.constant 0 : i32
    %c0_i32_0 = arith.constant 0 : i32
    %c0_i32_1 = arith.constant 0 : i32
    %c0_i32_2 = arith.constant 0 : i32
    return %c0_i32, %c0_i32_0, %c0_i32_1 : i32, i32, i32
  }
  func.func @transform_5(%arg0: i32) -> (i32, i32, i32) {
    %c0_i32 = arith.constant 0 : i32
    %c0_i32_0 = arith.constant 0 : i32
    %c0_i32_1 = arith.constant 0 : i32
    %c0_i32_2 = arith.constant 0 : i32
    return %c0_i32, %c0_i32_0, %c0_i32_1 : i32, i32, i32
  }
  func.func @transform_6(%arg0: i32) -> (i32, i32, i32) {
    %c0_i32 = arith.constant 0 : i32
    %c0_i32_0 = arith.constant 0 : i32
    %c0_i32_1 = arith.constant 0 : i32
    %c0_i32_2 = arith.constant 0 : i32
    return %c0_i32, %c0_i32_0, %c0_i32_1 : i32, i32, i32
  }
  func.func @transform_7(%arg0: i32) -> (i32, i32) {
    %c0_i32 = arith.constant 0 : i32
    %c0_i32_0 = arith.constant 0 : i32
    %c0_i32_1 = arith.constant 0 : i32
    return %c0_i32, %c0_i32_0 : i32, i32
  }
  func.func @transform_8(%arg0: i32) -> (i32, i32, i32) {
    %c0_i32 = arith.constant 0 : i32
    %c0_i32_0 = arith.constant 0 : i32
    %c0_i32_1 = arith.constant 0 : i32
    %c0_i32_2 = arith.constant 0 : i32
    return %c0_i32, %c0_i32_0, %c0_i32_1 : i32, i32, i32
  }
  func.func @transform_9(%arg0: i32) -> (i32, i32, i32) {
    %c0_i32 = arith.constant 0 : i32
    %c0_i32_0 = arith.constant 0 : i32
    %c0_i32_1 = arith.constant 0 : i32
    %c0_i32_2 = arith.constant 0 : i32
    return %c0_i32, %c0_i32_0, %c0_i32_1 : i32, i32, i32
  }
  func.func @transform_10(%arg0: i32) -> (i32, i32, i32) {
    %c0_i32 = arith.constant 0 : i32
    %c0_i32_0 = arith.constant 0 : i32
    %c0_i32_1 = arith.constant 0 : i32
    %c0_i32_2 = arith.constant 0 : i32
    return %c0_i32, %c0_i32_0, %c0_i32_1 : i32, i32, i32
  }
  func.func @transform_11(%arg0: i32) -> (i32, i32, i32) {
    %c0_i32 = arith.constant 0 : i32
    %c0_i32_0 = arith.constant 0 : i32
    %c0_i32_1 = arith.constant 0 : i32
    %c0_i32_2 = arith.constant 0 : i32
    return %c0_i32, %c0_i32_0, %c0_i32_1 : i32, i32, i32
  }
  func.func @transform_12(%arg0: i32) -> (i32, i32) {
    %c0_i32 = arith.constant 0 : i32
    %c0_i32_0 = arith.constant 0 : i32
    %c0_i32_1 = arith.constant 0 : i32
    return %c0_i32, %c0_i32_0 : i32, i32
  }
  func.func @transform_13(%arg0: i32) -> (i32, i32) {
    %c0_i32 = arith.constant 0 : i32
    %c0_i32_0 = arith.constant 0 : i32
    %c0_i32_1 = arith.constant 0 : i32
    return %c0_i32, %c0_i32_0 : i32, i32
  }
  func.func @transform_14(%arg0: i32) -> (i32, i32) {
    %c0_i32 = arith.constant 0 : i32
    %c0_i32_0 = arith.constant 0 : i32
    %c0_i32_1 = arith.constant 0 : i32
    return %c0_i32, %c0_i32_0 : i32, i32
  }
  func.func @transform_15(%arg0: i32) -> (i32, i32) {
    %c0_i32 = arith.constant 0 : i32
    %c0_i32_0 = arith.constant 0 : i32
    %c0_i32_1 = arith.constant 0 : i32
    return %c0_i32, %c0_i32_0 : i32, i32
  }
  func.func @transform_16(%arg0: i32) -> (i32, i32) {
    %c0_i32 = arith.constant 0 : i32
    %c0_i32_0 = arith.constant 0 : i32
    %c0_i32_1 = arith.constant 0 : i32
    return %c0_i32, %c0_i32_0 : i32, i32
  }
  func.func @transform_17(%arg0: i32) -> (i32, i32) {
    %c0_i32 = arith.constant 0 : i32
    %c0_i32_0 = arith.constant 0 : i32
    return %arg0, %c0_i32 : i32, i32
  }
}

</mosaic_0001>

<bundles_post_ra>
// kernel: network_forward.1
= control target key start
LH: loop header
LB: loop body
LE: loop exit
PB: predicated region body
PF: predicated region fallthrough
CT: control target
= control target key end

     0   :  { %s7187_s0 = inlined_call_operand.vmem [shape: f32[8,28,28], index: 0, kind: input, shape index: {}]   ;;  %s7188_s1 = inlined_call_operand.hbm [shape: f32[5,28,144], index: 1, kind: input, shape index: {}]   ;;  %s7189_s2 = inlined_call_operand.vmem [shape: f32[1,144], index: 2, kind: input, shape index: {}]   ;;  %s7190_s3 = inlined_call_operand.vmem [shape: f32[2,96,192], index: 3, kind: input, shape index: {}]   ;;  %s7191_s4 = inlined_call_operand.vmem [shape: f32[2,144,72], index: 4, kind: input, shape index: {}]   ;;  %s7192_s5 = inlined_call_operand.hbm [shape: f32[5,64,96], index: 5, kind: input, shape index: {}]   ;;  %s7193_s6 = inlined_call_operand.hbm [shape: f32[5,72,96], index: 6, kind: input, shape index: {}]   ;;  %s7194_s7 = inlined_call_operand.vmem [shape: f32[1,96], index: 7, kind: input, shape index: {}]   ;;  %s7195_s8 = inlined_call_operand.hbm [shape: f32[2,32,64], index: 8, kind: input, shape index: {}]   ;;  %s7196_s9 = inlined_call_operand.vmem [shape: f32[2,96,48], index: 9, kind: input, shape index: {}]   ;;  %s7197_s10 = inlined_call_operand.vmem [shape: f32[4,8,32], index: 10, kind: input, shape index: {}]   ;;  %s7198_s11 = inlined_call_operand.vmem [shape: f32[4,48,120], index: 11, kind: input, shape index: {}]   ;;  %s7199_s12 = inlined_call_operand.vmem [shape: f32[1,120], index: 12, kind: input, shape index: {}]   ;;  %s7200_s13 = inlined_call_operand.vmem [shape: f32[120,60], index: 13, kind: input, shape index: {}]   ;;  %s7201_s14 = inlined_call_operand.vmem [shape: f32[1,60], index: 14, kind: input, shape index: {}]   ;;  %s7202_s15 = inlined_call_operand.vmem [shape: f32[60,10], index: 15, kind: input, shape index: {}]   ;;  %s7203_s16 = inlined_call_operand.vmem [shape: f32[1,10], index: 16, kind: input, shape index: {}]   ;;  %s7204_s17 = inlined_call_operand.vmem [shape: f32[8,10], index: 17, kind: output, shape index: {}]  }
   0x1   :  { %7217 = sst [smem:[#allocation114_spill]] %s7187_s0 }
   0x2   :  { %7218 = sst [smem:[#allocation115_spill]] %s7188_s1 }
   0x3   :  { %7219 = sst [smem:[#allocation116_spill]] %s7204_s17 }
   0x4   :  { %22 = vsyncpa [#allocation3], 0 }
   0x5   :  { %23 = vsyncpa [#allocation5], 0  ;;  %s50_s26 = sshll.u32 %s7192_s5, 4  ;;  %s51_s26 = int_to_ptr.hbm [resolvable:$true] %s50_s26 }
   0x6   :  { %24 = vsyncpa [#allocation8], 0  ;;  %s4626_s27 = smov [#allocation4]   ;;  %s7220_s30 = sld [smem:[#allocation115_spill]] }
   0x7   :  { %s52_s28 = sshll.u32 %s4626_s27, 4  ;;  %s4627_s19 = smov 128   ;;  %s53_s28 = int_to_ptr.vmem [resolvable:$true] %s52_s28 }
   0x8   :  { %s4628_s1 = smov 8   ;;  %s4629_s20 = smov [#allocation2]  }
   0x9   :  { %58 = dma.hbm_to_vmem [thread:$0]  %s51_s26, 5120, %s53_s28, [#allocation5], %s4627_s19, %s4627_s19, %s4628_s1  }
   0xa   :  { %s33_s21 = sshll.u32 %s4629_s20, 4  ;;  %s4630_s22 = smov 256   ;;  %s34_s21 = int_to_ptr.vmem [resolvable:$true] %s33_s21 }
   0xb   :  { %s4631_s23 = smov 16   ;;  %s63_s25 = sshll.u32 %s7193_s6, 4  ;;  %s64_s25 = int_to_ptr.hbm [resolvable:$true] %s63_s25 }
   0xc   :  { %s31_s18 = sshll.u32 %s7220_s30, 4  ;;  %s4632_s27 = smov [#allocation6]   ;;  %s32_s18 = int_to_ptr.hbm [resolvable:$true] %s31_s18 }
   0xd   :  { %39 = dma.hbm_to_vmem [thread:$0]  %s32_s18, 5120, %s34_s21, [#allocation3], %s4630_s22, %s4630_s22, %s4631_s23  }
   0xe   :  { %s65_s17 = sshll.u32 %s4632_s27, 4  ;;  %s78_s30 = sshll.u32 %s7195_s8, 4  ;;  %s66_s17 = int_to_ptr.vmem [resolvable:$true] %s65_s17  ;;  %s79_s30 = int_to_ptr.hbm [resolvable:$true] %s78_s30 }
   0xf   :  { %71 = dma.hbm_to_vmem [thread:$0]  %s64_s25, 5760, %s66_s17, [#allocation5], %s4627_s19, %s4627_s19, %s4628_s1  }
  0x10   :  { %s4633_s26 = smov [#allocation7]  }
  0x11   :  { %s80_s28 = sshll.u32 %s4633_s26, 4  ;;  %s81_s28 = int_to_ptr.vmem [resolvable:$true] %s80_s28 }
  0x12   :  { %86 = dma.hbm_to_vmem [thread:$0]  %s79_s30, 1024, %s81_s28, [#allocation8], %s4627_s19, %s4627_s19, %s4628_s1  }
  0x13   :  { %4620 = dma.done.wait [#allocation3], 5120  }
  0x14   :  { %4621 = vsyncadd [#allocation3], 4294962176 }
  0x15   :  { %4622 = dma.done.wait [#allocation5], 10880  }
  0x16   :  { %4623 = vsyncadd [#allocation5], 4294956416 }
  0x17   :  { %4624 = dma.done.wait [#allocation8], 1024  }
  0x18   :  { %4625 = vsyncadd [#allocation8], 4294966272  ;;  %vm257_vm0 = vcmask 1043456   ;;  %v182_v0 = vld [vmem:[#allocation2 + $0x70] sm:$0xf]  ;;  %v180_v2 = vld [vmem:[#allocation2 + $0x60] sm:$0xff] }
  0x19   :  { %v149_v1 = vld [vmem:[#allocation2 + $0x30] sm:$0xf]  ;;  %3996 = vmatpush.msk.msra.mxu0 %vm257_vm0, %v182_v0  ;;  %4500 = vmatpush.msk.msra.mxu1 %vm257_vm0, %v182_v0  ;;  %v147_v3 = vld [vmem:[#allocation2 + $0x20] sm:$0xff]  ;;  %s7221_s17 = sld [smem:[#allocation114_spill]]  ;;  %vm184_vm1 = vcmask 228352   ;;  %v181_v14 = vld [vmem:[#allocation2 + $0x68] sm:$0xff] }
  0x1a   :  { %4501 = vmatpush.msk.msra.mxu3 %vm257_vm0, %v182_v0  ;;  %4046 = vmatpush.msk.msra.mxu2 %vm257_vm0, %v149_v1  ;;  %v178_v4 = vld [vmem:[#allocation2 + $0x50] sm:$0xff]  ;;  %v176_v6 = vld [vmem:[#allocation2 + $0x40] sm:$0xff]  ;;  %v183_v12 = vld [vmem:[#allocation2 + $0x78] sm:$0xf]  ;;  %vm1835_vm2 = vcmask 523264   ;;  %vm2399_vm3 = vcmask 130048  }
  0x1b   :  { %277 = vmatpush.msra.mxu0 %v180_v2  ;;  %4502 = vmatpush.msra.mxu1 %v180_v2  ;;  %v145_v5 = vld [vmem:[#allocation2 + $0x10] sm:$0xff]  ;;  %v143_v7 = vld [vmem:[#allocation2] sm:$0xff]  ;;  %v150_v13 = vld [vmem:[#allocation2 + $0x38] sm:$0xf]  ;;  %vm2687_vm4 = vcmask 785408   ;;  %vm2846_vm5 = vcmask 588800  }
  0x1c   :  { %4503 = vmatpush.msra.mxu3 %v180_v2  ;;  %533 = vmatpush.msra.mxu2 %v147_v3  ;;  %v148_v15 = vld [vmem:[#allocation2 + $0x28] sm:$0xff]  ;;  %v179_v16 = vld [vmem:[#allocation2 + $0x58] sm:$0xff]  ;;  %v729_v61 = vld [vmem:[#allocation2 + $0xb0] sm:$0xf]  ;;  %vm3663_vm6 = vcmask 261120   ;;  %vm3725_vm7 = vcmask 392192  }
  0x1d   :  { %278 = vmatpush.msra.mxu0 %v178_v4  ;;  %4504 = vmatpush.msra.mxu1 %v178_v4  ;;  %v146_v17 = vld [vmem:[#allocation2 + $0x18] sm:$0xff]  ;;  %v177_v18 = vld [vmem:[#allocation2 + $0x48] sm:$0xff]  ;;  %v727_v62 = vld [vmem:[#allocation2 + $0xa0] sm:$0xff]  ;;  %vm3909_vm8 = vcmask 982016   ;;  %vm3946_vm9 = vcmask 490496   ;;  %vm3973_vm10 = vcmask 80896  }
  0x1e   :  { %4505 = vmatpush.msra.mxu3 %v178_v4  ;;  %534 = vmatpush.msra.mxu2 %v145_v5  ;;  %v144_v19 = vld [vmem:[#allocation2 + $0x8] sm:$0xff] }
  0x1f   :  { %v151_v8 = vld [vmem:[%s7221_s17 + $0x1] sm:$0xff]  ;;  %v4746_v9 = vld [vmem:[%s7221_s17 + $0xe9] sm:$0xff]  ;;  %279 = vmatpush.msra.mxu0 %v176_v6  ;;  %4506 = vmatpush.msra.mxu1 %v176_v6  ;;  %v4751_v10 = vld [vmem:[%s7221_s17 + $0xf1] sm:$0xff] }
  0x20   :  { %v119_v11 = vld [vmem:[%s7221_s17] sm:$0xff]  ;;  %4507 = vmatpush.msra.mxu3 %v176_v6  ;;  %535 = vmatpush.msra.mxu2 %v143_v7  ;;  %v152_v20 = vld [vmem:[%s7221_s17 + $0x9] sm:$0xff]  ;;  %v153_v22 = vld [vmem:[%s7221_s17 + $0x11] sm:$0xff] }
  0x21   :  { %3997 = vmatmul.msk.f32.vlgmr.msra.gmra.mxu0 %vm184_vm1, %v151_v8  ;;  %4019 = vmatmul.msk.f32.vlgmr.msra.gmra.mxu1 %vm184_vm1, %v4746_v9  ;;  %v120_v21 = vld [vmem:[%s7221_s17 + $0x8] sm:$0xff]  ;;  %v121_v23 = vld [vmem:[%s7221_s17 + $0x10] sm:$0xff]  ;;  %v122_v25 = vld [vmem:[%s7221_s17 + $0x20] sm:$0xff] }
  0x22   :  { %4020 = vmatmul.msk.f32.vlgmr.msra.gmra.mxu3 %vm184_vm1, %v4751_v10  ;;  %4047 = vmatmul.msk.f32.vlgmr.msra.gmra.mxu2 %vm184_vm1, %v119_v11  ;;  %v154_v24 = vld [vmem:[%s7221_s17 + $0x21] sm:$0xff]  ;;  %v155_v26 = vld [vmem:[%s7221_s17 + $0x29] sm:$0xff]  ;;  %v156_v28 = vld [vmem:[%s7221_s17 + $0x31] sm:$0xff] }
  0x23   :  { %4021 = vmatpush.msk.msrb.mxu1 %vm257_vm0, %v183_v12  ;;  %4071 = vmatpush.msk.msrb.mxu3 %vm257_vm0, %v150_v13  ;;  %v123_v27 = vld [vmem:[%s7221_s17 + $0x28] sm:$0xff]  ;;  %v124_v29 = vld [vmem:[%s7221_s17 + $0x30] sm:$0xff]  ;;  %v125_v31 = vld [vmem:[%s7221_s17 + $0x40] sm:$0xff] }
  0x24   :  { %v157_v30 = vld [vmem:[%s7221_s17 + $0x41] sm:$0xff]  ;;  %v158_v32 = vld [vmem:[%s7221_s17 + $0x49] sm:$0xff]  ;;  %v159_v34 = vld [vmem:[%s7221_s17 + $0x51] sm:$0xff]  ;;  %4096 = vmatpush.msk.msrb.mxu0 %vm257_vm0, %v729_v61 }
  0x25   :  { %366 = vmatpush.msrb.mxu1 %v181_v14  ;;  %622 = vmatpush.msrb.mxu3 %v148_v15  ;;  %v126_v33 = vld [vmem:[%s7221_s17 + $0x48] sm:$0xff]  ;;  %v127_v35 = vld [vmem:[%s7221_s17 + $0x50] sm:$0xff]  ;;  %v128_v37 = vld [vmem:[%s7221_s17 + $0x60] sm:$0xff] }
  0x26   :  { %v160_v36 = vld [vmem:[%s7221_s17 + $0x61] sm:$0xff]  ;;  %v161_v38 = vld [vmem:[%s7221_s17 + $0x69] sm:$0xff]  ;;  %v162_v40 = vld [vmem:[%s7221_s17 + $0x71] sm:$0xff]  ;;  %822 = vmatpush.msrb.mxu0 %v727_v62 }
  0x27   :  { %367 = vmatpush.msrb.mxu1 %v179_v16  ;;  %623 = vmatpush.msrb.mxu3 %v146_v17  ;;  %v129_v39 = vld [vmem:[%s7221_s17 + $0x68] sm:$0xff]  ;;  %v130_v41 = vld [vmem:[%s7221_s17 + $0x70] sm:$0xff]  ;;  %v131_v43 = vld [vmem:[%s7221_s17 + $0x80] sm:$0xff] }
  0x28   :  { %v163_v42 = vld [vmem:[%s7221_s17 + $0x81] sm:$0xff]  ;;  %v164_v44 = vld [vmem:[%s7221_s17 + $0x89] sm:$0xff]  ;;  %v165_v46 = vld [vmem:[%s7221_s17 + $0x91] sm:$0xff] }
  0x29   :  { %368 = vmatpush.msrb.mxu1 %v177_v18  ;;  %624 = vmatpush.msrb.mxu3 %v144_v19  ;;  %v132_v45 = vld [vmem:[%s7221_s17 + $0x88] sm:$0xff]  ;;  %v133_v47 = vld [vmem:[%s7221_s17 + $0x90] sm:$0xff]  ;;  %v134_v49 = vld [vmem:[%s7221_s17 + $0xa0] sm:$0xff] }
  0x2a   :  { %3998 = vmatmul.msk.f32.gmra.mxu0 %vm184_vm1, %v152_v20  ;;  %4022 = vmatmul.msk.f32.vlgmr.msrb.gmra.mxu1 %vm184_vm1, %v151_v8  ;;  %v166_v48 = vld [vmem:[%s7221_s17 + $0xa1] sm:$0xff]  ;;  %v167_v52 = vld [vmem:[%s7221_s17 + $0xa9] sm:$0xff]  ;;  %v168_v59 = vld [vmem:[%s7221_s17 + $0xb1] sm:$0xff] }
  0x2b   :  { %4048 = vmatmul.msk.f32.gmra.mxu2 %vm184_vm1, %v120_v21  ;;  %4072 = vmatmul.msk.f32.vlgmr.msrb.gmra.mxu3 %vm184_vm1, %v119_v11  ;;  %v135_v53 = vld [vmem:[%s7221_s17 + $0xa8] sm:$0xff]  ;;  %v136_v60 = vld [vmem:[%s7221_s17 + $0xb0] sm:$0xff]  ;;  %v137_v7 = vld [vmem:[%s7221_s17 + $0xc0] sm:$0xff] }
  0x2c   :  { %v169_v5 = vld [vmem:[%s7221_s17 + $0xc1] sm:$0xff]  ;;  %v725_v6 = vld [vmem:[#allocation2 + $0x90] sm:$0xff] }
  0x2d   :  { %823 = vmatpush.msrb.mxu0 %v725_v6  ;;  %v723_v8 = vld [vmem:[#allocation2 + $0x80] sm:$0xff]  ;;  %v170_v17 = vld [vmem:[%s7221_s17 + $0xc9] sm:$0xff] }
  0x2e   :  { %v138_v18 = vld [vmem:[%s7221_s17 + $0xc8] sm:$0xff]  ;;  %v1066_v19 = vld [vmem:[#allocation2 + $0xf0] sm:$0xf] }
  0x2f   :  { %824 = vmatpush.msrb.mxu0 %v723_v8  ;;  %4146 = vmatpush.msk.msrb.mxu2 %vm257_vm0, %v1066_v19 }
  0x32   :  { %3999 = vmatmul.msk.f32.gmra.mxu0 %vm184_vm1, %v153_v22  ;;  %4023 = vmatmul.msk.f32.gmra.mxu1 %vm184_vm1, %v152_v20  ;;  %v1064_v20 = vld [vmem:[#allocation2 + $0xe0] sm:$0xff] }
  0x33   :  { %4049 = vmatmul.msk.f32.gmra.mxu2 %vm184_vm1, %v121_v23  ;;  %4073 = vmatmul.msk.f32.gmra.mxu3 %vm184_vm1, %v120_v21 }
  0x34   :  { %1159 = vmatpush.msrb.mxu2 %v1064_v20 }
  0x3a   :  { %4000 = vmatmul.msk.f32.gmra.mxu0 %vm184_vm1, %v154_v24  ;;  %4024 = vmatmul.msk.f32.gmra.mxu1 %vm184_vm1, %v153_v22 }
  0x3b   :  { %4050 = vmatmul.msk.f32.gmra.mxu2 %vm184_vm1, %v122_v25  ;;  %4074 = vmatmul.msk.f32.gmra.mxu3 %vm184_vm1, %v121_v23 }
  0x42   :  { %4001 = vmatmul.msk.f32.gmra.mxu0 %vm184_vm1, %v155_v26  ;;  %4025 = vmatmul.msk.f32.gmra.mxu1 %vm184_vm1, %v154_v24 }
  0x43   :  { %4051 = vmatmul.msk.f32.gmra.mxu2 %vm184_vm1, %v123_v27  ;;  %4075 = vmatmul.msk.f32.gmra.mxu3 %vm184_vm1, %v122_v25 }
  0x4a   :  { %4002 = vmatmul.msk.f32.gmra.mxu0 %vm184_vm1, %v156_v28  ;;  %4026 = vmatmul.msk.f32.gmra.mxu1 %vm184_vm1, %v155_v26 }
  0x4b   :  { %4052 = vmatmul.msk.f32.gmra.mxu2 %vm184_vm1, %v124_v29  ;;  %4076 = vmatmul.msk.f32.gmra.mxu3 %vm184_vm1, %v123_v27  ;;  %v171_v27 = vld [vmem:[%s7221_s17 + $0xd1] sm:$0xff] }
  0x52   :  { %4003 = vmatmul.msk.f32.gmra.mxu0 %vm184_vm1, %v157_v30  ;;  %4027 = vmatmul.msk.f32.gmra.mxu1 %vm184_vm1, %v156_v28  ;;  %v1062_v28 = vld [vmem:[#allocation2 + $0xd0] sm:$0xff] }
  0x53   :  { %4053 = vmatmul.msk.f32.gmra.mxu2 %vm184_vm1, %v125_v31  ;;  %4077 = vmatmul.msk.f32.gmra.mxu3 %vm184_vm1, %v124_v29  ;;  %v139_v29 = vld [vmem:[%s7221_s17 + $0xd0] sm:$0xff] }
  0x54   :  { %1160 = vmatpush.msrb.mxu2 %v1062_v28 }
  0x5a   :  { %4004 = vmatmul.msk.f32.gmra.mxu0 %vm184_vm1, %v158_v32  ;;  %4028 = vmatmul.msk.f32.gmra.mxu1 %vm184_vm1, %v157_v30  ;;  %v1060_v30 = vld [vmem:[#allocation2 + $0xc0] sm:$0xff] }
  0x5b   :  { %4054 = vmatmul.msk.f32.gmra.mxu2 %vm184_vm1, %v126_v33  ;;  %4078 = vmatmul.msk.f32.gmra.mxu3 %vm184_vm1, %v125_v31  ;;  %v730_v31 = vld [vmem:[#allocation2 + $0xb8] sm:$0xf] }
  0x5c   :  { %1161 = vmatpush.msrb.mxu2 %v1060_v30  ;;  %4121 = vmatpush.msk.msra.mxu1 %vm257_vm0, %v730_v31  ;;  %v702_v30 = vld [vmem:[%s7221_s17 + $0x2a] sm:$0xff]  ;;  %v1037_v31 = vld [vmem:[%s7221_s17 + $0x13] sm:$0xff] }
  0x62   :  { %4005 = vmatmul.msk.f32.gmra.mxu0 %vm184_vm1, %v159_v34  ;;  %4029 = vmatmul.msk.f32.gmra.mxu1 %vm184_vm1, %v158_v32  ;;  %v1067_v32 = vld [vmem:[#allocation2 + $0xf8] sm:$0xf] }
  0x63   :  { %4055 = vmatmul.msk.f32.gmra.mxu2 %vm184_vm1, %v127_v35  ;;  %4079 = vmatmul.msk.f32.gmra.mxu3 %vm184_vm1, %v126_v33  ;;  %v728_v33 = vld [vmem:[#allocation2 + $0xa8] sm:$0xff] }
  0x64   :  { %4171 = vmatpush.msk.msra.mxu3 %vm257_vm0, %v1067_v32  ;;  %911 = vmatpush.msra.mxu1 %v728_v33 }
  0x6a   :  { %4006 = vmatmul.msk.f32.gmra.mxu0 %vm184_vm1, %v160_v36  ;;  %4030 = vmatmul.msk.f32.gmra.mxu1 %vm184_vm1, %v159_v34  ;;  %v1065_v34 = vld [vmem:[#allocation2 + $0xe8] sm:$0xff] }
  0x6b   :  { %4056 = vmatmul.msk.f32.gmra.mxu2 %vm184_vm1, %v128_v37  ;;  %4080 = vmatmul.msk.f32.gmra.mxu3 %vm184_vm1, %v127_v35 }
  0x6c   :  { %1248 = vmatpush.msra.mxu3 %v1065_v34 }
  0x72   :  { %4007 = vmatmul.msk.f32.gmra.mxu0 %vm184_vm1, %v161_v38  ;;  %4031 = vmatmul.msk.f32.gmra.mxu1 %vm184_vm1, %v160_v36 }
  0x73   :  { %4057 = vmatmul.msk.f32.gmra.mxu2 %vm184_vm1, %v129_v39  ;;  %4081 = vmatmul.msk.f32.gmra.mxu3 %vm184_vm1, %v128_v37 }
  0x7a   :  { %4008 = vmatmul.msk.f32.gmra.mxu0 %vm184_vm1, %v162_v40  ;;  %4032 = vmatmul.msk.f32.gmra.mxu1 %vm184_vm1, %v161_v38 }
  0x7b   :  { %4058 = vmatmul.msk.f32.gmra.mxu2 %vm184_vm1, %v130_v41  ;;  %4082 = vmatmul.msk.f32.gmra.mxu3 %vm184_vm1, %v129_v39 }
  0x82   :  { %4009 = vmatmul.msk.f32.gmra.mxu0 %vm184_vm1, %v163_v42  ;;  %4033 = vmatmul.msk.f32.gmra.mxu1 %vm184_vm1, %v162_v40 }
  0x83   :  { %4059 = vmatmul.msk.f32.gmra.mxu2 %vm184_vm1, %v131_v43  ;;  %4083 = vmatmul.msk.f32.gmra.mxu3 %vm184_vm1, %v130_v41  ;;  %v172_v41 = vld [vmem:[%s7221_s17 + $0xe1] sm:$0xff] }
  0x8a   :  { %4010 = vmatmul.msk.f32.gmra.mxu0 %vm184_vm1, %v164_v44  ;;  %4034 = vmatmul.msk.f32.gmra.mxu1 %vm184_vm1, %v163_v42  ;;  %v726_v42 = vld [vmem:[#allocation2 + $0x98] sm:$0xff] }
  0x8b   :  { %4060 = vmatmul.msk.f32.gmra.mxu2 %vm184_vm1, %v132_v45  ;;  %4084 = vmatmul.msk.f32.gmra.mxu3 %vm184_vm1, %v131_v43  ;;  %v1063_v43 = vld [vmem:[#allocation2 + $0xd8] sm:$0xff] }
  0x8c   :  { %912 = vmatpush.msra.mxu1 %v726_v42  ;;  %1249 = vmatpush.msra.mxu3 %v1063_v43 }
  0x92   :  { %4011 = vmatmul.msk.f32.gmra.mxu0 %vm184_vm1, %v165_v46  ;;  %4035 = vmatmul.msk.f32.gmra.mxu1 %vm184_vm1, %v164_v44  ;;  %v140_v44 = vld [vmem:[%s7221_s17 + $0xe0] sm:$0xff] }
  0x93   :  { %4061 = vmatmul.msk.f32.gmra.mxu2 %vm184_vm1, %v133_v47  ;;  %4085 = vmatmul.msk.f32.gmra.mxu3 %vm184_vm1, %v132_v45  ;;  %v724_v45 = vld [vmem:[#allocation2 + $0x88] sm:$0xff] }
  0x94   :  { %913 = vmatpush.msra.mxu1 %v724_v45 }
  0x9a   :  { %4012 = vmatmul.msk.f32.gmra.mxu0 %vm184_vm1, %v166_v48  ;;  %4036 = vmatmul.msk.f32.gmra.mxu1 %vm184_vm1, %v165_v46  ;;  %v1061_v46 = vld [vmem:[#allocation2 + $0xc8] sm:$0xff] }
  0x9b   :  { %4062 = vmatmul.msk.f32.gmra.mxu2 %vm184_vm1, %v134_v49  ;;  %4086 = vmatmul.msk.f32.gmra.mxu3 %vm184_vm1, %v133_v47 }
  0x9c   :  { %1250 = vmatpush.msra.mxu3 %v1061_v46 }
  0x9e   :  { %v281_v50 = vpop.f32.mrf.mxu0  ;;  %v4914_v51 = vpop.f32.mrf.mxu1 }
  0x9f   :  { %7222 = vst [vmem:[#allocation12_spill] sm:$0xff] %v4914_v51 }
  0xa2   :  { %4013 = vmatmul.msk.f32.gmra.mxu0 %vm184_vm1, %v167_v52  ;;  %4037 = vmatmul.msk.f32.gmra.mxu1 %vm184_vm1, %v166_v48 }
  0xa3   :  { %4063 = vmatmul.msk.f32.gmra.mxu2 %vm184_vm1, %v135_v53  ;;  %4087 = vmatmul.msk.f32.gmra.mxu3 %vm184_vm1, %v134_v49 }
  0xa5   :  { %v4926_v54 = vpop.f32.mrf.mxu3  ;;  %v537_v55 = vpop.f32.mrf.mxu2 }
  0xa6   :  { %7223 = vst [vmem:[#allocation13_spill] sm:$0xff] %v4926_v54  ;;  %v4928_v56 = vadd.f32 %v537_v55, %v281_v50  ;;  %v698_v55 = vld [vmem:[%s7221_s17 + $0x2] sm:$0xff] }
  0xa7   :  { %v284_v57 = vpop.f32.mrf.mxu0  ;;  %v370_v58 = vpop.f32.mrf.mxu1 }
  0xa8   :  { %7224 = vst [vmem:[#allocation14_spill] sm:$0xff] %v4928_v56 }
  0xaa   :  { %4014 = vmatmul.msk.f32.gmra.mxu0 %vm184_vm1, %v168_v59  ;;  %4038 = vmatmul.msk.f32.gmra.mxu1 %vm184_vm1, %v167_v52 }
  0xab   :  { %4064 = vmatmul.msk.f32.gmra.mxu2 %vm184_vm1, %v136_v60  ;;  %4088 = vmatmul.msk.f32.gmra.mxu3 %vm184_vm1, %v135_v53 }
  0xae   :  { %v540_v63 = vpop.f32.mrf.mxu2  ;;  %v626_v0 = vpop.f32.mrf.mxu3 }
  0xaf   :  { %v4941_v1 = vadd.f32 %v540_v63, %v284_v57  ;;  %v4943_v2 = vadd.f32 %v626_v0, %v370_v58  ;;  %v287_v3 = vpop.f32.mrf.mxu0  ;;  %v373_v4 = vpop.f32.mrf.mxu1  ;;  %v141_v57 = vld [vmem:[%s7221_s17 + $0xe8] sm:$0xff] }
  0xb0   :  { %v699_v0 = vld [vmem:[%s7221_s17 + $0xa] sm:$0xff] }
  0xb1   :  { %7225 = vst [vmem:[#allocation15_spill] sm:$0xff] %v4943_v2 }
  0xb2   :  { %4015 = vmatmul.msk.f32.gmra.mxu0 %vm184_vm1, %v169_v5  ;;  %4039 = vmatmul.msk.f32.gmra.mxu1 %vm184_vm1, %v168_v59 }
  0xb3   :  { %4065 = vmatmul.msk.f32.gmra.mxu2 %vm184_vm1, %v137_v7  ;;  %4089 = vmatmul.msk.f32.gmra.mxu3 %vm184_vm1, %v136_v60 }
  0xb6   :  { %v543_v11 = vpop.f32.mrf.mxu2  ;;  %v629_v12 = vpop.f32.mrf.mxu3 }
  0xb7   :  { %v4955_v13 = vadd.f32 %v543_v11, %v287_v3  ;;  %v4957_v14 = vadd.f32 %v629_v12, %v373_v4  ;;  %v290_v15 = vpop.f32.mrf.mxu0  ;;  %v376_v16 = vpop.f32.mrf.mxu1  ;;  %v142_v3 = vld [vmem:[%s7221_s17 + $0xf0] sm:$0xff] }
  0xb8   :  { %v700_v12 = vld [vmem:[%s7221_s17 + $0x12] sm:$0xff] }
  0xb9   :  { %7226 = vst [vmem:[#allocation16_spill] sm:$0xff] %v4957_v14 }
  0xba   :  { %4016 = vmatmul.msk.f32.gmra.mxu0 %vm184_vm1, %v170_v17  ;;  %4040 = vmatmul.msk.f32.gmra.mxu1 %vm184_vm1, %v169_v5 }
  0xbb   :  { %4066 = vmatmul.msk.f32.gmra.mxu2 %vm184_vm1, %v138_v18  ;;  %4090 = vmatmul.msk.f32.gmra.mxu3 %vm184_vm1, %v137_v7 }
  0xbe   :  { %v546_v21 = vpop.f32.mrf.mxu2  ;;  %v632_v22 = vpop.f32.mrf.mxu3 }
  0xbf   :  { %v4970_v23 = vadd.f32 %v546_v21, %v290_v15  ;;  %v4972_v24 = vadd.f32 %v632_v22, %v376_v16  ;;  %v293_v25 = vpop.f32.mrf.mxu0  ;;  %v379_v26 = vpop.f32.mrf.mxu1  ;;  %v701_v21 = vld [vmem:[%s7221_s17 + $0x22] sm:$0xff] }
  0xc1   :  { %7227 = vst [vmem:[#allocation17_spill] sm:$0xff] %v4972_v24 }
  0xc2   :  { %4017 = vmatmul.msk.f32.gmra.mxu0 %vm184_vm1, %v171_v27  ;;  %4041 = vmatmul.msk.f32.gmra.mxu1 %vm184_vm1, %v170_v17 }
  0xc3   :  { %4067 = vmatmul.msk.f32.gmra.mxu2 %vm184_vm1, %v139_v29  ;;  %4091 = vmatmul.msk.f32.gmra.mxu3 %vm184_vm1, %v138_v18 }
  0xc6   :  { %v549_v35 = vpop.f32.mrf.mxu2  ;;  %v635_v36 = vpop.f32.mrf.mxu3 }
  0xc7   :  { %v4986_v37 = vadd.f32 %v549_v35, %v293_v25  ;;  %v4988_v38 = vadd.f32 %v635_v36, %v379_v26  ;;  %v296_v39 = vpop.f32.mrf.mxu0  ;;  %v382_v40 = vpop.f32.mrf.mxu1 }
  0xc9   :  { %7228 = vst [vmem:[#allocation18_spill] sm:$0xff] %v4988_v38 }
  0xca   :  { %4018 = vmatmul.msk.f32.gmra.mxu0 %vm184_vm1, %v172_v41  ;;  %4042 = vmatmul.msk.f32.gmra.mxu1 %vm184_vm1, %v171_v27 }
  0xcb   :  { %4068 = vmatmul.msk.f32.gmra.mxu2 %vm184_vm1, %v140_v44  ;;  %4092 = vmatmul.msk.f32.gmra.mxu3 %vm184_vm1, %v139_v29 }
  0xce   :  { %v552_v47 = vpop.f32.mrf.mxu2  ;;  %v638_v48 = vpop.f32.mrf.mxu3 }
  0xcf   :  { %v5000_v49 = vadd.f32 %v552_v47, %v296_v39  ;;  %v5002_v50 = vadd.f32 %v638_v48, %v382_v40  ;;  %v299_v52 = vpop.f32.mrf.mxu0  ;;  %v385_v53 = vpop.f32.mrf.mxu1  ;;  %v703_v40 = vld [vmem:[%s7221_s17 + $0x32] sm:$0xff]  ;;  %v704_v48 = vld [vmem:[%s7221_s17 + $0x42] sm:$0xff] }
  0xd1   :  { %7229 = vst [vmem:[#allocation19_spill] sm:$0xff] %v5002_v50 }
  0xd2   :  { %4043 = vmatmul.msk.f32.gmra.mxu1 %vm184_vm1, %v172_v41  ;;  %4097 = vmatmul.msk.f32.vlgmr.msrb.gmra.mxu0 %vm184_vm1, %v698_v55  ;;  %v1038_v41 = vld [vmem:[%s7221_s17 + $0x23] sm:$0xff] }
  0xd3   :  { %4069 = vmatmul.msk.f32.gmra.mxu2 %vm184_vm1, %v141_v57  ;;  %4093 = vmatmul.msk.f32.gmra.mxu3 %vm184_vm1, %v140_v44 }
  0xd6   :  { %v555_v58 = vpop.f32.mrf.mxu2  ;;  %v641_v59 = vpop.f32.mrf.mxu3 }
  0xd7   :  { %v5014_v60 = vadd.f32 %v555_v58, %v299_v52  ;;  %v5016_v61 = vadd.f32 %v641_v59, %v385_v53  ;;  %v302_v62 = vpop.f32.mrf.mxu0  ;;  %v388_v63 = vpop.f32.mrf.mxu1  ;;  %v1039_v52 = vld [vmem:[%s7221_s17 + $0x2b] sm:$0xff] }
  0xd9   :  { %7230 = vst [vmem:[#allocation20_spill] sm:$0xff] %v5016_v61 }
  0xda   :  { %4044 = vmatmul.msk.f32.gmra.mxu1 %vm184_vm1, %v4746_v9  ;;  %4098 = vmatmul.msk.f32.gmra.mxu0 %vm184_vm1, %v699_v0  ;;  %v1035_v9 = vld [vmem:[%s7221_s17 + $0x3] sm:$0xff] }
  0xdb   :  { %4070 = vmatmul.msk.f32.gmra.mxu2 %vm184_vm1, %v142_v3  ;;  %4094 = vmatmul.msk.f32.gmra.mxu3 %vm184_vm1, %v141_v57 }
  0xde   :  { %v558_v4 = vpop.f32.mrf.mxu2  ;;  %v644_v5 = vpop.f32.mrf.mxu3 }
  0xdf   :  { %v5029_v6 = vadd.f32 %v558_v4, %v302_v62  ;;  %v5031_v7 = vadd.f32 %v644_v5, %v388_v63  ;;  %v305_v8 = vpop.f32.mrf.mxu0  ;;  %v391_v11 = vpop.f32.mrf.mxu1  ;;  %v705_v63 = vld [vmem:[%s7221_s17 + $0x4a] sm:$0xff] }
  0xe1   :  { %7231 = vst [vmem:[#allocation21_spill] sm:$0xff] %v5031_v7 }
  0xe2   :  { %4045 = vmatmul.msk.f32.gmra.mxu1 %vm184_vm1, %v4751_v10  ;;  %4099 = vmatmul.msk.f32.gmra.mxu0 %vm184_vm1, %v700_v12  ;;  %v1036_v10 = vld [vmem:[%s7221_s17 + $0xb] sm:$0xff] }
  0xe3   :  { %4095 = vmatmul.msk.f32.gmra.mxu3 %vm184_vm1, %v142_v3  ;;  %4147 = vmatmul.msk.f32.vlgmr.msrb.gmra.mxu2 %vm184_vm1, %v1035_v9 }
  0xe6   :  { %v561_v15 = vpop.f32.mrf.mxu2  ;;  %v647_v16 = vpop.f32.mrf.mxu3 }
  0xe7   :  { %v5044_v17 = vadd.f32 %v561_v15, %v305_v8  ;;  %v5046_v18 = vadd.f32 %v647_v16, %v391_v11  ;;  %v308_v19 = vpop.f32.mrf.mxu0  ;;  %v394_v20 = vpop.f32.mrf.mxu1  ;;  %v1041_v15 = vld [vmem:[%s7221_s17 + $0x43] sm:$0xff] }
  0xe9   :  { %7232 = vst [vmem:[#allocation22_spill] sm:$0xff] %v5046_v18 }
  0xea   :  { %4100 = vmatmul.msk.f32.gmra.mxu0 %vm184_vm1, %v701_v21  ;;  %4122 = vmatmul.msk.f32.vlgmr.msra.gmra.mxu1 %vm184_vm1, %v698_v55 }
  0xeb   :  { %4148 = vmatmul.msk.f32.gmra.mxu2 %vm184_vm1, %v1036_v10  ;;  %4172 = vmatmul.msk.f32.vlgmr.msra.gmra.mxu3 %vm184_vm1, %v1035_v9  ;;  %v706_v9 = vld [vmem:[%s7221_s17 + $0x52] sm:$0xff] }
  0xee   :  { %v564_v22 = vpop.f32.mrf.mxu2  ;;  %v650_v25 = vpop.f32.mrf.mxu3 }
  0xef   :  { %v5058_v26 = vadd.f32 %v564_v22, %v308_v19  ;;  %v5060_v27 = vadd.f32 %v650_v25, %v394_v20  ;;  %v311_v28 = vpop.f32.mrf.mxu0  ;;  %v397_v29 = vpop.f32.mrf.mxu1  ;;  %v707_v25 = vld [vmem:[%s7221_s17 + $0x62] sm:$0xff] }
  0xf1   :  { %7233 = vst [vmem:[#allocation23_spill] sm:$0xff] %v5060_v27 }
  0xf2   :  { %4101 = vmatmul.msk.f32.gmra.mxu0 %vm184_vm1, %v702_v30  ;;  %4123 = vmatmul.msk.f32.gmra.mxu1 %vm184_vm1, %v699_v0  ;;  %v1040_v0 = vld [vmem:[%s7221_s17 + $0x33] sm:$0xff] }
  0xf3   :  { %4149 = vmatmul.msk.f32.gmra.mxu2 %vm184_vm1, %v1037_v31  ;;  %4173 = vmatmul.msk.f32.gmra.mxu3 %vm184_vm1, %v1036_v10 }
  0xf6   :  { %v567_v32 = vpop.f32.mrf.mxu2  ;;  %v653_v33 = vpop.f32.mrf.mxu3 }
  0xf7   :  { %v5072_v34 = vadd.f32 %v567_v32, %v311_v28  ;;  %v5074_v35 = vadd.f32 %v653_v33, %v397_v29  ;;  %v314_v36 = vpop.f32.mrf.mxu0  ;;  %v400_v39 = vpop.f32.mrf.mxu1  ;;  %v1042_v28 = vld [vmem:[%s7221_s17 + $0x4b] sm:$0xff] }
  0xf9   :  { %7234 = vst [vmem:[#allocation24_spill] sm:$0xff] %v5074_v35 }
  0xfa   :  { %4102 = vmatmul.msk.f32.gmra.mxu0 %vm184_vm1, %v703_v40  ;;  %4124 = vmatmul.msk.f32.gmra.mxu1 %vm184_vm1, %v700_v12 }
  0xfb   :  { %4150 = vmatmul.msk.f32.gmra.mxu2 %vm184_vm1, %v1038_v41  ;;  %4174 = vmatmul.msk.f32.gmra.mxu3 %vm184_vm1, %v1037_v31 }
  0xfe   :  { %v570_v42 = vpop.f32.mrf.mxu2  ;;  %v656_v43 = vpop.f32.mrf.mxu3 }
  0xff   :  { %v5086_v44 = vadd.f32 %v570_v42, %v314_v36  ;;  %v5088_v45 = vadd.f32 %v656_v43, %v400_v39  ;;  %v317_v46 = vpop.f32.mrf.mxu0  ;;  %v403_v47 = vpop.f32.mrf.mxu1  ;;  %v708_v39 = vld [vmem:[%s7221_s17 + $0x6a] sm:$0xff] }
 0x101   :  { %7235 = vst [vmem:[#allocation25_spill] sm:$0xff] %v5088_v45 }
 0x102   :  { %4103 = vmatmul.msk.f32.gmra.mxu0 %vm184_vm1, %v704_v48  ;;  %4125 = vmatmul.msk.f32.gmra.mxu1 %vm184_vm1, %v701_v21 }
 0x103   :  { %4151 = vmatmul.msk.f32.gmra.mxu2 %vm184_vm1, %v1039_v52  ;;  %4175 = vmatmul.msk.f32.gmra.mxu3 %vm184_vm1, %v1038_v41 }
 0x106   :  { %v573_v53 = vpop.f32.mrf.mxu2  ;;  %v659_v55 = vpop.f32.mrf.mxu3 }
 0x107   :  { %v5100_v57 = vadd.f32 %v573_v53, %v317_v46  ;;  %v5102_v58 = vadd.f32 %v659_v55, %v403_v47  ;;  %v320_v59 = vpop.f32.mrf.mxu0  ;;  %v406_v62 = vpop.f32.mrf.mxu1  ;;  %v1044_v53 = vld [vmem:[%s7221_s17 + $0x63] sm:$0xff] }
 0x109   :  { %7236 = vst [vmem:[#allocation26_spill] sm:$0xff] %v5102_v58 }
 0x10a   :  { %4104 = vmatmul.msk.f32.gmra.mxu0 %vm184_vm1, %v705_v63  ;;  %4126 = vmatmul.msk.f32.gmra.mxu1 %vm184_vm1, %v702_v30 }
 0x10b   :  { %4152 = vmatmul.msk.f32.gmra.mxu2 %vm184_vm1, %v1040_v0  ;;  %4176 = vmatmul.msk.f32.gmra.mxu3 %vm184_vm1, %v1039_v52  ;;  %v709_v52 = vld [vmem:[%s7221_s17 + $0x72] sm:$0xff] }
 0x10e   :  { %v576_v3 = vpop.f32.mrf.mxu2  ;;  %v662_v4 = vpop.f32.mrf.mxu3 }
 0x10f   :  { %v5114_v5 = vadd.f32 %v576_v3, %v320_v59  ;;  %v5116_v8 = vadd.f32 %v662_v4, %v406_v62  ;;  %v323_v11 = vpop.f32.mrf.mxu0  ;;  %v409_v12 = vpop.f32.mrf.mxu1  ;;  %v710_v4 = vld [vmem:[%s7221_s17 + $0x82] sm:$0xff] }
 0x111   :  { %7237 = vst [vmem:[#allocation27_spill] sm:$0xff] %v5116_v8 }
 0x112   :  { %4105 = vmatmul.msk.f32.gmra.mxu0 %vm184_vm1, %v706_v9  ;;  %4127 = vmatmul.msk.f32.gmra.mxu1 %vm184_vm1, %v703_v40  ;;  %v1043_v40 = vld [vmem:[%s7221_s17 + $0x53] sm:$0xff] }
 0x113   :  { %4153 = vmatmul.msk.f32.gmra.mxu2 %vm184_vm1, %v1041_v15  ;;  %4177 = vmatmul.msk.f32.gmra.mxu3 %vm184_vm1, %v1040_v0 }
 0x116   :  { %v579_v16 = vpop.f32.mrf.mxu2  ;;  %v665_v19 = vpop.f32.mrf.mxu3 }
 0x117   :  { %v5128_v20 = vadd.f32 %v579_v16, %v323_v11  ;;  %v5130_v21 = vadd.f32 %v665_v19, %v409_v12  ;;  %v326_v10 = vpop.f32.mrf.mxu0  ;;  %v412_v22 = vpop.f32.mrf.mxu1  ;;  %v1045_v11 = vld [vmem:[%s7221_s17 + $0x6b] sm:$0xff] }
 0x119   :  { %7238 = vst [vmem:[#allocation28_spill] sm:$0xff] %v5130_v21 }
 0x11a   :  { %4106 = vmatmul.msk.f32.gmra.mxu0 %vm184_vm1, %v707_v25  ;;  %4128 = vmatmul.msk.f32.gmra.mxu1 %vm184_vm1, %v704_v48 }
 0x11b   :  { %4154 = vmatmul.msk.f32.gmra.mxu2 %vm184_vm1, %v1042_v28  ;;  %4178 = vmatmul.msk.f32.gmra.mxu3 %vm184_vm1, %v1041_v15 }
 0x11e   :  { %v582_v29 = vpop.f32.mrf.mxu2  ;;  %v668_v30 = vpop.f32.mrf.mxu3 }
 0x11f   :  { %v5142_v31 = vadd.f32 %v582_v29, %v326_v10  ;;  %v5144_v32 = vadd.f32 %v668_v30, %v412_v22  ;;  %v329_v33 = vpop.f32.mrf.mxu0  ;;  %v415_v36 = vpop.f32.mrf.mxu1  ;;  %v711_v22 = vld [vmem:[%s7221_s17 + $0x8a] sm:$0xff] }
 0x121   :  { %7239 = vst [vmem:[#allocation29_spill] sm:$0xff] %v5144_v32 }
 0x122   :  { %4107 = vmatmul.msk.f32.gmra.mxu0 %vm184_vm1, %v708_v39  ;;  %4129 = vmatmul.msk.f32.gmra.mxu1 %vm184_vm1, %v705_v63 }
 0x123   :  { %4155 = vmatmul.msk.f32.gmra.mxu2 %vm184_vm1, %v1043_v40  ;;  %4179 = vmatmul.msk.f32.gmra.mxu3 %vm184_vm1, %v1042_v28 }
 0x126   :  { %v585_v41 = vpop.f32.mrf.mxu2  ;;  %v671_v42 = vpop.f32.mrf.mxu3 }
 0x127   :  { %v5156_v43 = vadd.f32 %v585_v41, %v329_v33  ;;  %v5158_v46 = vadd.f32 %v671_v42, %v415_v36  ;;  %v332_v47 = vpop.f32.mrf.mxu0  ;;  %v418_v48 = vpop.f32.mrf.mxu1  ;;  %v712_v41 = vld [vmem:[%s7221_s17 + $0x92] sm:$0xff] }
 0x129   :  { %7240 = vst [vmem:[#allocation30_spill] sm:$0xff] %v5156_v43 }
 0x12a   :  { %7241 = vst [vmem:[#allocation31_spill] sm:$0xff] %v5158_v46  ;;  %4108 = vmatmul.msk.f32.gmra.mxu0 %vm184_vm1, %v709_v52  ;;  %4130 = vmatmul.msk.f32.gmra.mxu1 %vm184_vm1, %v706_v9 }
 0x12b   :  { %4156 = vmatmul.msk.f32.gmra.mxu2 %vm184_vm1, %v1044_v53  ;;  %4180 = vmatmul.msk.f32.gmra.mxu3 %vm184_vm1, %v1043_v40 }
 0x12e   :  { %v588_v55 = vpop.f32.mrf.mxu2  ;;  %v674_v59 = vpop.f32.mrf.mxu3 }
 0x12f   :  { %v5170_v62 = vadd.f32 %v588_v55, %v332_v47  ;;  %v5172_v63 = vadd.f32 %v674_v59, %v418_v48  ;;  %v335_v0 = vpop.f32.mrf.mxu0  ;;  %v421_v3 = vpop.f32.mrf.mxu1 }
 0x131   :  { %7242 = vst [vmem:[#allocation32_spill] sm:$0xff] %v5170_v62  ;;  %v1058_v62 = vld [vmem:[%s7221_s17 + $0xf3] sm:$0xff] }
 0x132   :  { %7243 = vst [vmem:[#allocation33_spill] sm:$0xff] %v5172_v63  ;;  %4109 = vmatmul.msk.f32.gmra.mxu0 %vm184_vm1, %v710_v4  ;;  %4131 = vmatmul.msk.f32.gmra.mxu1 %vm184_vm1, %v707_v25  ;;  %v1046_v25 = vld [vmem:[%s7221_s17 + $0x73] sm:$0xff]  ;;  %v1053_v63 = vld [vmem:[%s7221_s17 + $0xc3] sm:$0xff] }
 0x133   :  { %4157 = vmatmul.msk.f32.gmra.mxu2 %vm184_vm1, %v1045_v11  ;;  %4181 = vmatmul.msk.f32.gmra.mxu3 %vm184_vm1, %v1044_v53 }
 0x136   :  { %v591_v12 = vpop.f32.mrf.mxu2  ;;  %v677_v9 = vpop.f32.mrf.mxu3 }
 0x137   :  { %v5184_v15 = vadd.f32 %v591_v12, %v335_v0  ;;  %v5186_v16 = vadd.f32 %v677_v9, %v421_v3  ;;  %v338_v19 = vpop.f32.mrf.mxu0  ;;  %v424_v10 = vpop.f32.mrf.mxu1  ;;  %v713_v0 = vld [vmem:[%s7221_s17 + $0xa2] sm:$0xff] }
 0x139   :  { %7244 = vst [vmem:[#allocation34_spill] sm:$0xff] %v5184_v15 }
 0x13a   :  { %7245 = vst [vmem:[#allocation35_spill] sm:$0xff] %v5186_v16  ;;  %4110 = vmatmul.msk.f32.gmra.mxu0 %vm184_vm1, %v711_v22  ;;  %4132 = vmatmul.msk.f32.gmra.mxu1 %vm184_vm1, %v708_v39  ;;  %v1047_v39 = vld [vmem:[%s7221_s17 + $0x83] sm:$0xff] }
 0x13b   :  { %4158 = vmatmul.msk.f32.gmra.mxu2 %vm184_vm1, %v1046_v25  ;;  %4182 = vmatmul.msk.f32.gmra.mxu3 %vm184_vm1, %v1045_v11  ;;  %v719_v16 = vld [vmem:[%s7221_s17 + $0xe2] sm:$0xff] }
 0x13e   :  { %v594_v28 = vpop.f32.mrf.mxu2  ;;  %v680_v29 = vpop.f32.mrf.mxu3 }
 0x13f   :  { %v5198_v30 = vadd.f32 %v594_v28, %v338_v19  ;;  %v5200_v33 = vadd.f32 %v680_v29, %v424_v10  ;;  %v341_v36 = vpop.f32.mrf.mxu0  ;;  %v427_v40 = vpop.f32.mrf.mxu1 }
 0x141   :  { %7246 = vst [vmem:[#allocation36_spill] sm:$0xff] %v5198_v30  ;;  %v1374_v30 = vld [vmem:[%s7221_s17 + $0x14] sm:$0xff] }
 0x142   :  { %7247 = vst [vmem:[#allocation37_spill] sm:$0xff] %v5200_v33  ;;  %4111 = vmatmul.msk.f32.gmra.mxu0 %vm184_vm1, %v712_v41  ;;  %4133 = vmatmul.msk.f32.gmra.mxu1 %vm184_vm1, %v709_v52  ;;  %v1048_v52 = vld [vmem:[%s7221_s17 + $0x8b] sm:$0xff]  ;;  %v1055_v33 = vld [vmem:[%s7221_s17 + $0xd3] sm:$0xff] }
 0x143   :  { %4159 = vmatmul.msk.f32.gmra.mxu2 %vm184_vm1, %v1047_v39  ;;  %4183 = vmatmul.msk.f32.gmra.mxu3 %vm184_vm1, %v1046_v25  ;;  %v714_v25 = vld [vmem:[%s7221_s17 + $0xaa] sm:$0xff] }
 0x146   :  { %v597_v42 = vpop.f32.mrf.mxu2  ;;  %v683_v47 = vpop.f32.mrf.mxu3 }
 0x147   :  { %v5212_v48 = vadd.f32 %v597_v42, %v341_v36  ;;  %v5214_v53 = vadd.f32 %v683_v47, %v427_v40  ;;  %v344_v55 = vpop.f32.mrf.mxu0  ;;  %v430_v59 = vpop.f32.mrf.mxu1  ;;  %v1050_v42 = vld [vmem:[%s7221_s17 + $0xa3] sm:$0xff] }
 0x149   :  { %7248 = vst [vmem:[#allocation38_spill] sm:$0xff] %v5212_v48 }
 0x14a   :  { %7249 = vst [vmem:[#allocation39_spill] sm:$0xff] %v5214_v53  ;;  %4112 = vmatmul.msk.f32.gmra.mxu0 %vm184_vm1, %v713_v0  ;;  %4134 = vmatmul.msk.f32.gmra.mxu1 %vm184_vm1, %v710_v4  ;;  %v1049_v4 = vld [vmem:[%s7221_s17 + $0x93] sm:$0xff] }
 0x14b   :  { %4160 = vmatmul.msk.f32.gmra.mxu2 %vm184_vm1, %v1048_v52  ;;  %4184 = vmatmul.msk.f32.gmra.mxu3 %vm184_vm1, %v1047_v39  ;;  %v715_v39 = vld [vmem:[%s7221_s17 + $0xb2] sm:$0xff] }
 0x14e   :  { %v600_v3 = vpop.f32.mrf.mxu2  ;;  %v686_v11 = vpop.f32.mrf.mxu3 }
 0x14f   :  { %v5226_v12 = vadd.f32 %v600_v3, %v344_v55  ;;  %v5228_v9 = vadd.f32 %v686_v11, %v430_v59  ;;  %v433_v19 = vpop.f32.mrf.mxu1  ;;  %v5230_v10 = vpop.f32.mrf.mxu0  ;;  %v1051_v3 = vld [vmem:[%s7221_s17 + $0xab] sm:$0xff] }
 0x150   :  { %7252 = vst [vmem:[#allocation42_spill] sm:$0xff] %v5230_v10 }
 0x151   :  { %7250 = vst [vmem:[#allocation40_spill] sm:$0xff] %v5226_v12 }
 0x152   :  { %7251 = vst [vmem:[#allocation41_spill] sm:$0xff] %v5228_v9  ;;  %4113 = vmatmul.msk.f32.gmra.mxu0 %vm184_vm1, %v714_v25  ;;  %4135 = vmatmul.msk.f32.gmra.mxu1 %vm184_vm1, %v711_v22 }
 0x153   :  { %4161 = vmatmul.msk.f32.gmra.mxu2 %vm184_vm1, %v1049_v4  ;;  %4185 = vmatmul.msk.f32.gmra.mxu3 %vm184_vm1, %v1048_v52  ;;  %v716_v52 = vld [vmem:[%s7221_s17 + $0xc2] sm:$0xff] }
 0x156   :  { %v689_v28 = vpop.f32.mrf.mxu3  ;;  %v5354_v43 = vpop.f32.mrf.mxu2 }
 0x157   :  { %v5242_v29 = vadd.f32 %v689_v28, %v433_v19  ;;  %v436_v36 = vpop.f32.mrf.mxu1  ;;  %v5244_v40 = vpop.f32.mrf.mxu0  ;;  %7262 = vst [vmem:[#allocation52_spill] sm:$0xff] %v5354_v43 }
 0x159   :  { %7253 = vst [vmem:[#allocation43_spill] sm:$0xff] %v5242_v29  ;;  %v721_v29 = vld [vmem:[%s7221_s17 + $0xf2] sm:$0xff] }
 0x15a   :  { %4114 = vmatmul.msk.f32.gmra.mxu0 %vm184_vm1, %v715_v39  ;;  %4136 = vmatmul.msk.f32.gmra.mxu1 %vm184_vm1, %v712_v41  ;;  %v1403_v41 = vld [vmem:[#allocation2 + $0x130] sm:$0xf] }
 0x15b   :  { %4162 = vmatmul.msk.f32.gmra.mxu2 %vm184_vm1, %v1050_v42  ;;  %4186 = vmatmul.msk.f32.gmra.mxu3 %vm184_vm1, %v1049_v4 }
 0x15c   :  { %4196 = vmatpush.msk.msra.mxu0 %vm257_vm0, %v1403_v41  ;;  %v718_v41 = vld [vmem:[%s7221_s17 + $0xd2] sm:$0xff] }
 0x15e   :  { %v692_v22 = vpop.f32.mrf.mxu3 }
 0x15f   :  { %v5256_v47 = vadd.f32 %v692_v22, %v436_v36  ;;  %v439_v55 = vpop.f32.mrf.mxu1  ;;  %v5258_v59 = vpop.f32.mrf.mxu0  ;;  %v717_v36 = vld [vmem:[%s7221_s17 + $0xca] sm:$0xff] }
 0x161   :  { %7254 = vst [vmem:[#allocation44_spill] sm:$0xff] %v5256_v47  ;;  %v1372_v47 = vld [vmem:[%s7221_s17 + $0x4] sm:$0xff] }
 0x162   :  { %4115 = vmatmul.msk.f32.gmra.mxu0 %vm184_vm1, %v716_v52  ;;  %4137 = vmatmul.msk.f32.gmra.mxu1 %vm184_vm1, %v713_v0  ;;  %v1052_v0 = vld [vmem:[%s7221_s17 + $0xb3] sm:$0xff] }
 0x163   :  { %4163 = vmatmul.msk.f32.gmra.mxu2 %vm184_vm1, %v1051_v3  ;;  %4187 = vmatmul.msk.f32.gmra.mxu3 %vm184_vm1, %v1050_v42  ;;  %v1401_v42 = vld [vmem:[#allocation2 + $0x120] sm:$0xff] }
 0x164   :  { %1496 = vmatpush.msra.mxu0 %v1401_v42 }
 0x166   :  { %v695_v11 = vpop.f32.mrf.mxu3 }
 0x167   :  { %v5271_v19 = vadd.f32 %v695_v11, %v439_v55  ;;  %v5273_v4 = vpop.f32.mrf.mxu0  ;;  %v5275_v28 = vpop.f32.mrf.mxu1  ;;  %v1399_v11 = vld [vmem:[#allocation2 + $0x110] sm:$0xff] }
 0x168   :  { %7256 = vst [vmem:[#allocation46_spill] sm:$0xff] %v5275_v28  ;;  %1497 = vmatpush.msra.mxu0 %v1399_v11  ;;  %v1054_v11 = vld [vmem:[%s7221_s17 + $0xcb] sm:$0xff] }
 0x169   :  { %7255 = vst [vmem:[#allocation45_spill] sm:$0xff] %v5271_v19  ;;  %v1400_v19 = vld [vmem:[#allocation2 + $0x118] sm:$0xff] }
 0x16a   :  { %4116 = vmatmul.msk.f32.gmra.mxu0 %vm184_vm1, %v717_v36  ;;  %4138 = vmatmul.msk.f32.gmra.mxu1 %vm184_vm1, %v714_v25  ;;  %v1397_v25 = vld [vmem:[#allocation2 + $0x100] sm:$0xff] }
 0x16b   :  { %4164 = vmatmul.msk.f32.gmra.mxu2 %vm184_vm1, %v1052_v0  ;;  %4188 = vmatmul.msk.f32.gmra.mxu3 %vm184_vm1, %v1051_v3 }
 0x16c   :  { %1498 = vmatpush.msra.mxu0 %v1397_v25  ;;  %v720_v25 = vld [vmem:[%s7221_s17 + $0xea] sm:$0xff] }
 0x16f   :  { %v5287_v22 = vpop.f32.mrf.mxu0  ;;  %v5289_v55 = vpop.f32.mrf.mxu1 }
 0x170   :  { %7257 = vst [vmem:[#allocation47_spill] sm:$0xff] %v5289_v55 }
 0x172   :  { %4117 = vmatmul.msk.f32.gmra.mxu0 %vm184_vm1, %v718_v41  ;;  %4139 = vmatmul.msk.f32.gmra.mxu1 %vm184_vm1, %v715_v39 }
 0x173   :  { %4165 = vmatmul.msk.f32.gmra.mxu2 %vm184_vm1, %v1053_v63  ;;  %4189 = vmatmul.msk.f32.gmra.mxu3 %vm184_vm1, %v1052_v0 }
 0x177   :  { %v5301_v3 = vpop.f32.mrf.mxu0  ;;  %v5303_v42 = vpop.f32.mrf.mxu1 }
 0x178   :  { %7258 = vst [vmem:[#allocation48_spill] sm:$0xff] %v5303_v42 }
 0x17a   :  { %4118 = vmatmul.msk.f32.gmra.mxu0 %vm184_vm1, %v719_v16  ;;  %4140 = vmatmul.msk.f32.gmra.mxu1 %vm184_vm1, %v716_v52  ;;  %v1402_v52 = vld [vmem:[#allocation2 + $0x128] sm:$0xff] }
 0x17b   :  { %4166 = vmatmul.msk.f32.gmra.mxu2 %vm184_vm1, %v1054_v11  ;;  %4190 = vmatmul.msk.f32.gmra.mxu3 %vm184_vm1, %v1053_v63  ;;  %v1404_v63 = vld [vmem:[#allocation2 + $0x138] sm:$0xf] }
 0x17c   :  { %4221 = vmatpush.msk.msrb.mxu1 %vm257_vm0, %v1404_v63 }
 0x17e   :  { %1585 = vmatpush.msrb.mxu1 %v1402_v52 }
 0x17f   :  { %v5315_v39 = vpop.f32.mrf.mxu0  ;;  %v5317_v0 = vpop.f32.mrf.mxu1 }
 0x180   :  { %7259 = vst [vmem:[#allocation49_spill] sm:$0xff] %v5317_v0  ;;  %1586 = vmatpush.msrb.mxu1 %v1400_v19  ;;  %v1057_v19 = vld [vmem:[%s7221_s17 + $0xeb] sm:$0xff] }
 0x182   :  { %4119 = vmatmul.msk.f32.gmra.mxu0 %vm184_vm1, %v720_v25  ;;  %4141 = vmatmul.msk.f32.gmra.mxu1 %vm184_vm1, %v717_v36  ;;  %v1056_v36 = vld [vmem:[%s7221_s17 + $0xe3] sm:$0xff] }
 0x183   :  { %4167 = vmatmul.msk.f32.gmra.mxu2 %vm184_vm1, %v1055_v33  ;;  %4191 = vmatmul.msk.f32.gmra.mxu3 %vm184_vm1, %v1054_v11  ;;  %v1398_v11 = vld [vmem:[#allocation2 + $0x108] sm:$0xff] }
 0x184   :  { %1587 = vmatpush.msrb.mxu1 %v1398_v11  ;;  %v1373_v11 = vld [vmem:[%s7221_s17 + $0xc] sm:$0xff] }
 0x187   :  { %v5330_v53 = vpop.f32.mrf.mxu0  ;;  %v5332_v9 = vpop.f32.mrf.mxu1 }
 0x188   :  { %7260 = vst [vmem:[#allocation50_spill] sm:$0xff] %v5332_v9 }
 0x18a   :  { %4120 = vmatmul.msk.f32.gmra.mxu0 %vm184_vm1, %v721_v29  ;;  %4142 = vmatmul.msk.f32.gmra.mxu1 %vm184_vm1, %v718_v41 }
 0x18b   :  { %4168 = vmatmul.msk.f32.gmra.mxu2 %vm184_vm1, %v1056_v36  ;;  %4192 = vmatmul.msk.f32.gmra.mxu3 %vm184_vm1, %v1055_v33 }
 0x18f   :  { %v5344_v63 = vpop.f32.mrf.mxu0  ;;  %v5346_v52 = vpop.f32.mrf.mxu1 }
 0x190   :  { %7261 = vst [vmem:[#allocation51_spill] sm:$0xff] %v5346_v52 }
 0x192   :  { %4143 = vmatmul.msk.f32.gmra.mxu1 %vm184_vm1, %v719_v16  ;;  %4197 = vmatmul.msk.f32.vlgmr.msra.gmra.mxu0 %vm184_vm1, %v1372_v47  ;;  %v5372_v16 = vpop.f32.mrf.mxu2 }
 0x193   :  { %4169 = vmatmul.msk.f32.gmra.mxu2 %vm184_vm1, %v1057_v19  ;;  %4193 = vmatmul.msk.f32.gmra.mxu3 %vm184_vm1, %v1056_v36  ;;  %7264 = vst [vmem:[#allocation54_spill] sm:$0xff] %v5372_v16 }
 0x197   :  { %v5360_v33 = vpop.f32.mrf.mxu0  ;;  %v5362_v41 = vpop.f32.mrf.mxu1 }
 0x198   :  { %7263 = vst [vmem:[#allocation53_spill] sm:$0xff] %v5362_v41 }
 0x19a   :  { %4144 = vmatmul.msk.f32.gmra.mxu1 %vm184_vm1, %v720_v25  ;;  %4198 = vmatmul.msk.f32.gmra.mxu0 %vm184_vm1, %v1373_v11 }
 0x19b   :  { %4170 = vmatmul.msk.f32.gmra.mxu2 %vm184_vm1, %v1058_v62  ;;  %4194 = vmatmul.msk.f32.gmra.mxu3 %vm184_vm1, %v1057_v19  ;;  %v1375_v19 = vld [vmem:[%s7221_s17 + $0x24] sm:$0xff] }
 0x19f   :  { %v5376_v36 = vpop.f32.mrf.mxu0  ;;  %v5378_v15 = vpop.f32.mrf.mxu1 }
 0x1a0   :  { %7265 = vst [vmem:[#allocation55_spill] sm:$0xff] %v5378_v15 }
 0x1a2   :  { %4145 = vmatmul.msk.f32.gmra.mxu1 %vm184_vm1, %v721_v29  ;;  %4199 = vmatmul.msk.f32.gmra.mxu0 %vm184_vm1, %v1374_v30 }
 0x1a3   :  { %4195 = vmatmul.msk.f32.gmra.mxu3 %vm184_vm1, %v1058_v62  ;;  %v1376_v62 = vld [vmem:[%s7221_s17 + $0x2c] sm:$0xff] }
 0x1a7   :  { %v5386_v25 = vpop.f32.mrf.mxu0  ;;  %v5388_v48 = vpop.f32.mrf.mxu1 }
 0x1a8   :  { %7266 = vst [vmem:[#allocation56_spill] sm:$0xff] %v5388_v48 }
 0x1aa   :  { %4200 = vmatmul.msk.f32.gmra.mxu0 %vm184_vm1, %v1375_v19  ;;  %4222 = vmatmul.msk.f32.vlgmr.msrb.gmra.mxu1 %vm184_vm1, %v1372_v47  ;;  %v1377_v47 = vld [vmem:[%s7221_s17 + $0x34] sm:$0xff] }
 0x1af   :  { %v5395_v12 = vpop.f32.mrf.mxu0  ;;  %v5397_v16 = vpop.f32.mrf.mxu1 }
 0x1b0   :  { %7267 = vst [vmem:[#allocation57_spill] sm:$0xff] %v5397_v16 }
 0x1b2   :  { %4201 = vmatmul.msk.f32.gmra.mxu0 %vm184_vm1, %v1376_v62  ;;  %4223 = vmatmul.msk.f32.gmra.mxu1 %vm184_vm1, %v1373_v11  ;;  %v1378_v11 = vld [vmem:[%s7221_s17 + $0x44] sm:$0xff] }
 0x1b7   :  { %v5404_v29 = vpop.f32.mrf.mxu0  ;;  %v5406_v54 = vpop.f32.mrf.mxu1 }
 0x1b8   :  { %7268 = vst [vmem:[#allocation58_spill] sm:$0xff] %v5406_v54 }
 0x1ba   :  { %4202 = vmatmul.msk.f32.gmra.mxu0 %vm184_vm1, %v1377_v47  ;;  %4224 = vmatmul.msk.f32.gmra.mxu1 %vm184_vm1, %v1374_v30  ;;  %v1379_v30 = vld [vmem:[%s7221_s17 + $0x4c] sm:$0xff] }
 0x1bf   :  { %v5413_v43 = vpop.f32.mrf.mxu0  ;;  %v5415_v51 = vpop.f32.mrf.mxu1 }
 0x1c0   :  { %7269 = vst [vmem:[#allocation59_spill] sm:$0xff] %v5415_v51 }
 0x1c2   :  { %4203 = vmatmul.msk.f32.gmra.mxu0 %vm184_vm1, %v1378_v11  ;;  %4225 = vmatmul.msk.f32.gmra.mxu1 %vm184_vm1, %v1375_v19  ;;  %v1380_v19 = vld [vmem:[%s7221_s17 + $0x54] sm:$0xff] }
 0x1c7   :  { %v5422_v28 = vpop.f32.mrf.mxu0  ;;  %v5424_v2 = vpop.f32.mrf.mxu1 }
 0x1c8   :  { %7270 = vst [vmem:[#allocation60_spill] sm:$0xff] %v5424_v2 }
 0x1ca   :  { %4204 = vmatmul.msk.f32.gmra.mxu0 %vm184_vm1, %v1379_v30  ;;  %4226 = vmatmul.msk.f32.gmra.mxu1 %vm184_vm1, %v1376_v62  ;;  %v1381_v62 = vld [vmem:[%s7221_s17 + $0x64] sm:$0xff] }
 0x1cf   :  { %v5431_v55 = vpop.f32.mrf.mxu0  ;;  %v5433_v14 = vpop.f32.mrf.mxu1 }
 0x1d0   :  { %7271 = vst [vmem:[#allocation61_spill] sm:$0xff] %v5431_v55  ;;  %v5449_v55 = vpop.f32.mrf.mxu2 }
 0x1d1   :  { %7272 = vst [vmem:[#allocation62_spill] sm:$0xff] %v5433_v14 }
 0x1d2   :  { %4205 = vmatmul.msk.f32.gmra.mxu0 %vm184_vm1, %v1380_v19  ;;  %4227 = vmatmul.msk.f32.gmra.mxu1 %vm184_vm1, %v1377_v47  ;;  %7275 = vst [vmem:[#allocation65_spill] sm:$0xff] %v5449_v55  ;;  %v1382_v47 = vld [vmem:[%s7221_s17 + $0x6c] sm:$0xff] }
 0x1d7   :  { %v5440_v42 = vpop.f32.mrf.mxu0  ;;  %v5442_v24 = vpop.f32.mrf.mxu1 }
 0x1d8   :  { %7273 = vst [vmem:[#allocation63_spill] sm:$0xff] %v5440_v42  ;;  %v5460_v42 = vpop.f32.mrf.mxu2 }
 0x1d9   :  { %7274 = vst [vmem:[#allocation64_spill] sm:$0xff] %v5442_v24 }
 0x1da   :  { %4206 = vmatmul.msk.f32.gmra.mxu0 %vm184_vm1, %v1381_v62  ;;  %4228 = vmatmul.msk.f32.gmra.mxu1 %vm184_vm1, %v1378_v11  ;;  %7278 = vst [vmem:[#allocation68_spill] sm:$0xff] %v5460_v42  ;;  %v1383_v11 = vld [vmem:[%s7221_s17 + $0x74] sm:$0xff] }
 0x1df   :  { %v5451_v0 = vpop.f32.mrf.mxu0  ;;  %v5453_v38 = vpop.f32.mrf.mxu1 }
 0x1e0   :  { %7276 = vst [vmem:[#allocation66_spill] sm:$0xff] %v5451_v0  ;;  %v5478_v61 = vpop.f32.mrf.mxu2 }
 0x1e1   :  { %7277 = vst [vmem:[#allocation67_spill] sm:$0xff] %v5453_v38 }
 0x1e2   :  { %4207 = vmatmul.msk.f32.gmra.mxu0 %vm184_vm1, %v1382_v47  ;;  %4229 = vmatmul.msk.f32.gmra.mxu1 %vm184_vm1, %v1379_v30  ;;  %v1384_v30 = vld [vmem:[%s7221_s17 + $0x84] sm:$0xff] }
 0x1e7   :  { %v5462_v9 = vpop.f32.mrf.mxu0  ;;  %v5464_v50 = vpop.f32.mrf.mxu1 }
 0x1e8   :  { %7279 = vst [vmem:[#allocation69_spill] sm:$0xff] %v5462_v9 }
 0x1e9   :  { %7280 = vst [vmem:[#allocation70_spill] sm:$0xff] %v5464_v50  ;;  %v5482_v50 = vpop.f32.mrf.mxu3 }
 0x1ea   :  { %4208 = vmatmul.msk.f32.gmra.mxu0 %vm184_vm1, %v1383_v11  ;;  %4230 = vmatmul.msk.f32.gmra.mxu1 %vm184_vm1, %v1380_v19  ;;  %7283 = vst [vmem:[#allocation73_spill] sm:$0xff] %v5482_v50  ;;  %v1385_v19 = vld [vmem:[%s7221_s17 + $0x8c] sm:$0xff] }
 0x1ef   :  { %v5471_v0 = vpop.f32.mrf.mxu0  ;;  %v5473_v52 = vpop.f32.mrf.mxu1 }
 0x1f0   :  { %7281 = vst [vmem:[#allocation71_spill] sm:$0xff] %v5471_v0 }
 0x1f1   :  { %7282 = vst [vmem:[#allocation72_spill] sm:$0xff] %v5473_v52  ;;  %v5491_v52 = vpop.f32.mrf.mxu2  ;;  %v5495_v0 = vpop.f32.mrf.mxu3 }
 0x1f2   :  { %4209 = vmatmul.msk.f32.gmra.mxu0 %vm184_vm1, %v1384_v30  ;;  %4231 = vmatmul.msk.f32.gmra.mxu1 %vm184_vm1, %v1381_v62  ;;  %7286 = vst [vmem:[#allocation76_spill] sm:$0xff] %v5495_v0 }
 0x1f7   :  { %v5484_v9 = vpop.f32.mrf.mxu0  ;;  %v5486_v41 = vpop.f32.mrf.mxu1 }
 0x1f8   :  { %7284 = vst [vmem:[#allocation74_spill] sm:$0xff] %v5484_v9 }
 0x1f9   :  { %7285 = vst [vmem:[#allocation75_spill] sm:$0xff] %v5486_v41  ;;  %v1386_v41 = vld [vmem:[%s7221_s17 + $0x94] sm:$0xff]  ;;  %v5506_v9 = vpop.f32.mrf.mxu2 }
 0x1fa   :  { %4210 = vmatmul.msk.f32.gmra.mxu0 %vm184_vm1, %v1385_v19  ;;  %4232 = vmatmul.msk.f32.gmra.mxu1 %vm184_vm1, %v1382_v47  ;;  %v1387_v47 = vld [vmem:[%s7221_s17 + $0xa4] sm:$0xff] }
 0x1ff   :  { %v5497_v7 = vpop.f32.mrf.mxu0  ;;  %v5499_v62 = vpop.f32.mrf.mxu1 }
 0x200   :  { %7287 = vst [vmem:[#allocation77_spill] sm:$0xff] %v5497_v7  ;;  %v5515_v7 = vpop.f32.mrf.mxu3 }
 0x201   :  { %7288 = vst [vmem:[#allocation78_spill] sm:$0xff] %v5499_v62  ;;  %v5519_v62 = vpop.f32.mrf.mxu2 }
 0x202   :  { %4211 = vmatmul.msk.f32.gmra.mxu0 %vm184_vm1, %v1386_v41  ;;  %4233 = vmatmul.msk.f32.gmra.mxu1 %vm184_vm1, %v1383_v11  ;;  %7291 = vst [vmem:[#allocation81_spill] sm:$0xff] %v5515_v7 }
 0x207   :  { %v5508_v50 = vpop.f32.mrf.mxu0  ;;  %v5510_v15 = vpop.f32.mrf.mxu1 }
 0x208   :  { %7289 = vst [vmem:[#allocation79_spill] sm:$0xff] %v5508_v50  ;;  %v5528_v50 = vpop.f32.mrf.mxu3 }
 0x209   :  { %7290 = vst [vmem:[#allocation80_spill] sm:$0xff] %v5510_v15  ;;  %v1388_v15 = vld [vmem:[%s7221_s17 + $0xac] sm:$0xff] }
 0x20a   :  { %4212 = vmatmul.msk.f32.gmra.mxu0 %vm184_vm1, %v1387_v47  ;;  %4234 = vmatmul.msk.f32.gmra.mxu1 %vm184_vm1, %v1384_v30  ;;  %7294 = vst [vmem:[#allocation84_spill] sm:$0xff] %v5528_v50  ;;  %v1389_v30 = vld [vmem:[%s7221_s17 + $0xb4] sm:$0xff] }
 0x20f   :  { %v5521_v0 = vpop.f32.mrf.mxu1  ;;  %v5523_v11 = vpop.f32.mrf.mxu0 }
 0x210   :  { %7292 = vst [vmem:[#allocation82_spill] sm:$0xff] %v5521_v0  ;;  %v5539_v0 = vpop.f32.mrf.mxu2  ;;  %v5543_v48 = vpop.f32.mrf.mxu3 }
 0x211   :  { %7293 = vst [vmem:[#allocation83_spill] sm:$0xff] %v5523_v11 }
 0x212   :  { %4213 = vmatmul.msk.f32.gmra.mxu0 %vm184_vm1, %v1388_v15  ;;  %4235 = vmatmul.msk.f32.gmra.mxu1 %vm184_vm1, %v1385_v19  ;;  %7297 = vst [vmem:[#allocation87_spill] sm:$0xff] %v5543_v48  ;;  %v1390_v19 = vld [vmem:[%s7221_s17 + $0xc4] sm:$0xff] }
 0x217   :  { %v5532_v7 = vpop.f32.mrf.mxu1  ;;  %v5534_v18 = vpop.f32.mrf.mxu0 }
 0x218   :  { %7295 = vst [vmem:[#allocation85_spill] sm:$0xff] %v5532_v7  ;;  %v5552_v7 = vpop.f32.mrf.mxu2  ;;  %v5556_v16 = vpop.f32.mrf.mxu3 }
 0x219   :  { %7296 = vst [vmem:[#allocation86_spill] sm:$0xff] %v5534_v18 }
 0x21a   :  { %4214 = vmatmul.msk.f32.gmra.mxu0 %vm184_vm1, %v1389_v30  ;;  %4236 = vmatmul.msk.f32.gmra.mxu1 %vm184_vm1, %v1386_v41  ;;  %7300 = vst [vmem:[#allocation90_spill] sm:$0xff] %v5556_v16 }
 0x21f   :  { %v5545_v50 = vpop.f32.mrf.mxu1  ;;  %v5547_v27 = vpop.f32.mrf.mxu0 }
 0x220   :  { %7298 = vst [vmem:[#allocation88_spill] sm:$0xff] %v5545_v50  ;;  %v1391_v50 = vld [vmem:[%s7221_s17 + $0xcc] sm:$0xff]  ;;  %v5567_v48 = vpop.f32.mrf.mxu2  ;;  %v5576_v16 = vpop.f32.mrf.mxu3 }
 0x221   :  { %7299 = vst [vmem:[#allocation89_spill] sm:$0xff] %v5547_v27 }
 0x222   :  { %4215 = vmatmul.msk.f32.gmra.mxu0 %vm184_vm1, %v1390_v19  ;;  %4237 = vmatmul.msk.f32.gmra.mxu1 %vm184_vm1, %v1387_v47  ;;  %v1392_v47 = vld [vmem:[%s7221_s17 + $0xd4] sm:$0xff]  ;;  %7304 = vst [vmem:[#allocation94_spill] sm:$0xff] %v5576_v16 }
 0x227   :  { %v5558_v35 = vpop.f32.mrf.mxu0  ;;  %v5560_v41 = vpop.f32.mrf.mxu1 }
 0x228   :  { %7301 = vst [vmem:[#allocation91_spill] sm:$0xff] %v5558_v35  ;;  %v5589_v58 = vpop.f32.mrf.mxu3 }
 0x229   :  { %7302 = vst [vmem:[#allocation92_spill] sm:$0xff] %v5560_v41  ;;  %v5580_v41 = vpop.f32.mrf.mxu2 }
 0x22a   :  { %4216 = vmatmul.msk.f32.gmra.mxu0 %vm184_vm1, %v1391_v50  ;;  %4238 = vmatmul.msk.f32.gmra.mxu1 %vm184_vm1, %v1388_v15  ;;  %7306 = vst [vmem:[#allocation96_spill] sm:$0xff] %v5589_v58 }
 0x22f   :  { %v5569_v54 = vpop.f32.mrf.mxu0  ;;  %v5571_v45 = vpop.f32.mrf.mxu1 }
 0x230   :  { %7303 = vst [vmem:[#allocation93_spill] sm:$0xff] %v5571_v45  ;;  %v1393_v45 = vld [vmem:[%s7221_s17 + $0xe4] sm:$0xff] }
 0x231   :  { %v1193_v8 = vpop.f32.mrf.mxu2 }
 0x232   :  { %4217 = vmatmul.msk.f32.gmra.mxu0 %vm184_vm1, %v1392_v47  ;;  %4239 = vmatmul.msk.f32.gmra.mxu1 %vm184_vm1, %v1389_v30  ;;  %v1394_v30 = vld [vmem:[%s7221_s17 + $0xec] sm:$0xff] }
 0x237   :  { %v5582_v51 = vpop.f32.mrf.mxu0  ;;  %v5584_v15 = vpop.f32.mrf.mxu1 }
 0x238   :  { %7305 = vst [vmem:[#allocation95_spill] sm:$0xff] %v5584_v15  ;;  %v5602_v15 = vpop.f32.mrf.mxu3 }
 0x239   :  { %7308 = vst [vmem:[#allocation98_spill] sm:$0xff] %v5602_v15 }
 0x23a   :  { %4218 = vmatmul.msk.f32.gmra.mxu0 %vm184_vm1, %v1393_v45  ;;  %4240 = vmatmul.msk.f32.gmra.mxu1 %vm184_vm1, %v1390_v19  ;;  %v1395_v19 = vld [vmem:[%s7221_s17 + $0xf4] sm:$0xff] }
 0x23f   :  { %v5593_v16 = vpop.f32.mrf.mxu0  ;;  %v5595_v2 = vpop.f32.mrf.mxu1 }
 0x240   :  { %7307 = vst [vmem:[#allocation97_spill] sm:$0xff] %v5595_v2  ;;  %v1196_v2 = vpop.f32.mrf.mxu2  ;;  %v5613_v21 = vpop.f32.mrf.mxu3 }
 0x241   :  { %7310 = vst [vmem:[#allocation100_spill] sm:$0xff] %v5613_v21 }
 0x242   :  { %4219 = vmatmul.msk.f32.gmra.mxu0 %vm184_vm1, %v1394_v30  ;;  %4241 = vmatmul.msk.f32.gmra.mxu1 %vm184_vm1, %v1391_v50 }
 0x247   :  { %v5604_v58 = vpop.f32.mrf.mxu0  ;;  %v5606_v14 = vpop.f32.mrf.mxu1 }
 0x248   :  { %7309 = vst [vmem:[#allocation99_spill] sm:$0xff] %v5606_v14  ;;  %v1199_v15 = vpop.f32.mrf.mxu2  ;;  %v5624_v32 = vpop.f32.mrf.mxu3 }
 0x249   :  { %7313 = vst [vmem:[#allocation103_spill] sm:$0xff] %v5624_v32 }
 0x24a   :  { %4220 = vmatmul.msk.f32.gmra.mxu0 %vm184_vm1, %v1395_v19  ;;  %4242 = vmatmul.msk.f32.gmra.mxu1 %vm184_vm1, %v1392_v47 }
 0x24f   :  { %v5615_v11 = vpop.f32.mrf.mxu0  ;;  %v5617_v50 = vpop.f32.mrf.mxu1 }
 0x250   :  { %7311 = vst [vmem:[#allocation101_spill] sm:$0xff] %v5617_v50  ;;  %v1202_v18 = vpop.f32.mrf.mxu2  ;;  %v5629_v21 = vpop.f32.mrf.mxu3 }
 0x251   :  { %7315 = vst [vmem:[#allocation105_spill] sm:$0xff] %v5629_v21 }
 0x252   :  { %4243 = vmatmul.msk.f32.gmra.mxu1 %vm184_vm1, %v1393_v45 }
 0x257   :  { %v5620_v24 = vpop.f32.mrf.mxu0  ;;  %v5622_v14 = vpop.f32.mrf.mxu1 }
 0x258   :  { %7312 = vst [vmem:[#allocation102_spill] sm:$0xff] %v5622_v14  ;;  %v1205_v45 = vpop.f32.mrf.mxu2  ;;  %v5634_v55 = vpop.f32.mrf.mxu3 }
 0x259   :  { %7317 = vst [vmem:[#allocation107_spill] sm:$0xff] %v5634_v55  ;;  %v1013_v55 = vadd.f32 %v5404_v29, %v5114_v5  ;;  %v1009_v5 = vadd.f32 %v5386_v25, %v5086_v44 }
 0x25a   :  { %4244 = vmatmul.msk.f32.gmra.mxu1 %vm184_vm1, %v1394_v30 }
 0x25f   :  { %v1530_v38 = vpop.f32.mrf.mxu0  ;;  %v5627_v47 = vpop.f32.mrf.mxu1 }
 0x260   :  { %7314 = vst [vmem:[#allocation104_spill] sm:$0xff] %v5627_v47  ;;  %v1208_v32 = vpop.f32.mrf.mxu2  ;;  %v5638_v42 = vpop.f32.mrf.mxu3 }
 0x261   :  { %7319 = vst [vmem:[#allocation109_spill] sm:$0xff] %v5638_v42 }
 0x262   :  { %4245 = vmatmul.msk.f32.gmra.mxu1 %vm184_vm1, %v1395_v19 }
 0x267   :  { %v1533_v50 = vpop.f32.mrf.mxu0  ;;  %v5632_v46 = vpop.f32.mrf.mxu1 }
 0x268   :  { %7316 = vst [vmem:[#allocation106_spill] sm:$0xff] %v5632_v46  ;;  %v5642_v47 = vpop.f32.mrf.mxu2  ;;  %v5646_v19 = vpop.f32.mrf.mxu3  ;;  %v1015_v46 = vadd.f32 %v5413_v43, %v5128_v20 }
 0x269   :  { %7321 = vst [vmem:[#allocation111_spill] sm:$0xff] %v5642_v47  ;;  %v1011_v47 = vadd.f32 %v5395_v12, %v5100_v57  ;;  %v1007_v57 = vadd.f32 %v5376_v36, %v5072_v34  ;;  %v1005_v12 = vadd.f32 %v5360_v33, %v5058_v26 }
 0x26a   :  { %7323 = vst [vmem:[#allocation113_spill] sm:$0xff] %v5646_v19  ;;  %v1352_v42 = vadd.f32 %v1205_v45, %v1015_v46 }
 0x26f   :  { %v1536_v27 = vpop.f32.mrf.mxu0  ;;  %v5636_v14 = vpop.f32.mrf.mxu1 }
 0x270   :  { %7318 = vst [vmem:[#allocation108_spill] sm:$0xff] %v5636_v14  ;;  %v1017_v14 = vadd.f32 %v5422_v28, %v5142_v31  ;;  %v5661_v35 = vpop.f32.mrf.mxu2  ;;  %v1348_v31 = vadd.f32 %v1199_v15, %v1011_v47  ;;  %v1003_v15 = vadd.f32 %v5344_v63, %v5044_v17  ;;  %v1001_v47 = vadd.f32 %v5330_v53, %v5029_v6 }
 0x272   :  { %v1354_v19 = vadd.f32 %v1208_v32, %v1017_v14  ;;  %v5672_v14 = vpop.f32.mrf.mxu3  ;;  %v1685_v32 = vadd.f32 %v1536_v27, %v1348_v31  ;;  %v1340_v33 = vadd.f32 %v5567_v48, %v1003_v15  ;;  %v1338_v6 = vadd.f32 %v5552_v7, %v1001_v47 }
 0x274   :  { %v1677_v53 = vadd.f32 %v5615_v11, %v1340_v33  ;;  %v7332_v33 = vld [vmem:[#allocation86_spill] sm:$0xff] }
 0x277   :  { %v1539_v30 = vpop.f32.mrf.mxu0  ;;  %v5640_v10 = vpop.f32.mrf.mxu1 }
 0x278   :  { %7320 = vst [vmem:[#allocation110_spill] sm:$0xff] %v5640_v10  ;;  %v5657_v10 = vld [vmem:[%s7189_s2] sm:$0x3] }
 0x279   :  { %v5668_v46 = vperm.slane %v5657_v10, 0 }
 0x27b   :  { %v1739_v27 = vadd.f32 %v5668_v46, %v1685_v32  ;;  %v7324_v32 = vld [vmem:[#allocation91_spill] sm:$0xff] }
 0x27d   :  { %v1787_v48 = vmax.f32 %v1739_v27, 0.0  ;;  %v7330_v27 = vld [vmem:[#allocation31_spill] sm:$0xff] }
 0x27f   :  { %v1542_v21 = vpop.f32.mrf.mxu0  ;;  %v5644_v56 = vpop.f32.mrf.mxu1 }
 0x280   :  { %7322 = vst [vmem:[#allocation112_spill] sm:$0xff] %v5644_v56  ;;  %v1350_v56 = vadd.f32 %v1202_v18, %v1013_v55  ;;  %v1689_v20 = vadd.f32 %v1542_v21, %v1352_v42  ;;  %v1346_v18 = vadd.f32 %v1196_v2, %v1009_v5  ;;  %v1344_v55 = vadd.f32 %v1193_v8, %v1007_v57 }
 0x281   :  { %v1342_v2 = vadd.f32 %v5580_v41, %v1005_v12  ;;  %v999_v41 = vadd.f32 %v5315_v39, %v5014_v60  ;;  %v1675_v5 = vadd.f32 %v5604_v58, %v1338_v6  ;;  %v995_v39 = vadd.f32 %v5287_v22, %v4986_v37  ;;  %v7327_v12 = vld [vmem:[#allocation68_spill] sm:$0xff] }
 0x282   :  { %v1687_v28 = vadd.f32 %v1539_v30, %v1350_v56  ;;  %v1743_v21 = vadd.f32 %v5668_v46, %v1689_v20  ;;  %v1683_v42 = vadd.f32 %v1533_v50, %v1346_v18  ;;  %v1681_v34 = vadd.f32 %v1530_v38, %v1344_v55  ;;  %v5690_v50 = vpop.f32.mrf.mxu2  ;;  %v5702_v20 = vpop.f32.mrf.mxu3  ;;  %v7334_v6 = vld [vmem:[#allocation64_spill] sm:$0xff] }
 0x283   :  { %v1679_v17 = vadd.f32 %v5620_v24, %v1342_v2  ;;  %v997_v24 = vadd.f32 %v5301_v3, %v5000_v49  ;;  %v1731_v49 = vadd.f32 %v5668_v46, %v1677_v53  ;;  %v993_v58 = vadd.f32 %v5273_v4, %v4970_v23 }
 0x284   :  { %v1741_v25 = vadd.f32 %v5668_v46, %v1687_v28  ;;  %v1791_v36 = vmax.f32 %v1743_v21, 0.0  ;;  %v1737_v38 = vadd.f32 %v5668_v46, %v1683_v42  ;;  %v1735_v30 = vadd.f32 %v5668_v46, %v1681_v34 }
 0x285   :  { %v1733_v60 = vadd.f32 %v5668_v46, %v1679_v17  ;;  %v1334_v11 = vadd.f32 %v5519_v62, %v997_v24  ;;  %v1332_v28 = vadd.f32 %v5506_v9, %v995_v39  ;;  %v1729_v37 = vadd.f32 %v5668_v46, %v1675_v5 }
 0x286   :  { %v1789_v63 = vmax.f32 %v1741_v25, 0.0  ;;  %v1785_v7 = vmax.f32 %v1737_v38, 0.0  ;;  %v1783_v3 = vmax.f32 %v1735_v30, 0.0  ;;  %v1330_v62 = vadd.f32 %v5491_v52, %v993_v58  ;;  %v7325_v52 = vld [vmem:[#allocation14_spill] sm:$0xff]  ;;  %v7328_v25 = vld [vmem:[#allocation89_spill] sm:$0xff] }
 0x287   :  { %v1545_v43 = vpop.f32.mrf.mxu0  ;;  %v5665_v29 = vpop.f32.mrf.mxu1  ;;  %v1781_v22 = vmax.f32 %v1733_v60, 0.0  ;;  %v1669_v23 = vadd.f32 %v5569_v54, %v1332_v28  ;;  %v1779_v9 = vmax.f32 %v1731_v49, 0.0  ;;  %v7336_v60 = vld [vmem:[#allocation28_spill] sm:$0xff]  ;;  %v7339_v28 = vld [vmem:[#allocation27_spill] sm:$0xff] }
 0x288   :  { %v1691_v45 = vadd.f32 %v1545_v43, %v1354_v19  ;;  %v1336_v19 = vadd.f32 %v5539_v0, %v999_v41  ;;  %v1667_v21 = vadd.f32 %v7324_v32, %v1330_v62  ;;  %v7333_v41 = vld [vmem:[#allocation29_spill] sm:$0xff] }
 0x289   :  { %v1016_v53 = vadd.f32 %v7334_v6, %v7333_v41  ;;  %v7352_v41 = vld [vmem:[#allocation23_spill] sm:$0xff]  ;;  %v7353_v6 = vld [vmem:[#allocation56_spill] sm:$0xff] }
 0x28a   :  { %v1745_v44 = vadd.f32 %v5668_v46, %v1691_v45  ;;  %v1673_v43 = vadd.f32 %v5593_v16, %v1336_v19  ;;  %v1671_v45 = vadd.f32 %v5582_v51, %v1334_v11  ;;  %v991_v16 = vadd.f32 %v5258_v59, %v4955_v13  ;;  %v5721_v57 = vpop.f32.mrf.mxu2  ;;  %v5733_v42 = vpop.f32.mrf.mxu3  ;;  %v7338_v11 = vld [vmem:[#allocation113_spill] sm:$0xff] }
 0x28b   :  { %v989_v51 = vadd.f32 %v5244_v40, %v4941_v1  ;;  %v1777_v59 = vmax.f32 %v1729_v37, 0.0  ;;  %v1723_v1 = vadd.f32 %v5668_v46, %v1669_v23  ;;  %v7329_v40 = vld [vmem:[#allocation65_spill] sm:$0xff]  ;;  %v1721_v38 = vadd.f32 %v5668_v46, %v1667_v21 }
 0x28c   :  { %v1793_v56 = vmax.f32 %v1745_v44, 0.0  ;;  %v1727_v4 = vadd.f32 %v5668_v46, %v1673_v43  ;;  %v1328_v18 = vadd.f32 %v5478_v61, %v991_v16  ;;  %v1725_v13 = vadd.f32 %v5668_v46, %v1671_v45  ;;  %v7326_v44 = vld [vmem:[#allocation42_spill] sm:$0xff]  ;;  %v7340_v45 = vld [vmem:[#allocation60_spill] sm:$0xff] }
 0x28d   :  { %v987_v54 = vadd.f32 %v7326_v44, %v7325_v52  ;;  %v1326_v55 = vadd.f32 %v7327_v12, %v989_v51  ;;  %v1771_v5 = vmax.f32 %v1723_v1, 0.0  ;;  %v1353_v43 = vadd.f32 %v7338_v11, %v1016_v53  ;;  %v7342_v51 = vld [vmem:[#allocation26_spill] sm:$0xff]  ;;  %v7345_v12 = vld [vmem:[#allocation25_spill] sm:$0xff]  ;;  %v7357_v11 = vld [vmem:[#allocation55_spill] sm:$0xff] }
 0x28e   :  { %1872 = vmatpush.msra.mxu2 %v1793_v56  ;;  %2145 = vmatpush.msrb.mxu0 %v1793_v56  ;;  %v1665_v56 = vadd.f32 %v7328_v25, %v1328_v18  ;;  %v1775_v61 = vmax.f32 %v1727_v4, 0.0  ;;  %v1012_v37 = vadd.f32 %v7340_v45, %v7339_v28  ;;  %v5760_v23 = vperm.slane %v5657_v10, 1  ;;  %v7343_v18 = vld [vmem:[#allocation59_spill] sm:$0xff]  ;;  %v7359_v45 = vld [vmem:[#allocation108_spill] sm:$0xff] }
 0x28f   :  { %v5685_v26 = vpop.f32.mrf.mxu0  ;;  %v5687_v8 = vpop.f32.mrf.mxu1  ;;  %v1324_v15 = vadd.f32 %v7329_v40, %v987_v54  ;;  %v1663_v17 = vadd.f32 %v7332_v33, %v1326_v55  ;;  %v1010_v32 = vadd.f32 %v7343_v18, %v7342_v51  ;;  %v7346_v55 = vld [vmem:[#allocation58_spill] sm:$0xff]  ;;  %v1004_v53 = vadd.f32 %v7353_v6, %v7352_v41  ;;  %v7362_v51 = vld [vmem:[#allocation96_spill] sm:$0xff] }
 0x290   :  { %1873 = vmatpush.msra.mxu2 %v1791_v36  ;;  %2146 = vmatpush.msrb.mxu0 %v1791_v36  ;;  %v7331_v36 = vld [vmem:[#allocation67_spill] sm:$0xff]  ;;  %v1719_v19 = vadd.f32 %v5668_v46, %v1665_v56  ;;  %v1008_v25 = vadd.f32 %v7346_v55, %v7345_v12  ;;  %v7347_v56 = vld [vmem:[#allocation105_spill] sm:$0xff]  ;;  %v7364_v55 = vld [vmem:[#allocation20_spill] sm:$0xff] }
 0x291   :  { %v1018_v47 = vadd.f32 %v7331_v36, %v7330_v27  ;;  %v1347_v1 = vadd.f32 %v7347_v56, %v1010_v32  ;;  %v7349_v27 = vld [vmem:[#allocation57_spill] sm:$0xff]  ;;  %v7371_v6 = vld [vmem:[#allocation102_spill] sm:$0xff] }
 0x292   :  { %1874 = vmatpush.msra.mxu2 %v1789_v63  ;;  %2147 = vmatpush.msrb.mxu0 %v1789_v63  ;;  %v1773_v63 = vmax.f32 %v1725_v13, 0.0  ;;  %v5752_v49 = vpop.f32.mrf.mxu2  ;;  %v5769_v44 = vpop.f32.mrf.mxu3  ;;  %v5837_v12 = vld [vmem:[%s7190_s3 + $0x10] sm:$0xff] }
 0x293   :  { %v1355_v30 = vadd.f32 %v5672_v14, %v1018_v47  ;;  %v1769_v14 = vmax.f32 %v1721_v38, 0.0  ;;  %v7350_v47 = vld [vmem:[#allocation103_spill] sm:$0xff] }
 0x294   :  { %1875 = vmatpush.msra.mxu2 %v1787_v48  ;;  %2148 = vmatpush.msrb.mxu0 %v1787_v48  ;;  %v7335_v48 = vld [vmem:[#allocation83_spill] sm:$0xff]  ;;  %v1345_v33 = vadd.f32 %v7350_v47, %v1008_v25 }
 0x295   :  { %v1661_v24 = vadd.f32 %v7335_v48, %v1324_v15  ;;  %v7365_v25 = vld [vmem:[#allocation51_spill] sm:$0xff] }
 0x296   :  { %1876 = vmatpush.msra.mxu2 %v1785_v7  ;;  %2149 = vmatpush.msrb.mxu0 %v1785_v7  ;;  %v7337_v7 = vld [vmem:[#allocation62_spill] sm:$0xff]  ;;  %v998_v56 = vadd.f32 %v7365_v25, %v7364_v55  ;;  %v7368_v47 = vld [vmem:[#allocation19_spill] sm:$0xff] }
 0x297   :  { %v5713_v0 = vpop.f32.mrf.mxu0  ;;  %v1631_v31 = vpop.f32.mrf.mxu1  ;;  %v1014_v39 = vadd.f32 %v7337_v7, %v7336_v60  ;;  %v1715_v62 = vadd.f32 %v5668_v46, %v1661_v24  ;;  %v7379_v25 = vld [vmem:[#allocation99_spill] sm:$0xff] }
 0x298   :  { %1877 = vmatpush.msra.mxu2 %v1783_v3  ;;  %2150 = vmatpush.msrb.mxu0 %v1783_v3  ;;  %v1717_v3 = vadd.f32 %v5668_v46, %v1663_v17  ;;  %v1690_v4 = vadd.f32 %v1631_v31, %v1353_v43  ;;  %v7351_v17 = vld [vmem:[#allocation112_spill] sm:$0xff] }
 0x299   :  { %v1763_v15 = vmax.f32 %v1715_v62, 0.0  ;;  %v1684_v38 = vadd.f32 %v7351_v17, %v1347_v1  ;;  %v7360_v62 = vld [vmem:[#allocation21_spill] sm:$0xff]  ;;  %v7366_v1 = vld [vmem:[#allocation94_spill] sm:$0xff] }
 0x29a   :  { %1878 = vmatpush.msra.mxu2 %v1781_v22  ;;  %2151 = vmatpush.msrb.mxu0 %v1781_v22  ;;  %v7341_v22 = vld [vmem:[#allocation109_spill] sm:$0xff]  ;;  %v1765_v31 = vmax.f32 %v1717_v3, 0.0  ;;  %v5780_v40 = vadd.f32 %v5760_v23, %v1690_v4  ;;  %v5799_v24 = vpop.f32.mrf.mxu2  ;;  %v5825_v32 = vpop.f32.mrf.mxu3 }
 0x29b   :  { %v1351_v16 = vadd.f32 %v7341_v22, %v1014_v39  ;;  %v7356_v39 = vld [vmem:[#allocation22_spill] sm:$0xff]  ;;  %v5817_v22 = vadd.f32 %v5760_v23, %v1684_v38  ;;  %v7361_v4 = vld [vmem:[#allocation53_spill] sm:$0xff] }
 0x29c   :  { %1879 = vmatpush.msra.mxu2 %v1779_v9  ;;  %2152 = vmatpush.msrb.mxu0 %v1779_v9  ;;  %v1767_v9 = vmax.f32 %v1719_v19, 0.0  ;;  %v7355_v19 = vld [vmem:[#allocation110_spill] sm:$0xff]  ;;  %v1792_v7 = vmax.f32 %v5780_v40, 0.0  ;;  %v1002_v43 = vadd.f32 %v7357_v11, %v7356_v39 }
 0x29d   :  { %v1688_v54 = vadd.f32 %v5687_v8, %v1351_v16  ;;  %v5785_v8 = vld [vmem:[%s7190_s3] sm:$0xff]  ;;  %v7370_v38 = vld [vmem:[#allocation90_spill] sm:$0xff] }
 0x29e   :  { %1880 = vmatpush.msra.mxu2 %v1777_v59  ;;  %2153 = vmatpush.msrb.mxu0 %v1777_v59  ;;  %v7344_v59 = vld [vmem:[#allocation107_spill] sm:$0xff]  ;;  %v1339_v18 = vadd.f32 %v7362_v51, %v1002_v43  ;;  %v1335_v41 = vadd.f32 %v7370_v38, %v998_v56  ;;  %v7377_v51 = vld [vmem:[#allocation48_spill] sm:$0xff] }
 0x29f   :  { %v5738_v2 = vpop.f32.mrf.mxu0  ;;  %v1634_v34 = vpop.f32.mrf.mxu1  ;;  %v1349_v52 = vadd.f32 %v7344_v59, %v1012_v37  ;;  %v7363_v59 = vld [vmem:[#allocation106_spill] sm:$0xff] }
 0x2a0   :  { %1881 = vmatpush.msra.mxu2 %v1775_v61  ;;  %2154 = vmatpush.msrb.mxu0 %v1775_v61  ;;  %v1692_v58 = vadd.f32 %v1634_v34, %v1355_v30  ;;  %v7348_v34 = vld [vmem:[#allocation24_spill] sm:$0xff] }
 0x2a1   :  { %v1686_v61 = vadd.f32 %v5665_v29, %v1349_v52  ;;  %v1006_v36 = vadd.f32 %v7349_v27, %v7348_v34  ;;  %v5792_v29 = vadd.f32 %v5760_v23, %v1688_v54  ;;  %v7354_v30 = vld [vmem:[#allocation100_spill] sm:$0xff] }
 0x2a2   :  { %1882 = vmatpush.msra.mxu2 %v1773_v63  ;;  %2155 = vmatpush.msrb.mxu0 %v1773_v63  ;;  %v5773_v10 = vadd.f32 %v5760_v23, %v1692_v58 }
 0x2a3   :  { %v1343_v48 = vadd.f32 %v7354_v30, %v1006_v36  ;;  %v5803_v60 = vadd.f32 %v5760_v23, %v1686_v61  ;;  %v7216_v16 = vmax.f32 %v5792_v29, 0.0  ;;  %v7213_v36 = vmax.f32 %v5817_v22, 0.0 }
 0x2a4   :  { %1883 = vmatpush.msra.mxu2 %v1771_v5  ;;  %2156 = vmatpush.msrb.mxu0 %v1771_v5  ;;  %v1794_v63 = vmax.f32 %v5773_v10, 0.0  ;;  %v1682_v5 = vadd.f32 %v7355_v19, %v1345_v33  ;;  %v7369_v33 = vld [vmem:[#allocation50_spill] sm:$0xff]  ;;  %v7409_v10 = vld [vmem:[#allocation111_spill] sm:$0xff] }
 0x2a5   :  { %v1680_v37 = vadd.f32 %v7359_v45, %v1343_v48  ;;  %v996_v17 = vadd.f32 %v7369_v33, %v7368_v47  ;;  %v7372_v19 = vld [vmem:[#allocation18_spill] sm:$0xff]  ;;  %v7375_v45 = vld [vmem:[#allocation101_spill] sm:$0xff]  ;;  %v7381_v47 = vld [vmem:[#allocation47_spill] sm:$0xff] }
 0x2a6   :  { %1884 = vmatpush.msra.mxu2 %v1769_v14  ;;  %2157 = vmatpush.msrb.mxu0 %v1769_v14  ;;  %v7358_v14 = vld [vmem:[#allocation98_spill] sm:$0xff]  ;;  %v5829_v54 = vadd.f32 %v5760_v23, %v1682_v5  ;;  %v7373_v5 = vld [vmem:[#allocation49_spill] sm:$0xff] }
 0x2a7   :  { %v5764_v21 = vpop.f32.mrf.mxu0  ;;  %v5766_v13 = vpop.f32.mrf.mxu1  ;;  %v1341_v28 = vadd.f32 %v7358_v14, %v1004_v53  ;;  %v5844_v27 = vadd.f32 %v5760_v23, %v1680_v37  ;;  %v994_v39 = vadd.f32 %v7373_v5, %v7372_v19  ;;  %v7374_v14 = vld [vmem:[#allocation87_spill] sm:$0xff]  ;;  %v1672_v37 = vadd.f32 %v7375_v45, %v1335_v41  ;;  %v7386_v45 = vld [vmem:[#allocation76_spill] sm:$0xff] }
 0x2a8   :  { %1885 = vmatpush.msra.mxu2 %v1767_v9  ;;  %2158 = vmatpush.msrb.mxu0 %v1767_v9  ;;  %v1000_v9 = vadd.f32 %v7361_v4, %v7360_v62  ;;  %v7209_v48 = vmax.f32 %v5829_v54, 0.0  ;;  %v5892_v41 = vpop.f32.mrf.mxu3 }
 0x2a9   :  { %v1678_v52 = vadd.f32 %v7363_v59, %v1341_v28  ;;  %v1333_v28 = vadd.f32 %v7374_v14, %v996_v17  ;;  %v7208_v4 = vmax.f32 %v5844_v27, 0.0  ;;  %v1229_v59 = vpop.f32.mrf.mxu2  ;;  %v7382_v17 = vld [vmem:[#allocation81_spill] sm:$0xff]  ;;  %v5896_v19 = vadd.f32 %v5760_v23, %v1672_v37  ;;  %v7385_v14 = vld [vmem:[#allocation46_spill] sm:$0xff] }
 0x2aa   :  { %1886 = vmatpush.msra.mxu2 %v1765_v31  ;;  %2159 = vmatpush.msrb.mxu0 %v1765_v31  ;;  %v7214_v31 = vmax.f32 %v5803_v60, 0.0  ;;  %v1337_v61 = vadd.f32 %v7366_v1, %v1000_v9  ;;  %v7376_v9 = vld [vmem:[#allocation17_spill] sm:$0xff] }
 0x2ab   :  { %v5855_v30 = vadd.f32 %v5760_v23, %v1678_v52  ;;  %v7378_v52 = vld [vmem:[#allocation84_spill] sm:$0xff]  ;;  %v1670_v56 = vadd.f32 %v7379_v25, %v1333_v28 }
 0x2ac   :  { %1887 = vmatpush.msra.mxu2 %v1763_v15  ;;  %2160 = vmatpush.msrb.mxu0 %v1763_v15  ;;  %v7367_v15 = vld [vmem:[#allocation104_spill] sm:$0xff]  ;;  %v1674_v53 = vadd.f32 %v7371_v6, %v1337_v61  ;;  %v1331_v55 = vadd.f32 %v7378_v52, %v994_v39  ;;  %v7383_v6 = vld [vmem:[#allocation97_spill] sm:$0xff]  ;;  %v7384_v39 = vld [vmem:[#allocation15_spill] sm:$0xff] }
 0x2ad   :  { %1888 = vmatmul.f32.vlgmr.msra.gmra.mxu2 %v5785_v8  ;;  %v1676_v34 = vadd.f32 %v7367_v15, %v1339_v18  ;;  %v992_v18 = vadd.f32 %v7377_v51, %v7376_v9  ;;  %v7207_v61 = vmax.f32 %v5855_v30, 0.0  ;;  %v5887_v15 = vld [vmem:[%s7190_s3 + $0x20] sm:$0xff]  ;;  %v988_v28 = vadd.f32 %v7385_v14, %v7384_v39  ;;  %v7389_v25 = vld [vmem:[#allocation52_spill] sm:$0xff]  ;;  %v7391_v14 = vld [vmem:[#allocation93_spill] sm:$0xff] }
 0x2ae   :  { %1978 = vmatpush.msrb.mxu2 %v1794_v63  ;;  %v5879_v1 = vadd.f32 %v5760_v23, %v1674_v53  ;;  %v1668_v53 = vadd.f32 %v7383_v6, %v1331_v55  ;;  %v7387_v51 = vld [vmem:[#allocation95_spill] sm:$0xff]  ;;  %v5907_v52 = vadd.f32 %v5760_v23, %v1670_v56  ;;  %v7388_v55 = vld [vmem:[#allocation12_spill] sm:$0xff]  ;;  %v7390_v6 = vld [vmem:[#allocation73_spill] sm:$0xff]  ;;  %v7210_v56 = vmax.f32 %v5896_v19, 0.0 }
 0x2af   :  { %v5810_v3 = vpop.f32.mrf.mxu0  ;;  %v5812_v58 = vpop.f32.mrf.mxu1  ;;  %v5869_v62 = vadd.f32 %v5760_v23, %v1676_v34  ;;  %v7380_v34 = vld [vmem:[#allocation16_spill] sm:$0xff]  ;;  %v1329_v38 = vadd.f32 %v7382_v17, %v992_v18  ;;  %v1325_v39 = vadd.f32 %v7390_v6, %v988_v28  ;;  %v5937_v28 = vld [vmem:[%s7190_s3 + $0x30] sm:$0xff]  ;;  %v7397_v6 = vld [vmem:[#allocation74_spill] sm:$0xff] }
 0x2b0   :  { %1979 = vmatpush.msrb.mxu2 %v1792_v7  ;;  %v990_v33 = vadd.f32 %v7381_v47, %v7380_v34  ;;  %v7211_v37 = vmax.f32 %v5879_v1, 0.0  ;;  %v604_v34 = vadd.f32 %v7389_v25, %v7388_v55  ;;  %v7395_v25 = vld [vmem:[#allocation92_spill] sm:$0xff] }
 0x2b1   :  { %v7206_v5 = vmax.f32 %v5869_v62, 0.0  ;;  %v1666_v18 = vadd.f32 %v7387_v51, %v1329_v38  ;;  %v5919_v38 = vadd.f32 %v5760_v23, %v1668_v53  ;;  %v7393_v51 = vld [vmem:[#allocation54_spill] sm:$0xff]  ;;  %v7212_v53 = vmax.f32 %v5907_v52, 0.0 }
 0x2b2   :  { %1980 = vmatpush.msrb.mxu2 %v7216_v16  ;;  %v1327_v9 = vadd.f32 %v7386_v45, %v990_v33  ;;  %v7392_v45 = vld [vmem:[#allocation13_spill] sm:$0xff] }
 0x2b4   :  { %1981 = vmatpush.msrb.mxu2 %v7214_v31  ;;  %v1664_v33 = vadd.f32 %v7391_v14, %v1327_v9  ;;  %v7396_v9 = vld [vmem:[#allocation40_spill] sm:$0xff] }
 0x2b5   :  { %1891 = vmatmul.f32.gmra.mxu2 %v5837_v12  ;;  %v1029_v14 = vadd.f32 %v7397_v6, %v7396_v9 }
 0x2b6   :  { %1982 = vmatpush.msrb.mxu2 %v7213_v36 }
 0x2b7   :  { %v5862_v11 = vpop.f32.mrf.mxu0  ;;  %v5864_v43 = vpop.f32.mrf.mxu1  ;;  %v1366_v6 = vadd.f32 %v5799_v24, %v1029_v14 }
 0x2b8   :  { %1983 = vmatpush.msrb.mxu2 %v7209_v48  ;;  %v5929_v48 = vadd.f32 %v5760_v23, %v1666_v18  ;;  %v5943_v18 = vadd.f32 %v5760_v23, %v1664_v33 }
 0x2b9   :  { %v1703_v31 = vadd.f32 %v5862_v11, %v1366_v6  ;;  %v7405_v11 = vld [vmem:[#allocation32_spill] sm:$0xff] }
 0x2ba   :  { %1984 = vmatpush.msrb.mxu2 %v7208_v4  ;;  %v1662_v4 = vadd.f32 %v7395_v25, %v1325_v39  ;;  %v5951_v25 = vld [vmem:[%s7190_s3 + $0xc0] sm:$0xff] }
 0x2bb   :  { %2161 = vmatmul.f32.vlgmr.msrb.gmra.mxu0 %v5951_v25 }
 0x2bc   :  { %1985 = vmatpush.msrb.mxu2 %v7207_v61  ;;  %v7394_v61 = vld [vmem:[#allocation77_spill] sm:$0xff]  ;;  %v5961_v33 = vadd.f32 %v5760_v23, %v1662_v4  ;;  %v1766_v4 = vmax.f32 %v5943_v18, 0.0 }
 0x2bd   :  { %1894 = vmatmul.f32.gmra.mxu2 %v5887_v15  ;;  %v1031_v55 = vadd.f32 %v7394_v61, %v604_v34  ;;  %v7398_v61 = vld [vmem:[#allocation79_spill] sm:$0xff] }
 0x2be   :  { %1986 = vmatpush.msrb.mxu2 %v7206_v5  ;;  %v607_v5 = vadd.f32 %v7393_v51, %v7392_v45  ;;  %v1232_v45 = vpop.f32.mrf.mxu2  ;;  %v7215_v51 = vmax.f32 %v5919_v38, 0.0 }
 0x2bf   :  { %v1566_v47 = vpop.f32.mrf.mxu0  ;;  %v5914_v17 = vpop.f32.mrf.mxu1  ;;  %v1368_v39 = vadd.f32 %v1229_v59, %v1031_v55 }
 0x2c0   :  { %1987 = vmatpush.msrb.mxu2 %v7211_v37  ;;  %v1033_v34 = vadd.f32 %v7398_v61, %v607_v5  ;;  %v7400_v37 = vld [vmem:[#allocation71_spill] sm:$0xff]  ;;  %v5958_v59 = vpop.f32.mrf.mxu3  ;;  %v1768_v61 = vmax.f32 %v5929_v48, 0.0 }
 0x2c1   :  { %v1705_v55 = vadd.f32 %v1566_v47, %v1368_v39  ;;  %v7403_v47 = vld [vmem:[#allocation34_spill] sm:$0xff] }
 0x2c2   :  { %1988 = vmatpush.msrb.mxu2 %v7210_v56  ;;  %v7399_v56 = vld [vmem:[#allocation38_spill] sm:$0xff]  ;;  %v1370_v5 = vadd.f32 %v1232_v45, %v1033_v34 }
 0x2c3   :  { %v1027_v9 = vadd.f32 %v7400_v37, %v7399_v56  ;;  %v7402_v37 = vld [vmem:[#allocation69_spill] sm:$0xff]  ;;  %v7404_v34 = vld [vmem:[#allocation66_spill] sm:$0xff] }
 0x2c4   :  { %1989 = vmatpush.msrb.mxu2 %v7212_v53  ;;  %v7401_v53 = vld [vmem:[#allocation36_spill] sm:$0xff]  ;;  %v1023_v39 = vadd.f32 %v7404_v34, %v7403_v47 }
 0x2c5   :  { %1897 = vmatmul.f32.gmra.mxu2 %v5937_v28  ;;  %v1025_v56 = vadd.f32 %v7402_v37, %v7401_v53  ;;  %v1364_v36 = vadd.f32 %v5752_v49, %v1027_v9  ;;  %v1759_v37 = vadd.f32 %v5668_v46, %v1705_v55  ;;  %v1764_v49 = vmax.f32 %v5961_v33, 0.0  ;;  %v7406_v9 = vld [vmem:[#allocation63_spill] sm:$0xff]  ;;  %v6164_v33 = vld [vmem:[%s7190_s3 + $0xe8] sm:$0xff] }
 0x2c6   :  { %1990 = vmatpush.msrb.mxu2 %v7215_v51  ;;  %v1021_v6 = vadd.f32 %v7406_v9, %v7405_v11  ;;  %v7411_v11 = vmax.f32 %v5803_v60, 0.0 }
 0x2c7   :  { %v1569_v24 = vpop.f32.mrf.mxu0  ;;  %v5968_v14 = vpop.f32.mrf.mxu1  ;;  %v1362_v51 = vadd.f32 %v5721_v57, %v1025_v56  ;;  %v1701_v53 = vadd.f32 %v5810_v3, %v1364_v36  ;;  %v1360_v57 = vadd.f32 %v5690_v50, %v1023_v39  ;;  %v1757_v36 = vadd.f32 %v5668_v46, %v1703_v31  ;;  %v5999_v56 = vld [vmem:[%s7190_s3 + $0xd0] sm:$0xff] }
 0x2c8   :  { %v1707_v45 = vadd.f32 %v1569_v24, %v1370_v5  ;;  %1991 = vmatpush.msrb.mxu2 %v1768_v61  ;;  %v5989_v5 = vld [vmem:[%s7190_s3 + $0x40] sm:$0xff]  ;;  %v7407_v24 = vld [vmem:[#allocation30_spill] sm:$0xff]  ;;  %2164 = vmatmul.f32.gmra.mxu0 %v5999_v56  ;;  %v1358_v50 = vadd.f32 %v5661_v35, %v1021_v6  ;;  %v1807_v31 = vmax.f32 %v1759_v37, 0.0  ;;  %v1318_v39 = vpop.f32.mrf.mxu3 }
 0x2c9   :  { %v1699_v3 = vadd.f32 %v5764_v21, %v1362_v51  ;;  %v1697_v21 = vadd.f32 %v5738_v2, %v1360_v57  ;;  %v1805_v2 = vmax.f32 %v1757_v36, 0.0  ;;  %v6034_v6 = vld [vmem:[%s7190_s3 + $0xe0] sm:$0xff] }
 0x2ca   :  { %v1761_v16 = vadd.f32 %v5668_v46, %v1707_v45  ;;  %1992 = vmatpush.msrb.mxu2 %v1766_v4  ;;  %v7408_v45 = vld [vmem:[#allocation61_spill] sm:$0xff]  ;;  %v1695_v34 = vadd.f32 %v5713_v0, %v1358_v50 }
 0x2cb   :  { %v1019_v47 = vadd.f32 %v7408_v45, %v7407_v24  ;;  %v1753_v35 = vadd.f32 %v5668_v46, %v1699_v3  ;;  %v1751_v40 = vadd.f32 %v5668_v46, %v1697_v21  ;;  %v6026_v0 = vld [vmem:[%s7190_s3 + $0x50] sm:$0xff]  ;;  %v7413_v3 = vmax.f32 %v5829_v54, 0.0  ;;  %v6050_v54 = vld [vmem:[%s7190_s3 + $0x60] sm:$0xff] }
 0x2cc   :  { %v1809_v55 = vmax.f32 %v1761_v16, 0.0  ;;  %1993 = vmatpush.msrb.mxu2 %v1764_v49  ;;  %v1755_v16 = vadd.f32 %v5668_v46, %v1701_v53  ;;  %v7410_v53 = vmax.f32 %v5792_v29, 0.0  ;;  %v1749_v9 = vadd.f32 %v5668_v46, %v1695_v34  ;;  %v7416_v45 = vld [vmem:[#allocation85_spill] sm:$0xff]  ;;  %v7421_v34 = vld [vmem:[#allocation82_spill] sm:$0xff] }
 0x2cd   :  { %1900 = vmatmul.f32.gmra.mxu2 %v5989_v5  ;;  %v1801_v29 = vmax.f32 %v1753_v35, 0.0  ;;  %v1799_v57 = vmax.f32 %v1751_v40, 0.0  ;;  %v7417_v21 = vmax.f32 %v5855_v30, 0.0  ;;  %v6062_v30 = vld [vmem:[%s7190_s3 + $0xc8] sm:$0xff] }
 0x2ce   :  { %2251 = vmatpush.msra.mxu2 %v1794_v63  ;;  %1933 = vmatpush.msrb.mxu3 %v1809_v55  ;;  %v1356_v63 = vadd.f32 %v7409_v10, %v1019_v47 }
 0x2cf   :  { %2206 = vmatpush.msra.mxu1 %v1809_v55  ;;  %v6012_v51 = vpop.f32.mrf.mxu1  ;;  %v1797_v55 = vmax.f32 %v1749_v9, 0.0 }
 0x2d0   :  { %2252 = vmatpush.msra.mxu2 %v1792_v7  ;;  %1934 = vmatpush.msrb.mxu3 %v1807_v31  ;;  %v1693_v37 = vadd.f32 %v5685_v26, %v1356_v63  ;;  %v1803_v7 = vmax.f32 %v1755_v16, 0.0  ;;  %v7412_v26 = vmax.f32 %v5817_v22, 0.0  ;;  %v7414_v22 = vmax.f32 %v5844_v27, 0.0  ;;  %v1321_v50 = vpop.f32.mrf.mxu3  ;;  %v6055_v27 = vld [vmem:[%s7190_s3 + $0x8] sm:$0xff]  ;;  %v7418_v16 = vld [vmem:[#allocation45_spill] sm:$0xff]  ;;  %v7420_v63 = vld [vmem:[#allocation43_spill] sm:$0xff] }
 0x2d1   :  { %2207 = vmatpush.msra.mxu1 %v1807_v31  ;;  %2167 = vmatmul.f32.gmra.mxu0 %v6034_v6  ;;  %v7419_v31 = vld [vmem:[#allocation88_spill] sm:$0xff]  ;;  %v1030_v35 = vadd.f32 %v7421_v34, %v7420_v63  ;;  %v7434_v34 = vmax.f32 %v5919_v38, 0.0 }
 0x2d2   :  { %2253 = vmatpush.msra.mxu2 %v7410_v53  ;;  %1935 = vmatpush.msrb.mxu3 %v1805_v2  ;;  %v1747_v60 = vadd.f32 %v5668_v46, %v1693_v37  ;;  %v7415_v46 = vld [vmem:[#allocation44_spill] sm:$0xff]  ;;  %v1034_v10 = vadd.f32 %v7419_v31, %v7418_v16  ;;  %v7422_v53 = vmax.f32 %v5869_v62, 0.0  ;;  %v6071_v37 = vld [vmem:[%s7190_s3 + $0xf0] sm:$0xff]  ;;  %v7425_v62 = vmax.f32 %v5879_v1, 0.0 }
 0x2d3   :  { %2208 = vmatpush.msra.mxu1 %v1805_v2  ;;  %v1032_v47 = vadd.f32 %v7416_v45, %v7415_v46  ;;  %v7430_v46 = vld [vmem:[#allocation75_spill] sm:$0xff]  ;;  %v7431_v16 = vmax.f32 %v5907_v52, 0.0  ;;  %v7433_v31 = vld [vmem:[#allocation72_spill] sm:$0xff] }
 0x2d4   :  { %2254 = vmatpush.msra.mxu2 %v7411_v11  ;;  %1936 = vmatpush.msrb.mxu3 %v1803_v7  ;;  %v1795_v24 = vmax.f32 %v1747_v60, 0.0  ;;  %v1371_v40 = vadd.f32 %v1321_v50, %v1034_v10  ;;  %v7424_v11 = vld [vmem:[#allocation80_spill] sm:$0xff] }
 0x2d5   :  { %2209 = vmatpush.msra.mxu1 %v1803_v7  ;;  %1903 = vmatmul.f32.gmra.mxu2 %v6026_v0  ;;  %v1369_v2 = vadd.f32 %v1318_v39, %v1032_v47  ;;  %v7423_v7 = vld [vmem:[#allocation41_spill] sm:$0xff]  ;;  %v1367_v39 = vadd.f32 %v5958_v59, %v1030_v35  ;;  %v7428_v59 = vmax.f32 %v5896_v19, 0.0  ;;  %v6108_v19 = vld [vmem:[%s7190_s3 + $0x18] sm:$0xff] }
 0x2d6   :  { %2255 = vmatpush.msra.mxu2 %v7412_v26  ;;  %1937 = vmatpush.msrb.mxu3 %v1801_v29  ;;  %v1028_v9 = vadd.f32 %v7424_v11, %v7423_v7  ;;  %v6121_v35 = vld [vmem:[%s7190_s3 + $0xd8] sm:$0xff] }
 0x2d7   :  { %2210 = vmatpush.msra.mxu1 %v1801_v29  ;;  %v1655_v36 = vpop.f32.mrf.mxu1 }
 0x2d8   :  { %2256 = vmatpush.msra.mxu2 %v7413_v3  ;;  %1938 = vmatpush.msrb.mxu3 %v1799_v57  ;;  %v1706_v29 = vadd.f32 %v1655_v36, %v1369_v2  ;;  %v7427_v3 = vld [vmem:[#allocation78_spill] sm:$0xff]  ;;  %v7429_v36 = vld [vmem:[#allocation37_spill] sm:$0xff]  ;;  %v6126_v2 = vld [vmem:[%s7190_s3 + $0x100] sm:$0xff] }
 0x2d9   :  { %2211 = vmatpush.msra.mxu1 %v1799_v57  ;;  %2170 = vmatmul.f32.gmra.mxu0 %v6071_v37  ;;  %v7426_v57 = vld [vmem:[#allocation39_spill] sm:$0xff]  ;;  %v1024_v45 = vadd.f32 %v7430_v46, %v7429_v36  ;;  %v6233_v36 = vld [vmem:[%s7190_s3 + $0xb0] sm:$0xff]  ;;  %v6238_v46 = vld [vmem:[%s7190_s3 + $0x58] sm:$0xff] }
 0x2da   :  { %2257 = vmatpush.msra.mxu2 %v7414_v22  ;;  %1939 = vmatpush.msrb.mxu3 %v1797_v55  ;;  %v1365_v22 = vadd.f32 %v5892_v41, %v1028_v9  ;;  %v6103_v41 = vld [vmem:[%s7190_s3 + $0x70] sm:$0xff] }
 0x2db   :  { %2212 = vmatpush.msra.mxu1 %v1797_v55  ;;  %v1026_v55 = vadd.f32 %v7427_v3, %v7426_v57  ;;  %v1361_v10 = vadd.f32 %v5769_v44, %v1024_v45  ;;  %v6181_v57 = vld [vmem:[%s7190_s3 + $0x90] sm:$0xff]  ;;  %v6191_v3 = vld [vmem:[%s7190_s3 + $0xf8] sm:$0xff] }
 0x2dc   :  { %2258 = vmatpush.msra.mxu2 %v7417_v21  ;;  %1940 = vmatpush.msrb.mxu3 %v1795_v24  ;;  %v1702_v50 = vadd.f32 %v5968_v14, %v1365_v22  ;;  %v1760_v21 = vadd.f32 %v5760_v23, %v1706_v29  ;;  %v6207_v22 = vld [vmem:[%s7190_s3 + $0xa0] sm:$0xff]  ;;  %v6243_v45 = vld [vmem:[%s7190_s3 + $0x118] sm:$0xff] }
 0x2dd   :  { %2213 = vmatpush.msra.mxu1 %v1795_v24  ;;  %1906 = vmatmul.f32.gmra.mxu2 %v6050_v54  ;;  %v1704_v24 = vadd.f32 %v6012_v51, %v1367_v39  ;;  %v1363_v47 = vadd.f32 %v5825_v32, %v1026_v55  ;;  %v7432_v32 = vld [vmem:[#allocation35_spill] sm:$0xff]  ;;  %v1698_v38 = vadd.f32 %v5864_v43, %v1361_v10  ;;  %v6311_v10 = vld [vmem:[%s7190_s3 + $0x170] sm:$0xff] }
 0x2de   :  { %2259 = vmatpush.msra.mxu2 %v7422_v53  ;;  %4246 = vmatmul.msk.f32.vlgmr.msrb.gmra.mxu3 %vm1835_vm2, %v6055_v27  ;;  %v1022_v14 = vadd.f32 %v7433_v31, %v7432_v32  ;;  %v7435_v53 = vld [vmem:[#allocation33_spill] sm:$0xff]  ;;  %v1756_v7 = vadd.f32 %v5760_v23, %v1702_v50  ;;  %v1808_v11 = vmax.f32 %v1760_v21, 0.0  ;;  %v6196_v55 = vld [vmem:[%s7190_s3 + $0x120] sm:$0xff]  ;;  %v6259_v50 = vld [vmem:[%s7190_s3 + $0x68] sm:$0xff] }
 0x2df   :  { %v1658_v26 = vpop.f32.mrf.mxu1  ;;  %4294 = vmatmul.msk.f32.vlgmr.msra.gmra.mxu1 %vm1835_vm2, %v6062_v30  ;;  %v1700_v52 = vadd.f32 %v5914_v17, %v1363_v47  ;;  %v1758_v63 = vadd.f32 %v5760_v23, %v1704_v24  ;;  %v6212_v24 = vld [vmem:[%s7190_s3 + $0x48] sm:$0xff]  ;;  %v6248_v47 = vld [vmem:[%s7190_s3 + $0x140] sm:$0xff]  ;;  %v6285_v32 = vld [vmem:[%s7190_s3 + $0x138] sm:$0xff] }
 0x2e0   :  { %2260 = vmatpush.msra.mxu2 %v7425_v62  ;;  %v1708_v60 = vadd.f32 %v1658_v26, %v1371_v40  ;;  %v7436_v40 = vld [vmem:[#allocation70_spill] sm:$0xff]  ;;  %v1359_v17 = vadd.f32 %v5733_v42, %v1022_v14  ;;  %v1804_v29 = vmax.f32 %v1756_v7, 0.0  ;;  %v6264_v21 = vld [vmem:[%s7190_s3 + $0x128] sm:$0xff]  ;;  %v6290_v31 = vld [vmem:[%s7190_s3 + $0x160] sm:$0xff] }
 0x2e1   :  { %v1020_v44 = vadd.f32 %v7436_v40, %v7435_v53  ;;  %2173 = vmatmul.f32.gmra.mxu0 %v6126_v2  ;;  %v1754_v42 = vadd.f32 %v5760_v23, %v1700_v52  ;;  %v1806_v43 = vmax.f32 %v1758_v63, 0.0  ;;  %v6306_v14 = vld [vmem:[%s7190_s3 + $0x148] sm:$0xff]  ;;  %v6327_v52 = vld [vmem:[%s7190_s3 + $0x158] sm:$0xff]  ;;  %v2395_v63 = vld [vmem:[%s7191_s4 + $0x70] sm:$0xff] }
 0x2e2   :  { %2261 = vmatpush.msra.mxu2 %v7428_v59  ;;  %v6091_v1 = vadd.f32 %v5760_v23, %v1708_v60  ;;  %v1696_v39 = vadd.f32 %v5812_v58, %v1359_v17  ;;  %v6158_v58 = vld [vmem:[%s7190_s3 + $0x28] sm:$0xff]  ;;  %v2393_v40 = vld [vmem:[%s7191_s4 + $0x60] sm:$0xff]  ;;  %v6370_v7 = vld [vmem:[%s7190_s3 + $0xb8] sm:$0xff] }
 0x2e3   :  { %v1357_v9 = vadd.f32 %v5702_v20, %v1020_v44  ;;  %v6153_v20 = vld [vmem:[%s7190_s3 + $0x80] sm:$0xff]  ;;  %v6217_v59 = vld [vmem:[%s7190_s3 + $0x108] sm:$0xff]  ;;  %v2392_v44 = vld [vmem:[%s7191_s4 + $0x58] sm:$0xff] }
 0x2e4   :  { %2262 = vmatpush.msra.mxu2 %v7431_v16  ;;  %v1810_v51 = vmax.f32 %v6091_v1, 0.0  ;;  %v1750_v18 = vadd.f32 %v5760_v23, %v1696_v39  ;;  %v6222_v1 = vld [vmem:[%s7190_s3 + $0x130] sm:$0xff]  ;;  %v6351_v53 = vld [vmem:[%s7190_s3 + $0x168] sm:$0xff]  ;;  %v2388_v39 = vld [vmem:[%s7191_s4 + $0x38] sm:$0xff] }
 0x2e5   :  { %1909 = vmatmul.f32.gmra.mxu2 %v6103_v41  ;;  %v1694_v48 = vadd.f32 %v5766_v13, %v1357_v9  ;;  %v1802_v13 = vmax.f32 %v1754_v42, 0.0  ;;  %v6269_v16 = vld [vmem:[%s7190_s3 + $0x150] sm:$0xff]  ;;  %v2389_v9 = vld [vmem:[%s7191_s4 + $0x40] sm:$0xff] }
 0x2e6   :  { %2263 = vmatpush.msra.mxu2 %v7434_v34  ;;  %4247 = vmatmul.msk.f32.gmra.mxu3 %vm1835_vm2, %v6108_v19  ;;  %v1798_v26 = vmax.f32 %v1750_v18, 0.0  ;;  %v6343_v34 = vld [vmem:[%s7190_s3 + $0xa8] sm:$0xff]  ;;  %v2383_v18 = vld [vmem:[%s7191_s4 + $0x10] sm:$0xff] }
 0x2e7   :  { %2039 = vmatpush.msra.mxu3 %v1810_v51  ;;  %4295 = vmatmul.msk.f32.gmra.mxu1 %vm1835_vm2, %v6121_v35 }
 0x2e8   :  { %2264 = vmatpush.msra.mxu2 %v1768_v61  ;;  %v1752_v61 = vadd.f32 %v5760_v23, %v1698_v38  ;;  %v2391_v38 = vld [vmem:[%s7191_s4 + $0x50] sm:$0xff] }
 0x2e9   :  { %2040 = vmatpush.msra.mxu3 %v1808_v11 }
 0x2ea   :  { %2265 = vmatpush.msra.mxu2 %v1766_v4  ;;  %v6169_v4 = vld [vmem:[%s7190_s3 + $0x110] sm:$0xff]  ;;  %v1800_v62 = vmax.f32 %v1752_v61, 0.0  ;;  %v2384_v61 = vld [vmem:[%s7191_s4 + $0x18] sm:$0xff] }
 0x2eb   :  { %2041 = vmatpush.msra.mxu3 %v1806_v43  ;;  %2176 = vmatmul.f32.gmra.mxu0 %v6169_v4 }
 0x2ec   :  { %2266 = vmatpush.msra.mxu2 %v1764_v49  ;;  %v1748_v49 = vadd.f32 %v5760_v23, %v1694_v48  ;;  %v6186_v23 = vld [vmem:[%s7190_s3 + $0x38] sm:$0xff]  ;;  %v2386_v48 = vld [vmem:[%s7191_s4 + $0x28] sm:$0xff] }
 0x2ed   :  { %2042 = vmatpush.msra.mxu3 %v1804_v29  ;;  %1912 = vmatmul.f32.gmra.mxu2 %v6153_v20 }
 0x2ee   :  { %4248 = vmatmul.msk.f32.gmra.mxu3 %vm1835_vm2, %v6158_v58  ;;  %v1796_v60 = vmax.f32 %v1748_v49, 0.0 }
 0x2ef   :  { %2043 = vmatpush.msra.mxu3 %v1802_v13  ;;  %4296 = vmatmul.msk.f32.gmra.mxu1 %vm1835_vm2, %v6164_v33 }
 0x2f1   :  { %2044 = vmatpush.msra.mxu3 %v1800_v62 }
 0x2f3   :  { %2045 = vmatpush.msra.mxu3 %v1798_v26  ;;  %2179 = vmatmul.f32.gmra.mxu0 %v6196_v55 }
 0x2f5   :  { %2046 = vmatpush.msra.mxu3 %v1796_v60  ;;  %1915 = vmatmul.f32.gmra.mxu2 %v6181_v57 }
 0x2f6   :  { %4249 = vmatmul.msk.f32.gmra.mxu3 %vm1835_vm2, %v6186_v23 }
 0x2f7   :  { %2312 = vmatpush.msrb.mxu3 %v1810_v51  ;;  %4297 = vmatmul.msk.f32.gmra.mxu1 %vm1835_vm2, %v6191_v3  ;;  %v6280_v51 = vld [vmem:[%s7190_s3 + $0x78] sm:$0xff] }
 0x2f9   :  { %2313 = vmatpush.msrb.mxu3 %v1808_v11  ;;  %v6378_v11 = vld [vmem:[%s7190_s3 + $0x178] sm:$0xff] }
 0x2fb   :  { %2314 = vmatpush.msrb.mxu3 %v1806_v43  ;;  %2182 = vmatmul.f32.gmra.mxu0 %v6222_v1  ;;  %v2387_v43 = vld [vmem:[%s7191_s4 + $0x30] sm:$0xff] }
 0x2fd   :  { %2315 = vmatpush.msrb.mxu3 %v1804_v29  ;;  %1918 = vmatmul.f32.gmra.mxu2 %v6207_v22 }
 0x2fe   :  { %4250 = vmatmul.msk.f32.gmra.mxu3 %vm1835_vm2, %v6212_v24 }
 0x2ff   :  { %2316 = vmatpush.msrb.mxu3 %v1802_v13  ;;  %4298 = vmatmul.msk.f32.gmra.mxu1 %vm1835_vm2, %v6217_v59  ;;  %v2382_v13 = vld [vmem:[%s7191_s4 + $0x8] sm:$0xff] }
 0x301   :  { %2317 = vmatpush.msrb.mxu3 %v1800_v62 }
 0x303   :  { %2318 = vmatpush.msrb.mxu3 %v1798_v26  ;;  %2185 = vmatmul.f32.gmra.mxu0 %v6248_v47 }
 0x305   :  { %2319 = vmatpush.msrb.mxu3 %v1796_v60  ;;  %1921 = vmatmul.f32.gmra.mxu2 %v6233_v36 }
 0x306   :  { %4251 = vmatmul.msk.f32.gmra.mxu3 %vm1835_vm2, %v6238_v46 }
 0x307   :  { %4299 = vmatmul.msk.f32.gmra.mxu1 %vm1835_vm2, %v6243_v45 }
 0x30b   :  { %2188 = vmatmul.f32.gmra.mxu0 %v6269_v16 }
 0x30d   :  { %1994 = vmatmul.f32.vlgmr.msrb.gmra.mxu2 %v5785_v8  ;;  %v6301_v8 = vld [vmem:[%s7190_s3 + $0x88] sm:$0xff] }
 0x30e   :  { %4252 = vmatmul.msk.f32.gmra.mxu3 %vm1835_vm2, %v6259_v50 }
 0x30f   :  { %4300 = vmatmul.msk.f32.gmra.mxu1 %vm1835_vm2, %v6264_v21 }
 0x313   :  { %2191 = vmatmul.f32.gmra.mxu0 %v6290_v31 }
 0x315   :  { %1997 = vmatmul.f32.gmra.mxu2 %v5837_v12  ;;  %v6322_v12 = vld [vmem:[%s7190_s3 + $0x98] sm:$0xff] }
 0x316   :  { %4253 = vmatmul.msk.f32.gmra.mxu3 %vm1835_vm2, %v6280_v51 }
 0x317   :  { %4301 = vmatmul.msk.f32.gmra.mxu1 %vm1835_vm2, %v6285_v32 }
 0x31b   :  { %2194 = vmatmul.f32.gmra.mxu0 %v6311_v10 }
 0x31d   :  { %2000 = vmatmul.f32.gmra.mxu2 %v5887_v15  ;;  %v2396_v15 = vld [vmem:[%s7191_s4 + $0x78] sm:$0xff] }
 0x31e   :  { %4254 = vmatmul.msk.f32.gmra.mxu3 %vm1835_vm2, %v6301_v8  ;;  %2436 = vmatpush.msra.mxu0 %v2396_v15 }
 0x31f   :  { %4302 = vmatmul.msk.f32.gmra.mxu1 %vm1835_vm2, %v6306_v14 }
 0x320   :  { %2437 = vmatpush.msra.mxu0 %v2395_v63 }
 0x325   :  { %2003 = vmatmul.f32.gmra.mxu2 %v5937_v28  ;;  %v2394_v28 = vld [vmem:[%s7191_s4 + $0x68] sm:$0xff] }
 0x326   :  { %4255 = vmatmul.msk.f32.gmra.mxu3 %vm1835_vm2, %v6322_v12  ;;  %2438 = vmatpush.msra.mxu0 %v2394_v28 }
 0x327   :  { %4303 = vmatmul.msk.f32.gmra.mxu1 %vm1835_vm2, %v6327_v52 }
 0x328   :  { %2439 = vmatpush.msra.mxu0 %v2393_v40 }
 0x32a   :  { %2440 = vmatpush.msra.mxu0 %v2392_v44 }
 0x32c   :  { %2441 = vmatpush.msra.mxu0 %v2391_v38 }
 0x32d   :  { %2006 = vmatmul.f32.gmra.mxu2 %v5989_v5  ;;  %v2390_v5 = vld [vmem:[%s7191_s4 + $0x48] sm:$0xff] }
 0x32e   :  { %4256 = vmatmul.msk.f32.gmra.mxu3 %vm1835_vm2, %v6343_v34  ;;  %2442 = vmatpush.msra.mxu0 %v2390_v5 }
 0x32f   :  { %4304 = vmatmul.msk.f32.gmra.mxu1 %vm1835_vm2, %v6351_v53 }
 0x330   :  { %v1889_v17 = vpop.f32.mrf.mxu2  ;;  %2443 = vmatpush.msra.mxu0 %v2389_v9 }
 0x332   :  { %2444 = vmatpush.msra.mxu0 %v2388_v39 }
 0x334   :  { %2445 = vmatpush.msra.mxu0 %v2387_v43 }
 0x335   :  { %2009 = vmatmul.f32.gmra.mxu2 %v6026_v0  ;;  %v2385_v0 = vld [vmem:[%s7191_s4 + $0x20] sm:$0xff] }
 0x336   :  { %4257 = vmatmul.msk.f32.gmra.mxu3 %vm1835_vm2, %v6370_v7  ;;  %2446 = vmatpush.msra.mxu0 %v2386_v48 }
 0x337   :  { %4305 = vmatmul.msk.f32.gmra.mxu1 %vm1835_vm2, %v6378_v11 }
 0x338   :  { %v1892_v42 = vpop.f32.mrf.mxu2  ;;  %2447 = vmatpush.msra.mxu0 %v2385_v0 }
 0x33a   :  { %2448 = vmatpush.msra.mxu0 %v2384_v61 }
 0x33c   :  { %2449 = vmatpush.msra.mxu0 %v2383_v18 }
 0x33d   :  { %2012 = vmatmul.f32.gmra.mxu2 %v6050_v54  ;;  %v2381_v54 = vld [vmem:[%s7191_s4] sm:$0xff] }
 0x33e   :  { %4258 = vmatmul.msk.f32.vlgmr.msra.gmra.mxu3 %vm1835_vm2, %v6055_v27  ;;  %2450 = vmatpush.msra.mxu0 %v2382_v13  ;;  %v2162_v27 = vpop.f32.mrf.mxu0 }
 0x340   :  { %v1895_v29 = vpop.f32.mrf.mxu2  ;;  %2451 = vmatpush.msra.mxu0 %v2381_v54 }
 0x345   :  { %2015 = vmatmul.f32.gmra.mxu2 %v6103_v41 }
 0x346   :  { %4259 = vmatmul.msk.f32.gmra.mxu3 %vm1835_vm2, %v6108_v19  ;;  %v2165_v62 = vpop.f32.mrf.mxu0 }
 0x348   :  { %v1898_v49 = vpop.f32.mrf.mxu2 }
 0x34d   :  { %2018 = vmatmul.f32.gmra.mxu2 %v6153_v20 }
 0x34e   :  { %4260 = vmatmul.msk.f32.gmra.mxu3 %vm1835_vm2, %v6158_v58  ;;  %v2168_v41 = vpop.f32.mrf.mxu0 }
 0x350   :  { %v1901_v26 = vpop.f32.mrf.mxu2 }
 0x355   :  { %2021 = vmatmul.f32.gmra.mxu2 %v6181_v57 }
 0x356   :  { %4261 = vmatmul.msk.f32.gmra.mxu3 %vm1835_vm2, %v6186_v23  ;;  %v2171_v40 = vpop.f32.mrf.mxu0 }
 0x358   :  { %v1904_v60 = vpop.f32.mrf.mxu2 }
 0x35c   :  { %v2215_v15 = vpop.f32.mrf.mxu1 }
 0x35d   :  { %2024 = vmatmul.f32.gmra.mxu2 %v6207_v22  ;;  %v2216_v19 = vadd.f32 %v2215_v15, %v2162_v27 }
 0x35e   :  { %4262 = vmatmul.msk.f32.gmra.mxu3 %vm1835_vm2, %v6212_v24 }
 0x360   :  { %v6427_v20 = vpop.f32.mrf.mxu2 }
 0x361   :  { %v1942_v63 = vpop.f32.mrf.mxu3 }
 0x362   :  { %v1943_v58 = vadd.f32 %v1942_v63, %v1889_v17  ;;  %v2174_v17 = vpop.f32.mrf.mxu0 }
 0x364   :  { %v6429_v28 = vmax.f32 %v1943_v58, %v2216_v19  ;;  %v2218_v57 = vpop.f32.mrf.mxu1 }
 0x365   :  { %2027 = vmatmul.f32.gmra.mxu2 %v6233_v36  ;;  %v2219_v23 = vadd.f32 %v2218_v57, %v2165_v62  ;;  %v4342_v57 = vld [vmem:[%s7191_s4 + $0xf0] sm:$0xff] }
 0x366   :  { %4263 = vmatmul.msk.f32.gmra.mxu3 %vm1835_vm2, %v6238_v46  ;;  %2452 = vmatmul.f32.vlgmr.msra.gmra.mxu0 %v6429_v28 }
 0x368   :  { %v6435_v22 = vpop.f32.mrf.mxu2 }
 0x369   :  { %v1945_v24 = vpop.f32.mrf.mxu3 }
 0x36a   :  { %v1946_v44 = vadd.f32 %v1945_v24, %v1892_v42 }
 0x36c   :  { %v6437_v38 = vmax.f32 %v1946_v44, %v2219_v23  ;;  %v2221_v5 = vpop.f32.mrf.mxu1 }
 0x36d   :  { %2267 = vmatmul.f32.vlgmr.msra.gmra.mxu2 %v5951_v25  ;;  %v2222_v36 = vadd.f32 %v2221_v5, %v2168_v41  ;;  %v2177_v25 = vpop.f32.mrf.mxu0 }
 0x36e   :  { %4264 = vmatmul.msk.f32.gmra.mxu3 %vm1835_vm2, %v6259_v50  ;;  %2455 = vmatmul.f32.gmra.mxu0 %v6437_v38 }
 0x370   :  { %v6443_v46 = vpop.f32.mrf.mxu2 }
 0x371   :  { %v1948_v9 = vpop.f32.mrf.mxu3 }
 0x372   :  { %v1949_v39 = vadd.f32 %v1948_v9, %v1895_v29 }
 0x374   :  { %v6445_v43 = vmax.f32 %v1949_v39, %v2222_v36  ;;  %v2224_v48 = vpop.f32.mrf.mxu1  ;;  %v4340_v36 = vld [vmem:[%s7191_s4 + $0xe0] sm:$0xff] }
 0x375   :  { %2270 = vmatmul.f32.gmra.mxu2 %v5999_v56  ;;  %v2225_v50 = vadd.f32 %v2224_v48, %v2171_v40  ;;  %v2180_v27 = vpop.f32.mrf.mxu0 }
 0x376   :  { %4265 = vmatmul.msk.f32.gmra.mxu3 %vm1835_vm2, %v6280_v51  ;;  %2458 = vmatmul.f32.gmra.mxu0 %v6445_v43 }
 0x378   :  { %v6451_v42 = vpop.f32.mrf.mxu2 }
 0x379   :  { %v1951_v0 = vpop.f32.mrf.mxu3 }
 0x37a   :  { %v1952_v61 = vadd.f32 %v1951_v0, %v1898_v49 }
 0x37c   :  { %v6453_v18 = vmax.f32 %v1952_v61, %v2225_v50  ;;  %v2227_v13 = vpop.f32.mrf.mxu1  ;;  %v4336_v61 = vld [vmem:[%s7191_s4 + $0xc0] sm:$0xff] }
 0x37d   :  { %2273 = vmatmul.f32.gmra.mxu2 %v6034_v6  ;;  %v2228_v51 = vadd.f32 %v2227_v13, %v2174_v17 }
 0x37e   :  { %4266 = vmatmul.msk.f32.gmra.mxu3 %vm1835_vm2, %v6301_v8  ;;  %2461 = vmatmul.f32.gmra.mxu0 %v6453_v18 }
 0x380   :  { %v6459_v56 = vpop.f32.mrf.mxu2 }
 0x381   :  { %v1954_v29 = vpop.f32.mrf.mxu3 }
 0x382   :  { %v1955_v54 = vadd.f32 %v1954_v29, %v1901_v26  ;;  %v2183_v26 = vpop.f32.mrf.mxu0 }
 0x384   :  { %v6461_v62 = vmax.f32 %v1955_v54, %v2228_v51  ;;  %v2230_v41 = vpop.f32.mrf.mxu1  ;;  %v4334_v51 = vld [vmem:[%s7191_s4 + $0xb0] sm:$0xff] }
 0x385   :  { %2276 = vmatmul.f32.gmra.mxu2 %v6071_v37  ;;  %v2231_v8 = vadd.f32 %v2230_v41, %v2177_v25  ;;  %v4345_v37 = vld [vmem:[%s7191_s4 + $0x108] sm:$0xff] }
 0x386   :  { %4267 = vmatmul.msk.f32.gmra.mxu3 %vm1835_vm2, %v6322_v12  ;;  %2464 = vmatmul.f32.gmra.mxu0 %v6461_v62 }
 0x387   :  { %2561 = vmatpush.msrb.mxu2 %v4345_v37 }
 0x388   :  { %v6467_v6 = vpop.f32.mrf.mxu2 }
 0x389   :  { %v1957_v49 = vpop.f32.mrf.mxu3 }
 0x38a   :  { %v1958_v15 = vadd.f32 %v1957_v49, %v1904_v60  ;;  %v4344_v60 = vld [vmem:[%s7191_s4 + $0x100] sm:$0xff]  ;;  %v2186_v44 = vpop.f32.mrf.mxu0 }
 0x38b   :  { %2562 = vmatpush.msrb.mxu2 %v4344_v60  ;;  %v4332_v49 = vld [vmem:[%s7191_s4 + $0xa0] sm:$0xff] }
 0x38c   :  { %v6469_v19 = vmax.f32 %v1958_v15, %v2231_v8  ;;  %v2233_v63 = vpop.f32.mrf.mxu1 }
 0x38d   :  { %2279 = vmatmul.f32.gmra.mxu2 %v6126_v2  ;;  %v2234_v12 = vadd.f32 %v2233_v63, %v2180_v27  ;;  %v4343_v2 = vld [vmem:[%s7191_s4 + $0xf8] sm:$0xff]  ;;  %v4330_v63 = vld [vmem:[%s7191_s4 + $0x90] sm:$0xff] }
 0x38e   :  { %4268 = vmatmul.msk.f32.gmra.mxu3 %vm1835_vm2, %v6343_v34  ;;  %2467 = vmatmul.f32.gmra.mxu0 %v6469_v19 }
 0x38f   :  { %2563 = vmatpush.msrb.mxu2 %v4343_v2 }
 0x390   :  { %v6485_v34 = vpop.f32.mrf.mxu2 }
 0x391   :  { %v1960_v58 = vpop.f32.mrf.mxu3  ;;  %2564 = vmatpush.msrb.mxu2 %v4342_v57 }
 0x392   :  { %v1961_v40 = vadd.f32 %v1960_v58, %v6427_v20  ;;  %v4341_v20 = vld [vmem:[%s7191_s4 + $0xe8] sm:$0xff]  ;;  %v2189_v13 = vpop.f32.mrf.mxu0 }
 0x393   :  { %2565 = vmatpush.msrb.mxu2 %v4341_v20 }
 0x394   :  { %v6490_v23 = vmax.f32 %v1961_v40, %v2234_v12  ;;  %v2236_v24 = vpop.f32.mrf.mxu1 }
 0x395   :  { %2282 = vmatmul.f32.gmra.mxu2 %v6169_v4  ;;  %v2237_v5 = vadd.f32 %v2236_v24, %v2183_v26  ;;  %v4339_v4 = vld [vmem:[%s7191_s4 + $0xd8] sm:$0xff] }
 0x396   :  { %4269 = vmatmul.msk.f32.gmra.mxu3 %vm1835_vm2, %v6370_v7  ;;  %2470 = vmatmul.f32.gmra.mxu0 %v6490_v23  ;;  %v4338_v7 = vld [vmem:[%s7191_s4 + $0xd0] sm:$0xff] }
 0x397   :  { %2566 = vmatpush.msrb.mxu2 %v4340_v36 }
 0x398   :  { %v6511_v48 = vpop.f32.mrf.mxu2 }
 0x399   :  { %v1963_v17 = vpop.f32.mrf.mxu3  ;;  %2567 = vmatpush.msrb.mxu2 %v4339_v4 }
 0x39a   :  { %v1964_v9 = vadd.f32 %v1963_v17, %v6435_v22  ;;  %v4337_v22 = vld [vmem:[%s7191_s4 + $0xc8] sm:$0xff]  ;;  %v2192_v15 = vpop.f32.mrf.mxu0 }
 0x39b   :  { %2568 = vmatpush.msrb.mxu2 %v4338_v7 }
 0x39c   :  { %v6509_v39 = vmax.f32 %v1964_v9, %v2237_v5  ;;  %v2239_v50 = vpop.f32.mrf.mxu1 }
 0x39d   :  { %2285 = vmatmul.f32.gmra.mxu2 %v6196_v55  ;;  %v2240_v25 = vadd.f32 %v2239_v50, %v2186_v44 }
 0x39e   :  { %4306 = vmatmul.msk.f32.vlgmr.msrb.gmra.mxu3 %vm1835_vm2, %v6062_v30  ;;  %2473 = vmatmul.f32.gmra.mxu0 %v6509_v39  ;;  %v4335_v30 = vld [vmem:[%s7191_s4 + $0xb8] sm:$0xff] }
 0x39f   :  { %2569 = vmatpush.msrb.mxu2 %v4337_v22 }
 0x3a0   :  { %v6538_v27 = vpop.f32.mrf.mxu2 }
 0x3a1   :  { %v1966_v0 = vpop.f32.mrf.mxu3  ;;  %2570 = vmatpush.msrb.mxu2 %v4336_v61 }
 0x3a2   :  { %v1967_v55 = vadd.f32 %v1966_v0, %v6443_v46  ;;  %v4333_v46 = vld [vmem:[%s7191_s4 + $0xa8] sm:$0xff]  ;;  %v2195_v2 = vpop.f32.mrf.mxu0 }
 0x3a3   :  { %2571 = vmatpush.msrb.mxu2 %v4335_v30 }
 0x3a4   :  { %v6530_v29 = vmax.f32 %v1967_v55, %v2240_v25  ;;  %v2242_v54 = vpop.f32.mrf.mxu1 }
 0x3a5   :  { %2288 = vmatmul.f32.gmra.mxu2 %v6222_v1  ;;  %v2243_v41 = vadd.f32 %v2242_v54, %v2189_v13 }
 0x3a6   :  { %4307 = vmatmul.msk.f32.gmra.mxu3 %vm1835_vm2, %v6121_v35  ;;  %2572 = vmatpush.msrb.mxu2 %v4334_v51  ;;  %v4331_v35 = vld [vmem:[%s7191_s4 + $0x98] sm:$0xff] }
 0x3a7   :  { %2476 = vmatmul.f32.gmra.mxu0 %v6530_v29 }
 0x3a8   :  { %2573 = vmatpush.msrb.mxu2 %v4333_v46  ;;  %v6557_v12 = vpop.f32.mrf.mxu2 }
 0x3a9   :  { %v1969_v8 = vpop.f32.mrf.mxu3 }
 0x3aa   :  { %v1970_v1 = vadd.f32 %v1969_v8, %v6451_v42  ;;  %2574 = vmatpush.msrb.mxu2 %v4332_v49 }
 0x3ac   :  { %v6551_v26 = vmax.f32 %v1970_v1, %v2243_v41  ;;  %2575 = vmatpush.msrb.mxu2 %v4331_v35  ;;  %v2245_v37 = vpop.f32.mrf.mxu1 }
 0x3ad   :  { %2291 = vmatmul.f32.gmra.mxu2 %v6248_v47  ;;  %v2246_v42 = vadd.f32 %v2245_v37, %v2192_v15 }
 0x3ae   :  { %4308 = vmatmul.msk.f32.gmra.mxu3 %vm1835_vm2, %v6164_v33  ;;  %2576 = vmatpush.msrb.mxu2 %v4330_v63 }
 0x3af   :  { %2479 = vmatmul.f32.gmra.mxu0 %v6551_v26 }
 0x3b0   :  { %v6564_v20 = vpop.f32.mrf.mxu2 }
 0x3b1   :  { %v1972_v58 = vpop.f32.mrf.mxu3 }
 0x3b2   :  { %v1973_v60 = vadd.f32 %v1972_v58, %v6459_v56 }
 0x3b4   :  { %v2377_v40 = vmax.f32 %v1973_v60, %v2246_v42  ;;  %v2248_v57 = vpop.f32.mrf.mxu1 }
 0x3b5   :  { %2294 = vmatmul.f32.gmra.mxu2 %v6269_v16  ;;  %v2249_v47 = vadd.f32 %v2248_v57, %v2195_v2 }
 0x3b6   :  { %4309 = vmatmul.msk.f32.gmra.mxu3 %vm1835_vm2, %v6191_v3 }
 0x3b7   :  { %2482 = vmatmul.f32.gmra.mxu0 %v2377_v40 }
 0x3b8   :  { %v6569_v5 = vpop.f32.mrf.mxu2 }
 0x3b9   :  { %v1975_v33 = vpop.f32.mrf.mxu3 }
 0x3ba   :  { %v1976_v24 = vadd.f32 %v1975_v33, %v6467_v6  ;;  %v4346_v6 = vld [vmem:[%s7191_s4 + $0x110] sm:$0xff] }
 0x3bc   :  { %v2379_v44 = vmax.f32 %v1976_v24, %v2249_v47 }
 0x3bd   :  { %2297 = vmatmul.f32.gmra.mxu2 %v6290_v31 }
 0x3be   :  { %4310 = vmatmul.msk.f32.gmra.mxu3 %vm1835_vm2, %v6217_v59 }
 0x3bf   :  { %2485 = vmatmul.f32.gmra.mxu0 %v2379_v44 }
 0x3c0   :  { %v6577_v16 = vpop.f32.mrf.mxu2 }
 0x3c1   :  { %v2048_v56 = vpop.f32.mrf.mxu3 }
 0x3c2   :  { %v2049_v50 = vadd.f32 %v2048_v56, %v6485_v34 }
 0x3c5   :  { %2300 = vmatmul.f32.gmra.mxu2 %v6311_v10 }
 0x3c6   :  { %4311 = vmatmul.msk.f32.gmra.mxu3 %vm1835_vm2, %v6243_v45 }
 0x3c8   :  { %v6582_v59 = vpop.f32.mrf.mxu2 }
 0x3c9   :  { %v2051_v3 = vpop.f32.mrf.mxu3 }
 0x3ca   :  { %v2052_v61 = vadd.f32 %v2051_v3, %v6511_v48 }
 0x3cd   :  { %2577 = vmatmul.f32.vlgmr.msrb.gmra.mxu2 %v6429_v28 }
 0x3ce   :  { %4312 = vmatmul.msk.f32.gmra.mxu3 %vm1835_vm2, %v6264_v21 }
 0x3d0   :  { %v6589_v21 = vpop.f32.mrf.mxu2 }
 0x3d1   :  { %v2054_v31 = vpop.f32.mrf.mxu3 }
 0x3d2   :  { %v2055_v34 = vadd.f32 %v2054_v31, %v6538_v27 }
 0x3d5   :  { %2580 = vmatmul.f32.gmra.mxu2 %v6437_v38 }
 0x3d6   :  { %4313 = vmatmul.msk.f32.gmra.mxu3 %vm1835_vm2, %v6285_v32 }
 0x3d8   :  { %v6596_v28 = vpop.f32.mrf.mxu2 }
 0x3d9   :  { %v2057_v10 = vpop.f32.mrf.mxu3 }
 0x3da   :  { %v2058_v41 = vadd.f32 %v2057_v10, %v6557_v12 }
 0x3dd   :  { %2583 = vmatmul.f32.gmra.mxu2 %v6445_v43 }
 0x3de   :  { %4314 = vmatmul.msk.f32.gmra.mxu3 %vm1835_vm2, %v6306_v14 }
 0x3e0   :  { %v6606_v38 = vpop.f32.mrf.mxu2 }
 0x3e1   :  { %v6587_v45 = vpop.f32.mrf.mxu3 }
 0x3e2   :  { %v2061_v27 = vadd.f32 %v6587_v45, %v6564_v20 }
 0x3e5   :  { %2586 = vmatmul.f32.gmra.mxu2 %v6453_v18 }
 0x3e6   :  { %4315 = vmatmul.msk.f32.gmra.mxu3 %vm1835_vm2, %v6327_v52 }
 0x3e8   :  { %v6611_v43 = vpop.f32.mrf.mxu2 }
 0x3e9   :  { %v6594_v32 = vpop.f32.mrf.mxu3 }
 0x3ea   :  { %v2064_v37 = vadd.f32 %v6594_v32, %v6569_v5 }
 0x3ed   :  { %2589 = vmatmul.f32.gmra.mxu2 %v6461_v62  ;;  %v2397_v62 = vld [vmem:[%s7191_s4 + $0x80] sm:$0xff] }
 0x3ee   :  { %4316 = vmatmul.msk.f32.gmra.mxu3 %vm1835_vm2, %v6351_v53  ;;  %v2398_v53 = vld [vmem:[%s7191_s4 + $0x88] sm:$0xff] }
 0x3ef   :  { %2503 = vmatpush.msrb.mxu1 %v2398_v53 }
 0x3f1   :  { %v6601_v14 = vpop.f32.mrf.mxu3  ;;  %2504 = vmatpush.msrb.mxu1 %v2397_v62 }
 0x3f5   :  { %2592 = vmatmul.f32.gmra.mxu2 %v6469_v19 }
 0x3f6   :  { %4317 = vmatmul.msk.f32.gmra.mxu3 %vm1835_vm2, %v6378_v11  ;;  %v4347_v11 = vld [vmem:[%s7191_s4 + $0x118] sm:$0xff] }
 0x3f7   :  { %2628 = vmatpush.msra.mxu3 %v4347_v11 }
 0x3f9   :  { %v6608_v52 = vpop.f32.mrf.mxu3  ;;  %2629 = vmatpush.msra.mxu3 %v4346_v6 }
 0x3fa   :  { %v2070_v33 = vadd.f32 %v6608_v52, %v6582_v59 }
 0x3fd   :  { %2595 = vmatmul.f32.gmra.mxu2 %v6490_v23  ;;  %v2268_v23 = vpop.f32.mrf.mxu2 }
 0x401   :  { %v6613_v18 = vpop.f32.mrf.mxu3 }
 0x402   :  { %v2073_v5 = vadd.f32 %v6613_v18, %v6589_v21 }
 0x405   :  { %2598 = vmatmul.f32.gmra.mxu2 %v6509_v39  ;;  %v2271_v36 = vpop.f32.mrf.mxu2 }
 0x409   :  { %v6628_v19 = vpop.f32.mrf.mxu3 }
 0x40a   :  { %v2076_v59 = vadd.f32 %v6628_v19, %v6596_v28 }
 0x40d   :  { %2601 = vmatmul.f32.gmra.mxu2 %v6530_v29  ;;  %v2274_v4 = vpop.f32.mrf.mxu2 }
 0x411   :  { %v6631_v17 = vpop.f32.mrf.mxu3 }
 0x412   :  { %v2079_v21 = vadd.f32 %v6631_v17, %v6606_v38 }
 0x415   :  { %2604 = vmatmul.f32.gmra.mxu2 %v6551_v26  ;;  %v2277_v25 = vpop.f32.mrf.mxu2 }
 0x419   :  { %v6634_v9 = vpop.f32.mrf.mxu3 }
 0x41a   :  { %v2082_v28 = vadd.f32 %v6634_v9, %v6611_v43 }
 0x41d   :  { %2607 = vmatmul.f32.gmra.mxu2 %v2377_v40  ;;  %v2280_v29 = vpop.f32.mrf.mxu2  ;;  %v2067_v40 = vadd.f32 %v6601_v14, %v6577_v16 }
 0x421   :  { %v2321_v7 = vpop.f32.mrf.mxu3 }
 0x422   :  { %v2322_v39 = vadd.f32 %v2321_v7, %v2268_v23  ;;  %v6680_v23 = vpop.f32.mrf.mxu0 }
 0x424   :  { %v2358_v22 = vmax.f32 %v2049_v50, %v2322_v39 }
 0x425   :  { %2610 = vmatmul.f32.gmra.mxu2 %v2379_v44  ;;  %v2283_v49 = vpop.f32.mrf.mxu2 }
 0x426   :  { %4318 = vmatmul.msk.f32.vlgmr.msrb.gmra.mxu1 %vm2399_vm3, %v2358_v22  ;;  %4348 = vmatmul.msk.f32.vlgmr.msra.gmra.mxu3 %vm2399_vm3, %v2358_v22 }
 0x429   :  { %v2324_v0 = vpop.f32.mrf.mxu3 }
 0x42a   :  { %v2325_v13 = vadd.f32 %v2324_v0, %v2271_v36  ;;  %v6684_v17 = vpop.f32.mrf.mxu0 }
 0x42c   :  { %v2360_v55 = vmax.f32 %v2052_v61, %v2325_v13 }
 0x42d   :  { %v2286_v63 = vpop.f32.mrf.mxu2 }
 0x42e   :  { %4319 = vmatmul.msk.f32.gmra.mxu1 %vm2399_vm3, %v2360_v55  ;;  %4349 = vmatmul.msk.f32.gmra.mxu3 %vm2399_vm3, %v2360_v55 }
 0x431   :  { %v2327_v30 = vpop.f32.mrf.mxu3 }
 0x432   :  { %v2328_v51 = vadd.f32 %v2327_v30, %v2274_v4  ;;  %v6690_v7 = vpop.f32.mrf.mxu0 }
 0x434   :  { %v2362_v54 = vmax.f32 %v2055_v34, %v2328_v51 }
 0x435   :  { %v2289_v58 = vpop.f32.mrf.mxu2 }
 0x436   :  { %4320 = vmatmul.msk.f32.gmra.mxu1 %vm2399_vm3, %v2362_v54  ;;  %4350 = vmatmul.msk.f32.gmra.mxu3 %vm2399_vm3, %v2362_v54 }
 0x439   :  { %v2330_v46 = vpop.f32.mrf.mxu3 }
 0x43a   :  { %v2331_v48 = vadd.f32 %v2330_v46, %v2277_v25  ;;  %v6698_v39 = vpop.f32.mrf.mxu0 }
 0x43c   :  { %v2364_v8 = vmax.f32 %v2058_v41, %v2331_v48 }
 0x43d   :  { %v2292_v20 = vpop.f32.mrf.mxu2 }
 0x43e   :  { %4321 = vmatmul.msk.f32.gmra.mxu1 %vm2399_vm3, %v2364_v8  ;;  %4351 = vmatmul.msk.f32.gmra.mxu3 %vm2399_vm3, %v2364_v8 }
 0x441   :  { %v2333_v1 = vpop.f32.mrf.mxu3 }
 0x442   :  { %v2334_v35 = vadd.f32 %v2333_v1, %v2280_v29  ;;  %v6708_v13 = vpop.f32.mrf.mxu0 }
 0x444   :  { %v2366_v15 = vmax.f32 %v2061_v27, %v2334_v35  ;;  %v2845_v27 = vld [vmem:[#allocation6 + $0x88] sm:$0xff]  ;;  %v2844_v35 = vld [vmem:[#allocation6 + $0x80] sm:$0xff] }
 0x445   :  { %v2295_v31 = vpop.f32.mrf.mxu2  ;;  %2878 = vmatpush.msra.mxu2 %v2845_v27 }
 0x446   :  { %4322 = vmatmul.msk.f32.gmra.mxu1 %vm2399_vm3, %v2366_v15  ;;  %4352 = vmatmul.msk.f32.gmra.mxu3 %vm2399_vm3, %v2366_v15 }
 0x447   :  { %2879 = vmatpush.msra.mxu2 %v2844_v35 }
 0x449   :  { %v2336_v26 = vpop.f32.mrf.mxu3 }
 0x44a   :  { %v2337_v42 = vadd.f32 %v2336_v26, %v2283_v49  ;;  %v6718_v29 = vpop.f32.mrf.mxu0 }
 0x44c   :  { %v2368_v12 = vmax.f32 %v2064_v37, %v2337_v42 }
 0x44d   :  { %v2298_v14 = vpop.f32.mrf.mxu2 }
 0x44e   :  { %4323 = vmatmul.msk.f32.gmra.mxu1 %vm2399_vm3, %v2368_v12  ;;  %4353 = vmatmul.msk.f32.gmra.mxu3 %vm2399_vm3, %v2368_v12  ;;  %v2842_v12 = vld [vmem:[#allocation6 + $0x70] sm:$0xff] }
 0x451   :  { %v2339_v60 = vpop.f32.mrf.mxu3 }
 0x452   :  { %v2340_v2 = vadd.f32 %v2339_v60, %v2286_v63  ;;  %v6726_v48 = vpop.f32.mrf.mxu0  ;;  %v2843_v63 = vld [vmem:[#allocation6 + $0x78] sm:$0xff]  ;;  %v2840_v60 = vld [vmem:[#allocation6 + $0x60] sm:$0xff] }
 0x453   :  { %2880 = vmatpush.msra.mxu2 %v2843_v63 }
 0x454   :  { %v2370_v57 = vmax.f32 %v2067_v40, %v2340_v2  ;;  %v2839_v40 = vld [vmem:[#allocation6 + $0x58] sm:$0xff] }
 0x455   :  { %v2301_v11 = vpop.f32.mrf.mxu2  ;;  %2881 = vmatpush.msra.mxu2 %v2842_v12 }
 0x456   :  { %4324 = vmatmul.msk.f32.gmra.mxu1 %vm2399_vm3, %v2370_v57  ;;  %4354 = vmatmul.msk.f32.gmra.mxu3 %vm2399_vm3, %v2370_v57 }
 0x459   :  { %v2342_v47 = vpop.f32.mrf.mxu3 }
 0x45a   :  { %v2343_v24 = vadd.f32 %v2342_v47, %v2289_v58  ;;  %v2474_v15 = vpop.f32.mrf.mxu0  ;;  %v2841_v58 = vld [vmem:[#allocation6 + $0x68] sm:$0xff] }
 0x45b   :  { %2882 = vmatpush.msra.mxu2 %v2841_v58 }
 0x45c   :  { %v2372_v44 = vmax.f32 %v2070_v33, %v2343_v24  ;;  %v2838_v33 = vld [vmem:[#allocation6 + $0x50] sm:$0xff] }
 0x45d   :  { %v6682_v38 = vpop.f32.mrf.mxu2  ;;  %2883 = vmatpush.msra.mxu2 %v2840_v60 }
 0x45e   :  { %4325 = vmatmul.msk.f32.gmra.mxu1 %vm2399_vm3, %v2372_v44  ;;  %4355 = vmatmul.msk.f32.gmra.mxu3 %vm2399_vm3, %v2372_v44 }
 0x45f   :  { %2884 = vmatpush.msra.mxu2 %v2839_v40 }
 0x461   :  { %v2345_v56 = vpop.f32.mrf.mxu3  ;;  %2885 = vmatpush.msra.mxu2 %v2838_v33 }
 0x462   :  { %v2346_v3 = vadd.f32 %v2345_v56, %v2292_v20  ;;  %v2477_v57 = vpop.f32.mrf.mxu0  ;;  %v2837_v20 = vld [vmem:[#allocation6 + $0x48] sm:$0xff] }
 0x463   :  { %2886 = vmatpush.msra.mxu2 %v2837_v20  ;;  %v2770_v20 = vld [vmem:[#allocation4 + $0x78] sm:$0xff] }
 0x464   :  { %v2374_v16 = vmax.f32 %v2073_v5, %v2346_v3 }
 0x465   :  { %v6686_v36 = vpop.f32.mrf.mxu2 }
 0x466   :  { %4326 = vmatmul.msk.f32.gmra.mxu1 %vm2399_vm3, %v2374_v16  ;;  %4356 = vmatmul.msk.f32.gmra.mxu3 %vm2399_vm3, %v2374_v16 }
 0x469   :  { %v2348_v10 = vpop.f32.mrf.mxu3 }
 0x46a   :  { %v2349_v45 = vadd.f32 %v2348_v10, %v2295_v31  ;;  %v2480_v5 = vpop.f32.mrf.mxu0 }
 0x46c   :  { %v2376_v32 = vmax.f32 %v2076_v59, %v2349_v45 }
 0x46d   :  { %v6692_v50 = vpop.f32.mrf.mxu2 }
 0x46e   :  { %4327 = vmatmul.msk.f32.gmra.mxu1 %vm2399_vm3, %v2376_v32  ;;  %4357 = vmatmul.msk.f32.gmra.mxu3 %vm2399_vm3, %v2376_v32 }
 0x471   :  { %v2351_v52 = vpop.f32.mrf.mxu3 }
 0x472   :  { %v2352_v18 = vadd.f32 %v2351_v52, %v2298_v14  ;;  %v2483_v10 = vpop.f32.mrf.mxu0 }
 0x474   :  { %v2378_v53 = vmax.f32 %v2079_v21, %v2352_v18 }
 0x475   :  { %v6700_v22 = vpop.f32.mrf.mxu2 }
 0x476   :  { %4328 = vmatmul.msk.f32.gmra.mxu1 %vm2399_vm3, %v2378_v53  ;;  %4358 = vmatmul.msk.f32.gmra.mxu3 %vm2399_vm3, %v2378_v53 }
 0x479   :  { %v2354_v62 = vpop.f32.mrf.mxu3 }
 0x47a   :  { %v2355_v6 = vadd.f32 %v2354_v62, %v2301_v11  ;;  %v2486_v14 = vpop.f32.mrf.mxu0 }
 0x47c   :  { %v2380_v19 = vmax.f32 %v2082_v28, %v2355_v6 }
 0x47d   :  { %v6712_v30 = vpop.f32.mrf.mxu2 }
 0x47e   :  { %4329 = vmatmul.msk.f32.gmra.mxu1 %vm2399_vm3, %v2380_v19  ;;  %4359 = vmatmul.msk.f32.gmra.mxu3 %vm2399_vm3, %v2380_v19 }
 0x485   :  { %v6720_v54 = vpop.f32.mrf.mxu2 }
 0x48d   :  { %v2596_v8 = vpop.f32.mrf.mxu2 }
 0x495   :  { %v2599_v26 = vpop.f32.mrf.mxu2 }
 0x49d   :  { %v2602_v24 = vpop.f32.mrf.mxu2 }
 0x4a3   :  { %v6688_v4 = vpop.f32.mrf.mxu1 }
 0x4a5   :  { %v2605_v3 = vpop.f32.mrf.mxu2 }
 0x4a9   :  { %v6694_v43 = vpop.f32.mrf.mxu3 }
 0x4ab   :  { %v6696_v9 = vpop.f32.mrf.mxu1 }
 0x4ad   :  { %v2608_v59 = vpop.f32.mrf.mxu2 }
 0x4b1   :  { %v6702_v25 = vpop.f32.mrf.mxu3 }
 0x4b3   :  { %v6704_v0 = vpop.f32.mrf.mxu1 }
 0x4b5   :  { %v2611_v52 = vpop.f32.mrf.mxu2 }
 0x4b9   :  { %v6706_v61 = vpop.f32.mrf.mxu3 }
 0x4bb   :  { %v6710_v55 = vpop.f32.mrf.mxu1 }
 0x4c1   :  { %v6714_v34 = vpop.f32.mrf.mxu3 }
 0x4c3   :  { %v6716_v51 = vpop.f32.mrf.mxu1 }
 0x4c9   :  { %v6722_v46 = vpop.f32.mrf.mxu3 }
 0x4cb   :  { %v6724_v41 = vpop.f32.mrf.mxu1 }
 0x4d1   :  { %v6728_v49 = vpop.f32.mrf.mxu3 }
 0x4d3   :  { %v6730_v1 = vpop.f32.mrf.mxu1 }
 0x4d9   :  { %v2649_v37 = vpop.f32.mrf.mxu3 }
 0x4da   :  { %v2650_v60 = vadd.f32 %v2649_v37, %v2596_v8  ;;  %v2644_v8 = vadd.f32 %v6722_v46, %v6712_v30  ;;  %v2638_v30 = vadd.f32 %v6706_v61, %v6692_v50  ;;  %v2632_v50 = vadd.f32 %v6694_v43, %v6682_v38  ;;  %v2763_v38 = vld [vmem:[#allocation4 + $0x40] sm:$0xff]  ;;  %v2765_v43 = vld [vmem:[#allocation4 + $0x50] sm:$0xff] }
 0x4db   :  { %v2527_v42 = vpop.f32.mrf.mxu1 }
 0x4dc   :  { %v2528_v40 = vadd.f32 %v2527_v42, %v2474_v15  ;;  %v2522_v15 = vadd.f32 %v6724_v41, %v6718_v29  ;;  %v2516_v29 = vadd.f32 %v6710_v55, %v6698_v39  ;;  %v2510_v39 = vadd.f32 %v6696_v9, %v6684_v17  ;;  %v2679_v17 = vld [vmem:[#allocation4] sm:$0xff]  ;;  %v2681_v9 = vld [vmem:[#allocation4 + $0x10] sm:$0xff]  ;;  %v2682_v55 = vld [vmem:[#allocation4 + $0x18] sm:$0xff] }
 0x4dd   :  { %v2683_v41 = vld [vmem:[#allocation4 + $0x20] sm:$0xff]  ;;  %v2684_v42 = vld [vmem:[#allocation4 + $0x28] sm:$0xff] }
 0x4e1   :  { %v2652_v2 = vpop.f32.mrf.mxu3 }
 0x4e2   :  { %v2653_v63 = vadd.f32 %v2652_v2, %v2599_v26  ;;  %v2647_v26 = vadd.f32 %v6728_v49, %v6720_v54  ;;  %v2525_v2 = vadd.f32 %v6730_v1, %v6726_v48  ;;  %v2641_v54 = vadd.f32 %v6714_v34, %v6700_v22  ;;  %v2768_v1 = vld [vmem:[#allocation4 + $0x68] sm:$0xff] }
 0x4e3   :  { %v2530_v47 = vpop.f32.mrf.mxu1  ;;  %v2519_v48 = vadd.f32 %v6716_v51, %v6708_v13  ;;  %v2635_v22 = vadd.f32 %v6702_v25, %v6686_v36  ;;  %v2513_v13 = vadd.f32 %v6704_v0, %v6690_v7  ;;  %v2507_v36 = vadd.f32 %v6688_v4, %v6680_v23  ;;  %v2764_v23 = vld [vmem:[#allocation4 + $0x48] sm:$0xff]  ;;  %v2766_v0 = vld [vmem:[#allocation4 + $0x58] sm:$0xff]  ;;  %v2767_v51 = vld [vmem:[#allocation4 + $0x60] sm:$0xff] }
 0x4e4   :  { %v2531_v12 = vadd.f32 %v2530_v47, %v2477_v57  ;;  %v6753_v57 = vmax.f32 %v2528_v40, %v2653_v63  ;;  %v6762_v37 = vmax.f32 %v2525_v2, %v2650_v60  ;;  %v6771_v49 = vmax.f32 %v2522_v15, %v2647_v26  ;;  %v2680_v4 = vld [vmem:[#allocation4 + $0x8] sm:$0xff]  ;;  %v2769_v47 = vld [vmem:[#allocation4 + $0x70] sm:$0xff]  ;;  %v3058_v40 = vld [vmem:[#allocation6 + $0xc0] sm:$0xff] }
 0x4e5   :  { %v6780_v46 = vmax.f32 %v2519_v48, %v2644_v8  ;;  %v6789_v34 = vmax.f32 %v2516_v29, %v2641_v54  ;;  %v2669_v61 = vmax.f32 %v2513_v13, %v2638_v30  ;;  %v2668_v7 = vmax.f32 %v2510_v39, %v2635_v22  ;;  %v3059_v60 = vld [vmem:[#allocation6 + $0xc8] sm:$0xff]  ;;  %v3057_v26 = vld [vmem:[#allocation6 + $0xb8] sm:$0xff]  ;;  %v3056_v2 = vld [vmem:[#allocation6 + $0xb0] sm:$0xff] }
 0x4e6   :  { %v2667_v25 = vmax.f32 %v2507_v36, %v2632_v50  ;;  %v3055_v8 = vld [vmem:[#allocation6 + $0xa8] sm:$0xff]  ;;  %v3054_v15 = vld [vmem:[#allocation6 + $0xa0] sm:$0xff]  ;;  %v3053_v54 = vld [vmem:[#allocation6 + $0x98] sm:$0xff] }
 0x4e7   :  { %v3052_v48 = vld [vmem:[#allocation6 + $0x90] sm:$0xff]  ;;  %v3292_v29 = vld [vmem:[#allocation4 + $0x100] sm:$0xff]  ;;  %v3293_v13 = vld [vmem:[#allocation4 + $0x108] sm:$0xff] }
 0x4e8   :  { %v3294_v39 = vld [vmem:[#allocation4 + $0x110] sm:$0xff]  ;;  %v3135_v36 = vld [vmem:[#allocation4 + $0xc0] sm:$0xff] }
 0x4e9   :  { %v2655_v44 = vpop.f32.mrf.mxu3 }
 0x4ea   :  { %v2656_v19 = vadd.f32 %v2655_v44, %v2602_v24  ;;  %v2685_v24 = vld [vmem:[#allocation4 + $0x30] sm:$0xff]  ;;  %v2686_v44 = vld [vmem:[#allocation4 + $0x38] sm:$0xff] }
 0x4eb   :  { %v2533_v56 = vpop.f32.mrf.mxu1 }
 0x4ec   :  { %v2534_v27 = vadd.f32 %v2533_v56, %v2480_v5  ;;  %v6744_v33 = vmax.f32 %v2531_v12, %v2656_v19  ;;  %v2978_v56 = vld [vmem:[#allocation4 + $0x80] sm:$0xff]  ;;  %v2979_v5 = vld [vmem:[#allocation4 + $0x88] sm:$0xff] }
 0x4f1   :  { %v2658_v16 = vpop.f32.mrf.mxu3 }
 0x4f2   :  { %v2659_v62 = vadd.f32 %v2658_v16, %v2605_v3  ;;  %v2761_v3 = vld [vmem:[#allocation6 + $0x40] sm:$0xff]  ;;  %v2980_v16 = vld [vmem:[#allocation4 + $0x90] sm:$0xff] }
 0x4f3   :  { %v2536_v31 = vpop.f32.mrf.mxu1  ;;  %2943 = vmatpush.msrb.mxu3 %v2761_v3 }
 0x4f4   :  { %v2537_v28 = vadd.f32 %v2536_v31, %v2483_v10  ;;  %v6739_v58 = vmax.f32 %v2534_v27, %v2659_v62  ;;  %v2760_v31 = vld [vmem:[#allocation6 + $0x38] sm:$0xff]  ;;  %v2759_v10 = vld [vmem:[#allocation6 + $0x30] sm:$0xff] }
 0x4f5   :  { %2944 = vmatpush.msrb.mxu3 %v2760_v31  ;;  %v2984_v62 = vld [vmem:[#allocation4 + $0xb0] sm:$0xff] }
 0x4f7   :  { %2945 = vmatpush.msrb.mxu3 %v2759_v10 }
 0x4f9   :  { %v2661_v45 = vpop.f32.mrf.mxu3 }
 0x4fa   :  { %v2662_v18 = vadd.f32 %v2661_v45, %v2608_v59  ;;  %v2758_v59 = vld [vmem:[#allocation6 + $0x28] sm:$0xff]  ;;  %v2757_v45 = vld [vmem:[#allocation6 + $0x20] sm:$0xff] }
 0x4fb   :  { %v2539_v32 = vpop.f32.mrf.mxu1  ;;  %2946 = vmatpush.msrb.mxu3 %v2758_v59 }
 0x4fc   :  { %v2540_v53 = vadd.f32 %v2539_v32, %v2486_v14  ;;  %v6734_v35 = vmax.f32 %v2537_v28, %v2662_v18  ;;  %v2981_v32 = vld [vmem:[#allocation4 + $0x98] sm:$0xff]  ;;  %v2753_v18 = vld [vmem:[#allocation6] sm:$0xff] }
 0x4fd   :  { %2947 = vmatpush.msrb.mxu3 %v2757_v45  ;;  %v2756_v14 = vld [vmem:[#allocation6 + $0x18] sm:$0xff] }
 0x4fe   :  { %v2985_v28 = vld [vmem:[#allocation4 + $0xb8] sm:$0xff] }
 0x4ff   :  { %2948 = vmatpush.msrb.mxu3 %v2756_v14  ;;  %v3217_v45 = vld [vmem:[#allocation6 + $0x118] sm:$0xff]  ;;  %v3215_v14 = vld [vmem:[#allocation6 + $0x108] sm:$0xff] }
 0x501   :  { %v2664_v21 = vpop.f32.mrf.mxu3 }
 0x502   :  { %v2665_v11 = vadd.f32 %v2664_v21, %v2611_v52  ;;  %v2755_v52 = vld [vmem:[#allocation6 + $0x10] sm:$0xff]  ;;  %v2754_v21 = vld [vmem:[#allocation6 + $0x8] sm:$0xff] }
 0x503   :  { %2949 = vmatpush.msrb.mxu3 %v2755_v52 }
 0x504   :  { %v6732_v6 = vmax.f32 %v2540_v53, %v2665_v11  ;;  %v2982_v53 = vld [vmem:[#allocation4 + $0xa0] sm:$0xff]  ;;  %v2983_v11 = vld [vmem:[#allocation4 + $0xa8] sm:$0xff] }
 0x505   :  { %2950 = vmatpush.msrb.mxu3 %v2754_v21  ;;  %v3214_v21 = vld [vmem:[#allocation6 + $0x100] sm:$0xff] }
 0x506   :  { %2716 = vmatpush.msrb.mxu0 %v6732_v6  ;;  %2799 = vmatpush.msra.mxu1 %v6732_v6 }
 0x507   :  { %3171 = vmatpush.msrb.mxu2 %v6732_v6  ;;  %2951 = vmatpush.msrb.mxu3 %v2753_v18 }
 0x508   :  { %2717 = vmatpush.msrb.mxu0 %v6734_v35  ;;  %2800 = vmatpush.msra.mxu1 %v6734_v35 }
 0x509   :  { %3172 = vmatpush.msrb.mxu2 %v6734_v35  ;;  %3249 = vmatpush.msra.mxu3 %v3217_v45 }
 0x50a   :  { %2718 = vmatpush.msrb.mxu0 %v6739_v58  ;;  %2801 = vmatpush.msra.mxu1 %v6739_v58 }
 0x50b   :  { %3173 = vmatpush.msrb.mxu2 %v6739_v58 }
 0x50c   :  { %2719 = vmatpush.msrb.mxu0 %v6744_v33  ;;  %2802 = vmatpush.msra.mxu1 %v6744_v33 }
 0x50d   :  { %3174 = vmatpush.msrb.mxu2 %v6744_v33 }
 0x50e   :  { %2720 = vmatpush.msrb.mxu0 %v6753_v57  ;;  %2803 = vmatpush.msra.mxu1 %v6753_v57 }
 0x50f   :  { %3175 = vmatpush.msrb.mxu2 %v6753_v57 }
 0x510   :  { %2721 = vmatpush.msrb.mxu0 %v6762_v37  ;;  %2804 = vmatpush.msra.mxu1 %v6762_v37 }
 0x511   :  { %3176 = vmatpush.msrb.mxu2 %v6762_v37 }
 0x512   :  { %2722 = vmatpush.msrb.mxu0 %v6771_v49  ;;  %2805 = vmatpush.msra.mxu1 %v6771_v49 }
 0x513   :  { %3177 = vmatpush.msrb.mxu2 %v6771_v49 }
 0x514   :  { %2723 = vmatpush.msrb.mxu0 %v6780_v46  ;;  %2806 = vmatpush.msra.mxu1 %v6780_v46 }
 0x515   :  { %3178 = vmatpush.msrb.mxu2 %v6780_v46 }
 0x516   :  { %2724 = vmatpush.msrb.mxu0 %v6789_v34  ;;  %2807 = vmatpush.msra.mxu1 %v6789_v34 }
 0x517   :  { %3179 = vmatpush.msrb.mxu2 %v6789_v34 }
 0x518   :  { %2725 = vmatpush.msrb.mxu0 %v2669_v61  ;;  %2808 = vmatpush.msra.mxu1 %v2669_v61 }
 0x519   :  { %3180 = vmatpush.msrb.mxu2 %v2669_v61 }
 0x51a   :  { %2726 = vmatpush.msrb.mxu0 %v2668_v7  ;;  %2809 = vmatpush.msra.mxu1 %v2668_v7 }
 0x51b   :  { %3181 = vmatpush.msrb.mxu2 %v2668_v7 }
 0x51c   :  { %2727 = vmatpush.msrb.mxu0 %v2667_v25  ;;  %2810 = vmatpush.msra.mxu1 %v2667_v25 }
 0x51d   :  { %3182 = vmatpush.msrb.mxu2 %v2667_v25  ;;  %4368 = vmatmul.msk.f32.vlgmr.msra.gmra.mxu1 %vm2687_vm4, %v2763_v38  ;;  %v3136_v38 = vld [vmem:[#allocation4 + $0xc8] sm:$0xff] }
 0x51e   :  { %3014 = vmatpush.msra.mxu0 %v6732_v6 }
 0x51f   :  { %4360 = vmatmul.msk.f32.vlgmr.msrb.gmra.mxu0 %vm2687_vm4, %v2679_v17  ;;  %v3296_v17 = vld [vmem:[#allocation4 + $0x120] sm:$0xff] }
 0x520   :  { %3015 = vmatpush.msra.mxu0 %v6734_v35 }
 0x522   :  { %3016 = vmatpush.msra.mxu0 %v6739_v58 }
 0x524   :  { %3017 = vmatpush.msra.mxu0 %v6744_v33 }
 0x525   :  { %4369 = vmatmul.msk.f32.gmra.mxu1 %vm2687_vm4, %v2764_v23 }
 0x526   :  { %3018 = vmatpush.msra.mxu0 %v6753_v57 }
 0x527   :  { %4361 = vmatmul.msk.f32.gmra.mxu0 %vm2687_vm4, %v2680_v4  ;;  %v3137_v4 = vld [vmem:[#allocation4 + $0xd0] sm:$0xff] }
 0x528   :  { %3019 = vmatpush.msra.mxu0 %v6762_v37 }
 0x52a   :  { %3020 = vmatpush.msra.mxu0 %v6771_v49 }
 0x52c   :  { %3021 = vmatpush.msra.mxu0 %v6780_v46 }
 0x52d   :  { %4370 = vmatmul.msk.f32.gmra.mxu1 %vm2687_vm4, %v2765_v43  ;;  %v3297_v43 = vld [vmem:[#allocation4 + $0x128] sm:$0xff] }
 0x52e   :  { %3022 = vmatpush.msra.mxu0 %v6789_v34 }
 0x52f   :  { %4362 = vmatmul.msk.f32.gmra.mxu0 %vm2687_vm4, %v2681_v9 }
 0x530   :  { %3023 = vmatpush.msra.mxu0 %v2669_v61 }
 0x532   :  { %3024 = vmatpush.msra.mxu0 %v2668_v7 }
 0x534   :  { %3025 = vmatpush.msra.mxu0 %v2667_v25 }
 0x535   :  { %4371 = vmatmul.msk.f32.gmra.mxu1 %vm2687_vm4, %v2766_v0  ;;  %v3138_v0 = vld [vmem:[#allocation4 + $0xd8] sm:$0xff] }
 0x536   :  { %3328 = vmatpush.msrb.mxu0 %v6732_v6 }
 0x537   :  { %4363 = vmatmul.msk.f32.gmra.mxu0 %vm2687_vm4, %v2682_v55  ;;  %v3298_v55 = vld [vmem:[#allocation4 + $0x130] sm:$0xff] }
 0x538   :  { %3329 = vmatpush.msrb.mxu0 %v6734_v35 }
 0x53a   :  { %3330 = vmatpush.msrb.mxu0 %v6739_v58  ;;  %v3060_v58 = vld [vmem:[#allocation6 + $0xd0] sm:$0xff] }
 0x53b   :  { %3092 = vmatpush.msrb.mxu1 %v3060_v58 }
 0x53c   :  { %3331 = vmatpush.msrb.mxu0 %v6744_v33 }
 0x53d   :  { %4372 = vmatmul.msk.f32.gmra.mxu1 %vm2687_vm4, %v2767_v51 }
 0x53e   :  { %3332 = vmatpush.msrb.mxu0 %v6753_v57  ;;  %3093 = vmatpush.msrb.mxu1 %v3059_v60  ;;  %v3209_v60 = vld [vmem:[#allocation6 + $0xd8] sm:$0xff] }
 0x53f   :  { %4364 = vmatmul.msk.f32.gmra.mxu0 %vm2687_vm4, %v2683_v41  ;;  %v3139_v41 = vld [vmem:[#allocation4 + $0xe0] sm:$0xff] }
 0x540   :  { %3333 = vmatpush.msrb.mxu0 %v6762_v37  ;;  %3094 = vmatpush.msrb.mxu1 %v3058_v40  ;;  %v3370_v40 = vld [vmem:[#allocation6 + $0x140] sm:$0xff] }
 0x542   :  { %3334 = vmatpush.msrb.mxu0 %v6771_v49  ;;  %3095 = vmatpush.msrb.mxu1 %v3057_v26  ;;  %v3368_v26 = vld [vmem:[#allocation6 + $0x130] sm:$0xff] }
 0x544   :  { %3335 = vmatpush.msrb.mxu0 %v6780_v46  ;;  %3096 = vmatpush.msrb.mxu1 %v3056_v2 }
 0x545   :  { %4373 = vmatmul.msk.f32.gmra.mxu1 %vm2687_vm4, %v2768_v1 }
 0x546   :  { %3336 = vmatpush.msrb.mxu0 %v6789_v34  ;;  %3097 = vmatpush.msrb.mxu1 %v3055_v8 }
 0x547   :  { %4365 = vmatmul.msk.f32.gmra.mxu0 %vm2687_vm4, %v2684_v42  ;;  %v3299_v42 = vld [vmem:[#allocation4 + $0x138] sm:$0xff] }
 0x548   :  { %3337 = vmatpush.msrb.mxu0 %v2669_v61  ;;  %3098 = vmatpush.msrb.mxu1 %v3054_v15 }
 0x54a   :  { %3338 = vmatpush.msrb.mxu0 %v2668_v7  ;;  %3099 = vmatpush.msrb.mxu1 %v3053_v54  ;;  %v3295_v7 = vld [vmem:[#allocation4 + $0x118] sm:$0xff]  ;;  %v3366_v54 = vld [vmem:[#allocation6 + $0x120] sm:$0xff] }
 0x54c   :  { %3339 = vmatpush.msrb.mxu0 %v2667_v25  ;;  %3100 = vmatpush.msrb.mxu1 %v3052_v48 }
 0x54d   :  { %4374 = vmatmul.msk.f32.gmra.mxu1 %vm2687_vm4, %v2769_v47  ;;  %v3140_v47 = vld [vmem:[#allocation4 + $0xe8] sm:$0xff] }
 0x54f   :  { %4366 = vmatmul.msk.f32.gmra.mxu0 %vm2687_vm4, %v2685_v24 }
 0x555   :  { %4375 = vmatmul.msk.f32.gmra.mxu1 %vm2687_vm4, %v2770_v20  ;;  %v3141_v20 = vld [vmem:[#allocation4 + $0xf0] sm:$0xff] }
 0x557   :  { %4367 = vmatmul.msk.f32.gmra.mxu0 %vm2687_vm4, %v2686_v44 }
 0x55f   :  { %4392 = vmatmul.msk.f32.vlgmr.msra.gmra.mxu0 %vm2687_vm4, %v2978_v56  ;;  %v3142_v56 = vld [vmem:[#allocation4 + $0xf8] sm:$0xff] }
 0x567   :  { %4393 = vmatmul.msk.f32.gmra.mxu0 %vm2687_vm4, %v2979_v5 }
 0x56f   :  { %4394 = vmatmul.msk.f32.gmra.mxu0 %vm2687_vm4, %v2980_v16 }
 0x577   :  { %4395 = vmatmul.msk.f32.gmra.mxu0 %vm2687_vm4, %v2981_v32  ;;  %v3216_v32 = vld [vmem:[#allocation6 + $0x110] sm:$0xff] }
 0x578   :  { %3250 = vmatpush.msra.mxu3 %v3216_v32 }
 0x57a   :  { %3251 = vmatpush.msra.mxu3 %v3215_v14 }
 0x57c   :  { %3252 = vmatpush.msra.mxu3 %v3214_v21 }
 0x57f   :  { %4396 = vmatmul.msk.f32.gmra.mxu0 %vm2687_vm4, %v2982_v53  ;;  %v3213_v53 = vld [vmem:[#allocation6 + $0xf8] sm:$0xff] }
 0x580   :  { %3253 = vmatpush.msra.mxu3 %v3213_v53 }
 0x587   :  { %4397 = vmatmul.msk.f32.gmra.mxu0 %vm2687_vm4, %v2983_v11  ;;  %v3374_v11 = vld [vmem:[#allocation6 + $0x160] sm:$0xff] }
 0x588   :  { %3406 = vmatpush.msra.mxu1 %v3374_v11 }
 0x58f   :  { %4398 = vmatmul.msk.f32.gmra.mxu0 %vm2687_vm4, %v2984_v62  ;;  %v3212_v62 = vld [vmem:[#allocation6 + $0xf0] sm:$0xff] }
 0x590   :  { %3254 = vmatpush.msra.mxu3 %v3212_v62 }
 0x597   :  { %4399 = vmatmul.msk.f32.gmra.mxu0 %vm2687_vm4, %v2985_v28  ;;  %v3373_v28 = vld [vmem:[#allocation6 + $0x158] sm:$0xff] }
 0x598   :  { %3407 = vmatpush.msra.mxu1 %v3373_v28 }
 0x59a   :  { %v2812_v6 = vpop.f32.mrf.mxu1 }
 0x59b   :  { %4376 = vmatmul.msk.f32.vlgmr.msra.gmra.mxu2 %vm2846_vm5, %v2812_v6  ;;  %v3211_v6 = vld [vmem:[#allocation6 + $0xe8] sm:$0xff] }
 0x59c   :  { %v2729_v19 = vpop.f32.mrf.mxu0  ;;  %3255 = vmatpush.msra.mxu3 %v3211_v6 }
 0x59d   :  { %4384 = vmatmul.msk.f32.vlgmr.msrb.gmra.mxu3 %vm2846_vm5, %v2729_v19  ;;  %v3372_v19 = vld [vmem:[#allocation6 + $0x150] sm:$0xff] }
 0x59e   :  { %3408 = vmatpush.msra.mxu1 %v3372_v19 }
 0x59f   :  { %4424 = vmatmul.msk.f32.vlgmr.msrb.gmra.mxu0 %vm2687_vm4, %v3292_v29 }
 0x5a2   :  { %v2815_v27 = vpop.f32.mrf.mxu1 }
 0x5a3   :  { %4377 = vmatmul.msk.f32.gmra.mxu2 %vm2846_vm5, %v2815_v27 }
 0x5a4   :  { %v2732_v35 = vpop.f32.mrf.mxu0 }
 0x5a5   :  { %4385 = vmatmul.msk.f32.gmra.mxu3 %vm2846_vm5, %v2732_v35  ;;  %v3210_v35 = vld [vmem:[#allocation6 + $0xe0] sm:$0xff] }
 0x5a6   :  { %3256 = vmatpush.msra.mxu3 %v3210_v35 }
 0x5a7   :  { %4425 = vmatmul.msk.f32.gmra.mxu0 %vm2687_vm4, %v3293_v13 }
 0x5a8   :  { %3257 = vmatpush.msra.mxu3 %v3209_v60 }
 0x5aa   :  { %v2818_v63 = vpop.f32.mrf.mxu1 }
 0x5ab   :  { %4378 = vmatmul.msk.f32.gmra.mxu2 %vm2846_vm5, %v2818_v63  ;;  %v3371_v63 = vld [vmem:[#allocation6 + $0x148] sm:$0xff] }
 0x5ac   :  { %v2735_v12 = vpop.f32.mrf.mxu0  ;;  %3409 = vmatpush.msra.mxu1 %v3371_v63 }
 0x5ad   :  { %4386 = vmatmul.msk.f32.gmra.mxu3 %vm2846_vm5, %v2735_v12 }
 0x5ae   :  { %3410 = vmatpush.msra.mxu1 %v3370_v40 }
 0x5af   :  { %4426 = vmatmul.msk.f32.gmra.mxu0 %vm2687_vm4, %v3294_v39 }
 0x5b2   :  { %v2821_v33 = vpop.f32.mrf.mxu1 }
 0x5b3   :  { %4379 = vmatmul.msk.f32.gmra.mxu2 %vm2846_vm5, %v2821_v33  ;;  %v3369_v33 = vld [vmem:[#allocation6 + $0x138] sm:$0xff] }
 0x5b4   :  { %v2738_v57 = vpop.f32.mrf.mxu0  ;;  %3411 = vmatpush.msra.mxu1 %v3369_v33 }
 0x5b5   :  { %4387 = vmatmul.msk.f32.gmra.mxu3 %vm2846_vm5, %v2738_v57  ;;  %v3367_v57 = vld [vmem:[#allocation6 + $0x128] sm:$0xff] }
 0x5b6   :  { %3412 = vmatpush.msra.mxu1 %v3368_v26 }
 0x5b7   :  { %4427 = vmatmul.msk.f32.gmra.mxu0 %vm2687_vm4, %v3295_v7 }
 0x5b8   :  { %3413 = vmatpush.msra.mxu1 %v3367_v57 }
 0x5ba   :  { %v2824_v37 = vpop.f32.mrf.mxu1  ;;  %3414 = vmatpush.msra.mxu1 %v3366_v54 }
 0x5bb   :  { %4380 = vmatmul.msk.f32.gmra.mxu2 %vm2846_vm5, %v2824_v37 }
 0x5bc   :  { %v2741_v49 = vpop.f32.mrf.mxu0 }
 0x5bd   :  { %4388 = vmatmul.msk.f32.gmra.mxu3 %vm2846_vm5, %v2741_v49 }
 0x5bf   :  { %4428 = vmatmul.msk.f32.gmra.mxu0 %vm2687_vm4, %v3296_v17 }
 0x5c2   :  { %v2827_v30 = vpop.f32.mrf.mxu1 }
 0x5c3   :  { %4381 = vmatmul.msk.f32.gmra.mxu2 %vm2846_vm5, %v2827_v30 }
 0x5c4   :  { %v2744_v46 = vpop.f32.mrf.mxu0 }
 0x5c5   :  { %4389 = vmatmul.msk.f32.gmra.mxu3 %vm2846_vm5, %v2744_v46 }
 0x5c7   :  { %4429 = vmatmul.msk.f32.gmra.mxu0 %vm2687_vm4, %v3297_v43 }
 0x5ca   :  { %v2830_v22 = vpop.f32.mrf.mxu1 }
 0x5cb   :  { %4382 = vmatmul.msk.f32.gmra.mxu2 %vm2846_vm5, %v2830_v22 }
 0x5cc   :  { %v2747_v34 = vpop.f32.mrf.mxu0 }
 0x5cd   :  { %4390 = vmatmul.msk.f32.gmra.mxu3 %vm2846_vm5, %v2747_v34 }
 0x5cf   :  { %4430 = vmatmul.msk.f32.gmra.mxu0 %vm2687_vm4, %v3298_v55 }
 0x5d2   :  { %v2833_v50 = vpop.f32.mrf.mxu1 }
 0x5d3   :  { %4383 = vmatmul.msk.f32.gmra.mxu2 %vm2846_vm5, %v2833_v50 }
 0x5d4   :  { %v2750_v61 = vpop.f32.mrf.mxu0 }
 0x5d5   :  { %4391 = vmatmul.msk.f32.gmra.mxu3 %vm2846_vm5, %v2750_v61 }
 0x5d7   :  { %4431 = vmatmul.msk.f32.gmra.mxu0 %vm2687_vm4, %v3299_v42 }
 0x5db   :  { %4408 = vmatmul.msk.f32.vlgmr.msrb.gmra.mxu2 %vm2687_vm4, %v3135_v36 }
 0x5dc   :  { %v3027_v25 = vpop.f32.mrf.mxu0 }
 0x5dd   :  { %4400 = vmatmul.msk.f32.vlgmr.msrb.gmra.mxu1 %vm2846_vm5, %v3027_v25 }
 0x5e3   :  { %4409 = vmatmul.msk.f32.gmra.mxu2 %vm2687_vm4, %v3136_v38 }
 0x5e4   :  { %v3030_v23 = vpop.f32.mrf.mxu0 }
 0x5e5   :  { %4401 = vmatmul.msk.f32.gmra.mxu1 %vm2846_vm5, %v3030_v23 }
 0x5eb   :  { %4410 = vmatmul.msk.f32.gmra.mxu2 %vm2687_vm4, %v3137_v4 }
 0x5ec   :  { %v3033_v9 = vpop.f32.mrf.mxu0 }
 0x5ed   :  { %4402 = vmatmul.msk.f32.gmra.mxu1 %vm2846_vm5, %v3033_v9 }
 0x5f3   :  { %4411 = vmatmul.msk.f32.gmra.mxu2 %vm2687_vm4, %v3138_v0 }
 0x5f4   :  { %v3036_v51 = vpop.f32.mrf.mxu0 }
 0x5f5   :  { %4403 = vmatmul.msk.f32.gmra.mxu1 %vm2846_vm5, %v3036_v51 }
 0x5fb   :  { %4412 = vmatmul.msk.f32.gmra.mxu2 %vm2687_vm4, %v3139_v41 }
 0x5fc   :  { %v3039_v1 = vpop.f32.mrf.mxu0 }
 0x5fd   :  { %4404 = vmatmul.msk.f32.gmra.mxu1 %vm2846_vm5, %v3039_v1 }
 0x603   :  { %4413 = vmatmul.msk.f32.gmra.mxu2 %vm2687_vm4, %v3140_v47 }
 0x604   :  { %v3042_v24 = vpop.f32.mrf.mxu0 }
 0x605   :  { %4405 = vmatmul.msk.f32.gmra.mxu1 %vm2846_vm5, %v3042_v24 }
 0x60b   :  { %4414 = vmatmul.msk.f32.gmra.mxu2 %vm2687_vm4, %v3141_v20 }
 0x60c   :  { %v3045_v44 = vpop.f32.mrf.mxu0 }
 0x60d   :  { %4406 = vmatmul.msk.f32.gmra.mxu1 %vm2846_vm5, %v3045_v44 }
 0x613   :  { %4415 = vmatmul.msk.f32.gmra.mxu2 %vm2687_vm4, %v3142_v56 }
 0x614   :  { %v3048_v5 = vpop.f32.mrf.mxu0 }
 0x615   :  { %4407 = vmatmul.msk.f32.gmra.mxu1 %vm2846_vm5, %v3048_v5 }
 0x61c   :  { %v3341_v37 = vpop.f32.mrf.mxu0 }
 0x61d   :  { %4432 = vmatmul.msk.f32.vlgmr.msra.gmra.mxu1 %vm2846_vm5, %v3341_v37 }
 0x61e   :  { %v6885_v3 = vpop.f32.mrf.mxu2 }
 0x620   :  { %v6887_v16 = vpop.f32.mrf.mxu3 }
 0x624   :  { %v3344_v29 = vpop.f32.mrf.mxu0 }
 0x625   :  { %4433 = vmatmul.msk.f32.gmra.mxu1 %vm2846_vm5, %v3344_v29 }
 0x626   :  { %v6889_v31 = vpop.f32.mrf.mxu2 }
 0x628   :  { %v6891_v10 = vpop.f32.mrf.mxu3 }
 0x62c   :  { %v3347_v34 = vpop.f32.mrf.mxu0 }
 0x62d   :  { %4434 = vmatmul.msk.f32.gmra.mxu1 %vm2846_vm5, %v3347_v34 }
 0x62e   :  { %v6893_v59 = vpop.f32.mrf.mxu2 }
 0x630   :  { %v2959_v52 = vpop.f32.mrf.mxu3 }
 0x631   :  { %v2960_v38 = vadd.f32 %v2959_v52, %v6893_v59 }
 0x634   :  { %v3350_v61 = vpop.f32.mrf.mxu0 }
 0x635   :  { %4435 = vmatmul.msk.f32.gmra.mxu1 %vm2846_vm5, %v3350_v61 }
 0x636   :  { %v2897_v18 = vpop.f32.mrf.mxu2 }
 0x638   :  { %v2962_v27 = vpop.f32.mrf.mxu3 }
 0x639   :  { %v2963_v12 = vadd.f32 %v2962_v27, %v2897_v18  ;;  %v2954_v18 = vadd.f32 %v6887_v16, %v6885_v3 }
 0x63c   :  { %v3353_v25 = vpop.f32.mrf.mxu0 }
 0x63d   :  { %4436 = vmatmul.msk.f32.gmra.mxu1 %vm2846_vm5, %v3353_v25 }
 0x63e   :  { %v2900_v58 = vpop.f32.mrf.mxu2 }
 0x640   :  { %v2965_v2 = vpop.f32.mrf.mxu3 }
 0x641   :  { %v2966_v8 = vadd.f32 %v2965_v2, %v2900_v58 }
 0x644   :  { %v3356_v43 = vpop.f32.mrf.mxu0 }
 0x645   :  { %4437 = vmatmul.msk.f32.gmra.mxu1 %vm2846_vm5, %v3356_v43 }
 0x646   :  { %v2903_v15 = vpop.f32.mrf.mxu2 }
 0x648   :  { %v2968_v48 = vpop.f32.mrf.mxu3 }
 0x649   :  { %v2969_v49 = vadd.f32 %v2968_v48, %v2903_v15 }
 0x64c   :  { %v3359_v51 = vpop.f32.mrf.mxu0 }
 0x64d   :  { %4438 = vmatmul.msk.f32.gmra.mxu1 %vm2846_vm5, %v3359_v51 }
 0x64e   :  { %v2906_v30 = vpop.f32.mrf.mxu2 }
 0x650   :  { %v2971_v46 = vpop.f32.mrf.mxu3 }
 0x651   :  { %v2972_v22 = vadd.f32 %v2971_v46, %v2906_v30  ;;  %v4516_v30 = vld [vmem:[%s7194_s7] ss:$0 sm:$0xff] }
 0x654   :  { %v3362_v47 = vpop.f32.mrf.mxu0 }
 0x655   :  { %4439 = vmatmul.msk.f32.gmra.mxu1 %vm2846_vm5, %v3362_v47 }
 0x656   :  { %v2909_v13 = vpop.f32.mrf.mxu2 }
 0x658   :  { %v2974_v52 = vpop.f32.mrf.mxu3 }
 0x659   :  { %v2975_v2 = vadd.f32 %v2974_v52, %v2909_v13  ;;  %v4460_v52 = vld [vmem:[%s7196_s9 + $0xa0] sm:$0xff] }
 0x65a   :  { %v3102_v50 = vpop.f32.mrf.mxu1 }
 0x65b   :  { %v3126_v53 = vadd.f32 %v3102_v50, %v2954_v18  ;;  %v3515_v18 = vld [vmem:[#allocation7 + $0x28] sm:$0xff] }
 0x65e   :  { %v3184_v39 = vpop.f32.mrf.mxu2 }
 0x65f   :  { %4416 = vmatmul.msk.f32.vlgmr.msra.gmra.mxu3 %vm2846_vm5, %v3184_v39 }
 0x662   :  { %v6900_v36 = vpop.f32.mrf.mxu1 }
 0x666   :  { %v3187_v7 = vpop.f32.mrf.mxu2 }
 0x667   :  { %4417 = vmatmul.msk.f32.gmra.mxu3 %vm2846_vm5, %v3187_v7 }
 0x66a   :  { %v3108_v17 = vpop.f32.mrf.mxu1 }
 0x66b   :  { %v3128_v23 = vadd.f32 %v3108_v17, %v2960_v38 }
 0x66e   :  { %v3190_v4 = vpop.f32.mrf.mxu2 }
 0x66f   :  { %4418 = vmatmul.msk.f32.gmra.mxu3 %vm2846_vm5, %v3190_v4 }
 0x672   :  { %v3111_v9 = vpop.f32.mrf.mxu1 }
 0x673   :  { %v3129_v0 = vadd.f32 %v3111_v9, %v2963_v12 }
 0x676   :  { %v3193_v55 = vpop.f32.mrf.mxu2 }
 0x677   :  { %4419 = vmatmul.msk.f32.gmra.mxu3 %vm2846_vm5, %v3193_v55 }
 0x67a   :  { %v3114_v41 = vpop.f32.mrf.mxu1 }
 0x67b   :  { %v3130_v1 = vadd.f32 %v3114_v41, %v2966_v8 }
 0x67e   :  { %v3196_v42 = vpop.f32.mrf.mxu2 }
 0x67f   :  { %4420 = vmatmul.msk.f32.gmra.mxu3 %vm2846_vm5, %v3196_v42 }
 0x682   :  { %v3117_v24 = vpop.f32.mrf.mxu1 }
 0x683   :  { %v3131_v20 = vadd.f32 %v3117_v24, %v2969_v49  ;;  %v2957_v49 = vadd.f32 %v6891_v10, %v6889_v31  ;;  %v3468_v24 = vld [vmem:[#allocation7] sm:$0xff] }
 0x685   :  { %v3127_v13 = vadd.f32 %v6900_v36, %v2957_v49 }
 0x686   :  { %v3199_v44 = vpop.f32.mrf.mxu2 }
 0x687   :  { %4421 = vmatmul.msk.f32.gmra.mxu3 %vm2846_vm5, %v3199_v44  ;;  %v3574_v44 = vld [vmem:[%s7196_s9 + $0x58] sm:$0xff] }
 0x68a   :  { %v3120_v56 = vpop.f32.mrf.mxu1 }
 0x68b   :  { %v3132_v5 = vadd.f32 %v3120_v56, %v2972_v22  ;;  %v4463_v56 = vld [vmem:[%s7196_s9 + $0xb8] sm:$0xff] }
 0x68e   :  { %v3202_v59 = vpop.f32.mrf.mxu2 }
 0x68f   :  { %4422 = vmatmul.msk.f32.gmra.mxu3 %vm2846_vm5, %v3202_v59  ;;  %v4462_v59 = vld [vmem:[%s7196_s9 + $0xb0] sm:$0xff] }
 0x692   :  { %v3123_v32 = vpop.f32.mrf.mxu1 }
 0x693   :  { %v3133_v8 = vadd.f32 %v3123_v32, %v2975_v2  ;;  %v4461_v32 = vld [vmem:[%s7196_s9 + $0xa8] sm:$0xff]  ;;  %v3517_v2 = vld [vmem:[#allocation7 + $0x38] sm:$0xff] }
 0x696   :  { %v3205_v45 = vpop.f32.mrf.mxu2 }
 0x697   :  { %4423 = vmatmul.msk.f32.gmra.mxu3 %vm2846_vm5, %v3205_v45  ;;  %v3572_v45 = vld [vmem:[%s7196_s9 + $0x48] sm:$0xff] }
 0x69a   :  { %v3416_v14 = vpop.f32.mrf.mxu1 }
 0x6a2   :  { %v3419_v21 = vpop.f32.mrf.mxu1 }
 0x6aa   :  { %v3422_v6 = vpop.f32.mrf.mxu1 }
 0x6b2   :  { %v3425_v35 = vpop.f32.mrf.mxu1 }
 0x6ba   :  { %v3428_v12 = vpop.f32.mrf.mxu1 }
 0x6c2   :  { %v3431_v60 = vpop.f32.mrf.mxu1 }
 0x6ca   :  { %v3434_v33 = vpop.f32.mrf.mxu1 }
 0x6d2   :  { %v3437_v16 = vpop.f32.mrf.mxu1 }
 0x6e2   :  { %v3259_v11 = vpop.f32.mrf.mxu3 }
 0x6e3   :  { %v3283_v62 = vadd.f32 %v3259_v11, %v3126_v53  ;;  %v3570_v53 = vld [vmem:[%s7196_s9 + $0x38] sm:$0xff] }
 0x6e4   :  { %v4459_v11 = vld [vmem:[%s7196_s9 + $0x98] sm:$0xff] }
 0x6e5   :  { %v3440_v28 = vadd.f32 %v3416_v14, %v3283_v62  ;;  %v3571_v14 = vld [vmem:[%s7196_s9 + $0x40] sm:$0xff]  ;;  %v3569_v62 = vld [vmem:[%s7196_s9 + $0x30] sm:$0xff] }
 0x6e7   :  { %v3452_v41 = vadd.f32 %v4516_v30, %v3440_v28  ;;  %v4458_v28 = vld [vmem:[%s7196_s9 + $0x90] sm:$0xff] }
 0x6e9   :  { %v3460_v47 = vmax.f32 %v3452_v41, 0.0 }
 0x6ea   :  { %v3262_v19 = vpop.f32.mrf.mxu3 }
 0x6eb   :  { %v3284_v7 = vadd.f32 %v3262_v19, %v3127_v13  ;;  %v4457_v19 = vld [vmem:[%s7196_s9 + $0x88] sm:$0xff] }
 0x6ed   :  { %v3441_v10 = vadd.f32 %v3419_v21, %v3284_v7  ;;  %v3469_v21 = vld [vmem:[#allocation7 + $0x8] sm:$0xff]  ;;  %v4474_v7 = vld [vmem:[%s7198_s11 + $0x48] sm:$0xff] }
 0x6f2   :  { %v3265_v27 = vpop.f32.mrf.mxu3 }
 0x6f3   :  { %v3285_v34 = vadd.f32 %v3265_v27, %v3128_v23  ;;  %v3453_v23 = vadd.f32 %v4516_v30, %v3441_v10  ;;  %v3567_v27 = vld [vmem:[%s7196_s9 + $0x20] sm:$0xff] }
 0x6f5   :  { %v3442_v4 = vadd.f32 %v3422_v6, %v3285_v34  ;;  %v3461_v42 = vmax.f32 %v3453_v23, 0.0  ;;  %v3568_v6 = vld [vmem:[%s7196_s9 + $0x28] sm:$0xff] }
 0x6f7   :  { %v3454_v55 = vadd.f32 %v4516_v30, %v3442_v4 }
 0x6fa   :  { %v3268_v63 = vpop.f32.mrf.mxu3 }
 0x6fb   :  { %v3286_v29 = vadd.f32 %v3268_v63, %v3129_v0  ;;  %v3470_v63 = vld [vmem:[#allocation7 + $0x10] sm:$0xff] }
 0x6fd   :  { %v3443_v25 = vadd.f32 %v3425_v35, %v3286_v29  ;;  %v4456_v35 = vld [vmem:[%s7196_s9 + $0x80] sm:$0xff] }
 0x6ff   :  { %v3455_v9 = vadd.f32 %v4516_v30, %v3443_v25  ;;  %v4473_v25 = vld [vmem:[%s7198_s11 + $0x40] sm:$0xff] }
 0x701   :  { %v3463_v51 = vmax.f32 %v3455_v9, 0.0 }
 0x702   :  { %v3271_v58 = vpop.f32.mrf.mxu3 }
 0x703   :  { %v3287_v37 = vadd.f32 %v3271_v58, %v3130_v1  ;;  %v3462_v1 = vmax.f32 %v3454_v55, 0.0  ;;  %v3566_v58 = vld [vmem:[%s7196_s9 + $0x18] sm:$0xff] }
 0x705   :  { %v3444_v50 = vadd.f32 %v3428_v12, %v3287_v37  ;;  %v3516_v12 = vld [vmem:[#allocation7 + $0x30] sm:$0xff] }
 0x707   :  { %v3456_v43 = vadd.f32 %v4516_v30, %v3444_v50 }
 0x709   :  { %v3464_v36 = vmax.f32 %v3456_v43, 0.0 }
 0x70a   :  { %v3274_v40 = vpop.f32.mrf.mxu3 }
 0x70b   :  { %v3288_v15 = vadd.f32 %v3274_v40, %v3131_v20  ;;  %v3514_v20 = vld [vmem:[#allocation7 + $0x20] sm:$0xff]  ;;  %v3565_v40 = vld [vmem:[%s7196_s9 + $0x10] sm:$0xff] }
 0x70d   :  { %v3445_v46 = vadd.f32 %v3431_v60, %v3288_v15  ;;  %v4455_v60 = vld [vmem:[%s7196_s9 + $0x78] sm:$0xff]  ;;  %v3563_v15 = vld [vmem:[%s7196_s9] sm:$0xff] }
 0x70f   :  { %v3457_v38 = vadd.f32 %v4516_v30, %v3445_v46 }
 0x711   :  { %v3465_v0 = vmax.f32 %v3457_v38, 0.0  ;;  %v4472_v38 = vld [vmem:[%s7198_s11 + $0x38] sm:$0xff] }
 0x712   :  { %v3277_v26 = vpop.f32.mrf.mxu3 }
 0x713   :  { %v3289_v57 = vadd.f32 %v3277_v26, %v3132_v5  ;;  %v3573_v5 = vld [vmem:[%s7196_s9 + $0x50] sm:$0xff]  ;;  %v3471_v26 = vld [vmem:[#allocation7 + $0x18] sm:$0xff] }
 0x715   :  { %v3446_v54 = vadd.f32 %v3434_v33, %v3289_v57  ;;  %v4454_v33 = vld [vmem:[%s7196_s9 + $0x70] sm:$0xff]  ;;  %v3564_v57 = vld [vmem:[%s7196_s9 + $0x8] sm:$0xff] }
 0x717   :  { %v3458_v39 = vadd.f32 %v4516_v30, %v3446_v54 }
 0x719   :  { %v3466_v31 = vmax.f32 %v3458_v39, 0.0  ;;  %v4476_v39 = vld [vmem:[%s7198_s11 + $0x58] sm:$0xff] }
 0x71a   :  { %v3280_v3 = vpop.f32.mrf.mxu3 }
 0x71b   :  { %v3290_v48 = vadd.f32 %v3280_v3, %v3133_v8  ;;  %v4453_v8 = vld [vmem:[%s7196_s9 + $0x68] sm:$0xff]  ;;  %v4452_v3 = vld [vmem:[%s7196_s9 + $0x60] sm:$0xff] }
 0x71d   :  { %v3447_v22 = vadd.f32 %v3437_v16, %v3290_v48 }
 0x71f   :  { %v3459_v61 = vadd.f32 %v4516_v30, %v3447_v22 }
 0x721   :  { %v3467_v17 = vmax.f32 %v3459_v61, 0.0  ;;  %v4475_v61 = vld [vmem:[%s7198_s11 + $0x50] sm:$0xff] }
 0x723   :  { %3492 = vmatpush.msra.mxu2 %v3467_v17  ;;  %3538 = vmatpush.msrb.mxu3 %v3467_v17  ;;  %v4471_v17 = vld [vmem:[%s7198_s11 + $0x30] sm:$0xff] }
 0x725   :  { %3493 = vmatpush.msra.mxu2 %v3466_v31  ;;  %3539 = vmatpush.msrb.mxu3 %v3466_v31 }
 0x727   :  { %3494 = vmatpush.msra.mxu2 %v3465_v0  ;;  %3540 = vmatpush.msrb.mxu3 %v3465_v0 }
 0x729   :  { %3495 = vmatpush.msra.mxu2 %v3464_v36  ;;  %3541 = vmatpush.msrb.mxu3 %v3464_v36 }
 0x72b   :  { %3496 = vmatpush.msra.mxu2 %v3463_v51  ;;  %3542 = vmatpush.msrb.mxu3 %v3463_v51 }
 0x72d   :  { %3497 = vmatpush.msra.mxu2 %v3462_v1  ;;  %3543 = vmatpush.msrb.mxu3 %v3462_v1 }
 0x72f   :  { %3498 = vmatpush.msra.mxu2 %v3461_v42  ;;  %3544 = vmatpush.msrb.mxu3 %v3461_v42  ;;  %v4469_v42 = vld [vmem:[%s7197_s10 + $0x8] sm:$0xff] }
 0x731   :  { %3499 = vmatpush.msra.mxu2 %v3460_v47  ;;  %3545 = vmatpush.msrb.mxu3 %v3460_v47  ;;  %v3662_v47 = vld [vmem:[%s7197_s10] sm:$0xff] }
 0x732   :  { %4440 = vmatmul.msk.f32.vlgmr.msra.gmra.mxu2 %vm1835_vm2, %v3468_v24  ;;  %4444 = vmatmul.msk.f32.vlgmr.msrb.gmra.mxu3 %vm1835_vm2, %v3514_v20  ;;  %v4479_v24 = vld [vmem:[%s7197_s10 + $0x10] sm:$0xff]  ;;  %v3692_v20 = vld [vmem:[%s7198_s11 + $0x28] sm:$0xff] }
 0x733   :  { %3591 = vmatpush.msrb.mxu2 %v3574_v44  ;;  %3633 = vmatpush.msra.mxu3 %v4463_v56  ;;  %v3691_v44 = vld [vmem:[%s7198_s11 + $0x20] sm:$0xff]  ;;  %v3690_v56 = vld [vmem:[%s7198_s11 + $0x18] sm:$0xff] }
 0x735   :  { %3592 = vmatpush.msrb.mxu2 %v3573_v5  ;;  %3634 = vmatpush.msra.mxu3 %v4462_v59  ;;  %v3689_v5 = vld [vmem:[%s7198_s11 + $0x10] sm:$0xff]  ;;  %v3688_v59 = vld [vmem:[%s7198_s11 + $0x8] sm:$0xff] }
 0x737   :  { %3593 = vmatpush.msrb.mxu2 %v3572_v45  ;;  %3635 = vmatpush.msra.mxu3 %v4461_v32  ;;  %v4486_v45 = vld [vmem:[%s7198_s11 + $0x88] sm:$0xff]  ;;  %v3687_v32 = vld [vmem:[%s7198_s11] sm:$0xff] }
 0x739   :  { %3594 = vmatpush.msrb.mxu2 %v3571_v14  ;;  %3636 = vmatpush.msra.mxu3 %v4460_v52  ;;  %v4485_v14 = vld [vmem:[%s7198_s11 + $0x80] sm:$0xff]  ;;  %v4484_v52 = vld [vmem:[%s7198_s11 + $0x78] sm:$0xff] }
 0x73a   :  { %4441 = vmatmul.msk.f32.gmra.mxu2 %vm1835_vm2, %v3469_v21  ;;  %4445 = vmatmul.msk.f32.gmra.mxu3 %vm1835_vm2, %v3515_v18  ;;  %v4483_v21 = vld [vmem:[%s7198_s11 + $0x70] sm:$0xff]  ;;  %v4482_v18 = vld [vmem:[%s7198_s11 + $0x68] sm:$0xff] }
 0x73b   :  { %3595 = vmatpush.msrb.mxu2 %v3570_v53  ;;  %3637 = vmatpush.msra.mxu3 %v4459_v11  ;;  %v4495_v53 = vld [vmem:[%s7198_s11 + $0xb8] sm:$0xff]  ;;  %v4481_v11 = vld [vmem:[%s7198_s11 + $0x60] sm:$0xff] }
 0x73d   :  { %3596 = vmatpush.msrb.mxu2 %v3569_v62  ;;  %3638 = vmatpush.msra.mxu3 %v4458_v28 }
 0x73f   :  { %3597 = vmatpush.msrb.mxu2 %v3568_v6  ;;  %3639 = vmatpush.msra.mxu3 %v4457_v19  ;;  %v4488_v6 = vld [vmem:[%s7197_s10 + $0x18] sm:$0xff] }
 0x741   :  { %3598 = vmatpush.msrb.mxu2 %v3567_v27  ;;  %3640 = vmatpush.msra.mxu3 %v4456_v35  ;;  %v4494_v27 = vld [vmem:[%s7198_s11 + $0xb0] sm:$0xff]  ;;  %v4493_v35 = vld [vmem:[%s7198_s11 + $0xa8] sm:$0xff] }
 0x742   :  { %4442 = vmatmul.msk.f32.gmra.mxu2 %vm1835_vm2, %v3470_v63  ;;  %4446 = vmatmul.msk.f32.gmra.mxu3 %vm1835_vm2, %v3516_v12  ;;  %v4492_v63 = vld [vmem:[%s7198_s11 + $0xa0] sm:$0xff]  ;;  %v4491_v12 = vld [vmem:[%s7198_s11 + $0x98] sm:$0xff] }
 0x743   :  { %3599 = vmatpush.msrb.mxu2 %v3566_v58  ;;  %3641 = vmatpush.msra.mxu3 %v4455_v60  ;;  %v4490_v58 = vld [vmem:[%s7198_s11 + $0x90] sm:$0xff] }
 0x744   :  { %v3904_v60 = vld [vmem:[%s7200_s13 + $0x70] sm:$0xff] }
 0x745   :  { %3600 = vmatpush.msrb.mxu2 %v3565_v40  ;;  %3642 = vmatpush.msra.mxu3 %v4454_v33  ;;  %v3903_v40 = vld [vmem:[%s7200_s13 + $0x68] sm:$0xff]  ;;  %v3902_v33 = vld [vmem:[%s7200_s13 + $0x60] sm:$0xff] }
 0x747   :  { %3601 = vmatpush.msrb.mxu2 %v3564_v57  ;;  %3643 = vmatpush.msra.mxu3 %v4453_v8  ;;  %v3899_v57 = vld [vmem:[%s7200_s13 + $0x48] sm:$0xff]  ;;  %v3898_v8 = vld [vmem:[%s7200_s13 + $0x40] sm:$0xff] }
 0x749   :  { %3602 = vmatpush.msrb.mxu2 %v3563_v15  ;;  %3644 = vmatpush.msra.mxu3 %v4452_v3  ;;  %v3897_v15 = vld [vmem:[%s7200_s13 + $0x38] sm:$0xff]  ;;  %v3896_v3 = vld [vmem:[%s7200_s13 + $0x30] sm:$0xff] }
 0x74a   :  { %4443 = vmatmul.msk.f32.gmra.mxu2 %vm1835_vm2, %v3471_v26  ;;  %4447 = vmatmul.msk.f32.gmra.mxu3 %vm1835_vm2, %v3517_v2  ;;  %v3901_v26 = vld [vmem:[%s7200_s13 + $0x58] sm:$0xff]  ;;  %v3900_v2 = vld [vmem:[%s7200_s13 + $0x50] sm:$0xff] }
 0x74b   :  { %3739 = vmatpush.msra.mxu2 %v4476_v39  ;;  %3762 = vmatpush.msrb.mxu3 %v3692_v20  ;;  %v3937_v39 = vld [vmem:[%s7202_s15 + $0x18] sm:$0xff] }
 0x74d   :  { %3740 = vmatpush.msra.mxu2 %v4475_v61  ;;  %3763 = vmatpush.msrb.mxu3 %v3691_v44 }
 0x74f   :  { %3741 = vmatpush.msra.mxu2 %v4474_v7  ;;  %3764 = vmatpush.msrb.mxu3 %v3690_v56 }
 0x751   :  { %3742 = vmatpush.msra.mxu2 %v4473_v25  ;;  %3765 = vmatpush.msrb.mxu3 %v3689_v5 }
 0x753   :  { %3743 = vmatpush.msra.mxu2 %v4472_v38  ;;  %3766 = vmatpush.msrb.mxu3 %v3688_v59 }
 0x755   :  { %3744 = vmatpush.msra.mxu2 %v4471_v17  ;;  %3767 = vmatpush.msrb.mxu3 %v3687_v32  ;;  %v4517_v17 = vld [vmem:[%s7199_s12] ss:$0 sm:$0xff] }
 0x7b5   :  { %v3501_v16 = vpop.f32.mrf.mxu2  ;;  %v3547_v37 = vpop.f32.mrf.mxu3 }
 0x7b6   :  { %v3559_v54 = vmax.f32 %v3501_v16, %v3547_v37  ;;  %v3895_v16 = vld [vmem:[%s7200_s13 + $0x28] sm:$0xff]  ;;  %v3894_v37 = vld [vmem:[%s7200_s13 + $0x20] sm:$0xff] }
 0x7b8   :  { %4448 = vmatmul.msk.f32.vlgmr.msrb.gmra.mxu2 %vm2687_vm4, %v3559_v54  ;;  %4464 = vmatmul.msk.f32.vlgmr.msra.gmra.mxu3 %vm2687_vm4, %v3559_v54 }
 0x7b9   :  { %3873 = vmatpush.msra.mxu3 %v4495_v53 }
 0x7bb   :  { %3874 = vmatpush.msra.mxu3 %v4494_v27 }
 0x7bd   :  { %v3504_v48 = vpop.f32.mrf.mxu2  ;;  %v3550_v49 = vpop.f32.mrf.mxu3  ;;  %3875 = vmatpush.msra.mxu3 %v4493_v35 }
 0x7be   :  { %v3560_v30 = vmax.f32 %v3504_v48, %v3550_v49  ;;  %v3893_v49 = vld [vmem:[%s7200_s13 + $0x18] sm:$0xff] }
 0x7bf   :  { %3876 = vmatpush.msra.mxu3 %v4492_v63 }
 0x7c0   :  { %4449 = vmatmul.msk.f32.gmra.mxu2 %vm2687_vm4, %v3560_v30  ;;  %4465 = vmatmul.msk.f32.gmra.mxu3 %vm2687_vm4, %v3560_v30  ;;  %v3892_v30 = vld [vmem:[%s7200_s13 + $0x10] sm:$0xff] }
 0x7c1   :  { %3877 = vmatpush.msra.mxu3 %v4491_v12 }
 0x7c3   :  { %3878 = vmatpush.msra.mxu3 %v4490_v58 }
 0x7c5   :  { %v3507_v29 = vpop.f32.mrf.mxu2  ;;  %v3553_v46 = vpop.f32.mrf.mxu3 }
 0x7c6   :  { %v3561_v22 = vmax.f32 %v3507_v29, %v3553_v46  ;;  %v3891_v29 = vld [vmem:[%s7200_s13 + $0x8] sm:$0xff]  ;;  %v3890_v46 = vld [vmem:[%s7200_s13] sm:$0xff] }
 0x7c8   :  { %4450 = vmatmul.msk.f32.gmra.mxu2 %vm2687_vm4, %v3561_v22  ;;  %4466 = vmatmul.msk.f32.gmra.mxu3 %vm2687_vm4, %v3561_v22  ;;  %v3941_v22 = vld [vmem:[%s7202_s15 + $0x38] sm:$0xf] }
 0x7cd   :  { %v3510_v13 = vpop.f32.mrf.mxu2  ;;  %v3556_v34 = vpop.f32.mrf.mxu3 }
 0x7ce   :  { %v3562_v50 = vmax.f32 %v3510_v13, %v3556_v34  ;;  %v3940_v13 = vld [vmem:[%s7202_s15 + $0x30] sm:$0xff]  ;;  %v3939_v34 = vld [vmem:[%s7202_s15 + $0x28] sm:$0xff] }
 0x7d0   :  { %4451 = vmatmul.msk.f32.gmra.mxu2 %vm2687_vm4, %v3562_v50  ;;  %4467 = vmatmul.msk.f32.gmra.mxu3 %vm2687_vm4, %v3562_v50  ;;  %v3938_v50 = vld [vmem:[%s7202_s15 + $0x20] sm:$0xff] }
 0x83b   :  { %v3604_v4 = vpop.f32.mrf.mxu2  ;;  %v3646_v43 = vpop.f32.mrf.mxu3 }
 0x83c   :  { %v3658_v1 = vmax.f32 %v3604_v4, %v3646_v43 }
 0x843   :  { %v3607_v31 = vpop.f32.mrf.mxu2  ;;  %v3649_v10 = vpop.f32.mrf.mxu3 }
 0x844   :  { %v3659_v41 = vmax.f32 %v3607_v31, %v3649_v10 }
 0x84b   :  { %v3610_v9 = vpop.f32.mrf.mxu2  ;;  %v3652_v0 = vpop.f32.mrf.mxu3 }
 0x84c   :  { %v3660_v51 = vmax.f32 %v3610_v9, %v3652_v0  ;;  %v3936_v9 = vld [vmem:[%s7202_s15 + $0x10] sm:$0xff]  ;;  %v3935_v0 = vld [vmem:[%s7202_s15 + $0x8] sm:$0xff] }
 0x853   :  { %v3613_v55 = vpop.f32.mrf.mxu2  ;;  %v3655_v36 = vpop.f32.mrf.mxu3 }
 0x854   :  { %v3661_v23 = vmax.f32 %v3613_v55, %v3655_v36  ;;  %v3934_v55 = vld [vmem:[%s7202_s15] sm:$0xff] }
 0x855   :  { %v4518_v36 = vld [vmem:[%s7201_s14] ss:$0 sm:$0xff] }
 0x856   :  { %3710 = vmatpush.msrb.mxu1 %v3661_v23  ;;  %3679 = vmatpush.msra.mxu0 %v3661_v23 }
 0x857   :  { %3845 = vmatpush.msrb.mxu2 %v3661_v23 }
 0x858   :  { %3711 = vmatpush.msrb.mxu1 %v3660_v51  ;;  %3680 = vmatpush.msra.mxu0 %v3660_v51 }
 0x859   :  { %3846 = vmatpush.msrb.mxu2 %v3660_v51 }
 0x85a   :  { %3712 = vmatpush.msrb.mxu1 %v3659_v41  ;;  %3681 = vmatpush.msra.mxu0 %v3659_v41 }
 0x85b   :  { %3847 = vmatpush.msrb.mxu2 %v3659_v41 }
 0x85c   :  { %3713 = vmatpush.msrb.mxu1 %v3658_v1  ;;  %3682 = vmatpush.msra.mxu0 %v3658_v1 }
 0x85d   :  { %4470 = vmatmul.msk.f32.vlgmr.msrb.gmra.mxu1 %vm3663_vm6, %v4469_v42  ;;  %3848 = vmatpush.msrb.mxu2 %v3658_v1 }
 0x85e   :  { %3789 = vmatpush.msrb.mxu0 %v3661_v23  ;;  %3817 = vmatpush.msra.mxu1 %v4486_v45 }
 0x85f   :  { %4468 = vmatmul.msk.f32.vlgmr.msra.gmra.mxu0 %vm3663_vm6, %v3662_v47 }
 0x860   :  { %3790 = vmatpush.msrb.mxu0 %v3660_v51  ;;  %3818 = vmatpush.msra.mxu1 %v4485_v14 }
 0x862   :  { %3791 = vmatpush.msrb.mxu0 %v3659_v41  ;;  %3819 = vmatpush.msra.mxu1 %v4484_v52 }
 0x864   :  { %3792 = vmatpush.msrb.mxu0 %v3658_v1  ;;  %3820 = vmatpush.msra.mxu1 %v4483_v21  ;;  %v4519_v1 = vld [vmem:[%s7203_s16] ss:$0 sm:$0xff]  ;;  %s7437_s16 = sld [smem:[#allocation116_spill]] }
 0x866   :  { %3821 = vmatpush.msra.mxu1 %v4482_v18  ;;  %3914 = vmatpush.msra.mxu0 %v3904_v60 }
 0x867   :  { %4480 = vmatmul.msk.f32.vlgmr.msrb.gmra.mxu0 %vm3663_vm6, %v4479_v24 }
 0x868   :  { %3822 = vmatpush.msra.mxu1 %v4481_v11  ;;  %3915 = vmatpush.msra.mxu0 %v3903_v40 }
 0x86a   :  { %3916 = vmatpush.msra.mxu0 %v3902_v33 }
 0x86c   :  { %3917 = vmatpush.msra.mxu0 %v3901_v26 }
 0x86e   :  { %3918 = vmatpush.msra.mxu0 %v3900_v2 }
 0x870   :  { %3919 = vmatpush.msra.mxu0 %v3899_v57 }
 0x872   :  { %3920 = vmatpush.msra.mxu0 %v3898_v8 }
 0x874   :  { %3921 = vmatpush.msra.mxu0 %v3897_v15 }
 0x876   :  { %3922 = vmatpush.msra.mxu0 %v3896_v3 }
 0x878   :  { %3923 = vmatpush.msra.mxu0 %v3895_v16 }
 0x87a   :  { %3924 = vmatpush.msra.mxu0 %v3894_v37 }
 0x87c   :  { %3925 = vmatpush.msra.mxu0 %v3893_v49 }
 0x87e   :  { %3926 = vmatpush.msra.mxu0 %v3892_v30 }
 0x880   :  { %3927 = vmatpush.msra.mxu0 %v3891_v29 }
 0x882   :  { %3928 = vmatpush.msra.mxu0 %v3890_v46 }
 0x8da   :  { %v3715_v62 = vpop.f32.mrf.mxu1 }
 0x8db   :  { %4477 = vmatmul.msk.f32.vlgmr.msra.gmra.mxu2 %vm3725_vm7, %v3715_v62 }
 0x8dc   :  { %v3684_v28 = vpop.f32.mrf.mxu0  ;;  %4498 = vmatpush.msk.msra.mxu2 %vm257_vm0, %v3941_v22 }
 0x8dd   :  { %4478 = vmatmul.msk.f32.vlgmr.msrb.gmra.mxu3 %vm3725_vm7, %v3684_v28 }
 0x8de   :  { %3962 = vmatpush.msra.mxu2 %v3940_v13 }
 0x8e0   :  { %3963 = vmatpush.msra.mxu2 %v3939_v34 }
 0x8e2   :  { %3964 = vmatpush.msra.mxu2 %v3938_v50 }
 0x8e3   :  { %4489 = vmatmul.msk.f32.vlgmr.msrb.gmra.mxu2 %vm3663_vm6, %v4488_v6 }
 0x8e4   :  { %v3794_v19 = vpop.f32.mrf.mxu0  ;;  %3965 = vmatpush.msra.mxu2 %v3937_v39 }
 0x8e5   :  { %4487 = vmatmul.msk.f32.vlgmr.msra.gmra.mxu1 %vm3725_vm7, %v3794_v19 }
 0x8e6   :  { %3966 = vmatpush.msra.mxu2 %v3936_v9 }
 0x8e8   :  { %3967 = vmatpush.msra.mxu2 %v3935_v0 }
 0x8ea   :  { %3968 = vmatpush.msra.mxu2 %v3934_v55 }
 0x95e   :  { %v3746_v54 = vpop.f32.mrf.mxu2 }
 0x960   :  { %v3769_v61 = vpop.f32.mrf.mxu3 }
 0x961   :  { %v3770_v7 = vadd.f32 %v3769_v61, %v3746_v54 }
 0x962   :  { %v3824_v25 = vpop.f32.mrf.mxu1 }
 0x963   :  { %v3827_v38 = vadd.f32 %v3824_v25, %v3770_v7 }
 0x966   :  { %v3850_v48 = vpop.f32.mrf.mxu2 }
 0x967   :  { %4496 = vmatmul.msk.f32.vlgmr.msra.gmra.mxu3 %vm3725_vm7, %v3850_v48 }
 0x9ea   :  { %v3880_v4 = vpop.f32.mrf.mxu3 }
 0x9eb   :  { %v3883_v43 = vadd.f32 %v3880_v4, %v3827_v38 }
 0x9ed   :  { %v3888_v31 = vadd.f32 %v4517_v17, %v3883_v43 }
 0x9ef   :  { %v3889_v10 = vmax.f32 %v3888_v31, 0.0 }
 0x9f1   :  { %4497 = vmatmul.msk.f32.vlgmr.msra.gmra.mxu0 %vm3909_vm8, %v3889_v10 }
 0xa6e   :  { %v3930_v23 = vpop.f32.mrf.mxu0 }
 0xa6f   :  { %v3931_v51 = vadd.f32 %v4518_v36, %v3930_v23 }
 0xa71   :  { %v3933_v41 = vmax.f32 %v3931_v51, 0.0 }
 0xa73   :  { %4499 = vmatmul.msk.f32.vlgmr.msra.gmra.mxu2 %vm3946_vm9, %v3933_v41 }
 0xaf6   :  { %v3970_v42 = vpop.f32.mrf.mxu2 }
 0xaf7   :  { %v3971_v47 = vadd.f32 %v4519_v1, %v3970_v42 }
 0xaf9   :  { %v3974_v24 = vsel %vm3973_vm10, %v3971_v47, -inf }
 0xafa   :  { %3975 = vmax.xlane.f32.xlu0 %v3974_v24 }
 0xb6d   :  { %v3976_v20 = vpop.xlane.xlu0 %3975 }
 0xb6e   :  { %v3977_v44 = vsub.f32 %v3971_v47, %v3976_v20 }
 0xb70   :  { %v3978_v56 = vmul.f32 1.442695, %v3977_v44 }
 0xb72   :  { %4520 = vpow2.f32 %v3978_v56 }
 0xb78   :  { %v4521_v5 = vpop.eup %4520 }
 0xb79   :  { %v3980_v59 = vsel %vm3973_vm10, %v4521_v5, 0.0 }
 0xb7a   :  { %3981 = vadd.xlane.f32.xlu0 %v3980_v59 }
 0xbed   :  { %v3982_v45 = vpop.xlane.xlu0 %3981 }
 0xbee   :  { %4522 = vrcp.f32 %v3982_v45 }
 0xbf4   :  { %v4523_v32 = vpop.eup %4522 }
 0xbf5   :  { %v3984_v14 = vmul.f32 %v4523_v32, %v3982_v45 }
 0xbf7   :  { %v3985_v52 = vsub.f32 2.0, %v3984_v14 }
 0xbf9   :  { %v3986_v21 = vmul.f32 %v4523_v32, %v3985_v52 }
 0xbfb   :  { %v3987_v18 = vmul.f32 %v4521_v5, %v3986_v21 }
 0xbfd   :  { %3988 = vst.msk [vmem:[%s7437_s16] sm:$0xff] %vm3973_vm10, %v3987_v18 }
 0xbfe   :  { %3993 = vsyncpa [#allocation3], 1 }
 0xbff   :  { %3994 = vsyncpa [#allocation5], 1 }
 0xc00   :  { %3995 = vsyncpa [#allocation8], 1 }

</bundles_post_ra>
